<compile_context>
chip_gen: v7x
topology: tpu7x:2x2x1
jax: 0.10.0
libtpu: 0.0.40
codegen_flags: <defaults>
</compile_context>

<pallas_src>
import functools

import jax
import jax.numpy as jnp
from jax import lax
from jax.experimental import pallas as pl
from jax.experimental.pallas import tpu as pltpu

INPUT_SIZE = 13
HIDDEN = 256
FC1_DIM = 128
NUM_CLASSES = 10
CLASS_PAD = 128          # lane-dense output width; real classes live in [:NUM_CLASSES]
NEG_BIG = -1e30          # bias padding so softmax over padded lanes is exact


def _round_up(x, m):
    return (x + m - 1) // m * m


def _lstm_chunk_kernel(zx_ref, whh_ref, w1_ref, b1_ref, w2_ref, b2_ref,
                       out_ref, h_ref, c_ref,
                       *, tc: int, use_last_layer: bool):
    """One (batch-tile, time-chunk) grid step.

    zx_ref : (Tc, Bt, 4H)  precomputed x@W_ih + b_ih + b_hh (time-major chunk)
    whh_ref: (H, 4H)       recurrent weights (transposed, PyTorch gate order i,f,g,o)
    w1_ref : (H, 128), b1_ref: (1, 128)
    w2_ref : (128, 128)    fc2 weights zero-padded to 128 classes
    b2_ref : (1, 128)      fc2 bias, padded classes set to -1e30
    out_ref: (Bt, 128)     padded class probabilities / logits
    h_ref, c_ref: (Bt, H)  f32 carry, persistent across the time grid axis
    """
    H = whh_ref.shape[0]
    ti = pl.program_id(1)
    mm_dtype = whh_ref.dtype

    @pl.when(ti == 0)
    def _init():
        h_ref[...] = jnp.zeros_like(h_ref)
        c_ref[...] = jnp.zeros_like(c_ref)

    def step(t, carry):
        h, c = carry
        z = (zx_ref[t].astype(jnp.float32)
             + jnp.dot(h.astype(mm_dtype), whh_ref[...],
                       preferred_element_type=jnp.float32))      # (Bt, 4H)
        # PyTorch LSTM gate order: i, f, g, o  (all elementwise math in f32)
        i = jax.nn.sigmoid(z[:, 0:H])
        f = jax.nn.sigmoid(z[:, H:2 * H])
        g = jnp.tanh(z[:, 2 * H:3 * H])
        o = jax.nn.sigmoid(z[:, 3 * H:4 * H])
        c_new = f * c + i * g
        h_new = o * jnp.tanh(c_new)
        return h_new, c_new

    h, c = lax.fori_loop(0, tc, step, (h_ref[...], c_ref[...]), unroll=True)
    h_ref[...] = h
    c_ref[...] = c

    @pl.when(ti == pl.num_programs(1) - 1)
    def _epilogue():
        y1 = (jnp.dot(h.astype(mm_dtype), w1_ref[...],
                      preferred_element_type=jnp.float32)
              + b1_ref[...].astype(jnp.float32))
        y2 = (jnp.dot(y1.astype(mm_dtype), w2_ref[...],
                      preferred_element_type=jnp.float32)
              + b2_ref[...].astype(jnp.float32))
        if use_last_layer:
            # softmax over dim=1 of (B, 10); padded lanes carry -1e30 -> exp==0
            y2 = y2 - jnp.max(y2, axis=-1, keepdims=True)
            e = jnp.exp(y2)
            y2 = e / jnp.sum(e, axis=-1, keepdims=True)
        out_ref[...] = y2.astype(out_ref.dtype)


def init_params(key):
    """Deterministic init mirroring PyTorch's default U(-1/sqrt(H), 1/sqrt(H))."""
    ks = jax.random.split(key, 10)
    s_lstm = 1.0 / jnp.sqrt(jnp.float32(HIDDEN))
    s_fc1 = 1.0 / jnp.sqrt(jnp.float32(HIDDEN))
    s_fc2 = 1.0 / jnp.sqrt(jnp.float32(FC1_DIM))
    u = lambda k, shape, s: jax.random.uniform(k, shape, jnp.float32, -s, s)
    return {
        # stored already transposed: (in, out)
        "w_ih": u(ks[0], (INPUT_SIZE, 4 * HIDDEN), s_lstm),
        "w_hh": u(ks[1], (HIDDEN, 4 * HIDDEN), s_lstm),
        "b_ih": u(ks[2], (1, 4 * HIDDEN), s_lstm),
        "b_hh": u(ks[3], (1, 4 * HIDDEN), s_lstm),
        "w_fc1": u(ks[4], (HIDDEN, FC1_DIM), s_fc1),
        "b_fc1": u(ks[5], (1, FC1_DIM), s_fc1),
        "w_fc2": u(ks[6], (FC1_DIM, NUM_CLASSES), s_fc2),
        "b_fc2": u(ks[7], (1, NUM_CLASSES), s_fc2),
    }


@functools.partial(jax.jit,
                   static_argnames=("use_last_layer", "matmul_dtype", "time_chunk"))
def rnn_model_forward(x, params, use_last_layer=True,
                      matmul_dtype=jnp.float32, time_chunk=8):
    """x: (B, T, 13) batch-first, like the PyTorch module. Returns (B, 10).

    Pass matmul_dtype=jnp.bfloat16 on v6e/v7x for 2x MXU rate (f32 accumulation
    and f32 h/c carry are kept inside the kernel).
    """
    B, T, D = x.shape
    assert D == INPUT_SIZE
    x = x.astype(jnp.float32)

    # ---- pad batch to fill f32 sublanes / tile it for the parallel grid axis ----
    B_pad = _round_up(max(B, 8), 8)
    if B_pad <= 256:
        Bt = B_pad
    else:
        Bt = 256
        B_pad = _round_up(B, Bt)
    n_b = B_pad // Bt
    if B_pad != B:
        x = jnp.pad(x, ((0, B_pad - B), (0, 0), (0, 0)))

    # ---- hoist the input projection out of the recurrence: one big matmul ----
    b_lstm = (params["b_ih"] + params["b_hh"]).astype(jnp.float32)            # (1, 4H)
    zx = jnp.einsum("btd,dg->btg", x, params["w_ih"].astype(jnp.float32)) + b_lstm
    zx = jnp.transpose(zx, (1, 0, 2))                                          # (T, B_pad, 4H)

    # ---- pad T at the FRONT (z=0 with h=c=0 is an exact no-op LSTM step) ----
    Tc = min(int(time_chunk), T)
    T_pad = _round_up(T, Tc)
    if T_pad != T:
        zx = jnp.pad(zx, ((T_pad - T, 0), (0, 0), (0, 0)))
    n_t = T_pad // Tc

    zx = zx.astype(matmul_dtype)
    w_hh = params["w_hh"].astype(matmul_dtype)
    w_fc1 = params["w_fc1"].astype(matmul_dtype)
    b_fc1 = params["b_fc1"].astype(jnp.float32)

    # ---- pad fc2 to a lane-dense 128-wide output ----
    w_fc2 = jnp.zeros((FC1_DIM, CLASS_PAD), matmul_dtype)
    w_fc2 = w_fc2.at[:, :NUM_CLASSES].set(params["w_fc2"].astype(matmul_dtype))
    b_fc2 = jnp.full((1, CLASS_PAD), NEG_BIG, jnp.float32)
    b_fc2 = b_fc2.at[:, :NUM_CLASSES].set(params["b_fc2"].astype(jnp.float32))

    kernel = functools.partial(_lstm_chunk_kernel, tc=Tc,
                               use_last_layer=use_last_layer)
    H4 = 4 * HIDDEN

    out = pl.pallas_call(
        kernel,
        out_shape=jax.ShapeDtypeStruct((B_pad, CLASS_PAD), jnp.float32),
        grid_spec=pltpu.PrefetchScalarGridSpec(
            num_scalar_prefetch=0,
            grid=(n_b, n_t),
            in_specs=[
                pl.BlockSpec((Tc, Bt, H4), lambda bi, ti: (ti, bi, 0)),     # Z_x chunk
                pl.BlockSpec((HIDDEN, H4), lambda bi, ti: (0, 0)),          # W_hh
                pl.BlockSpec((HIDDEN, FC1_DIM), lambda bi, ti: (0, 0)),     # W_fc1
                pl.BlockSpec((1, FC1_DIM), lambda bi, ti: (0, 0)),          # b_fc1
                pl.BlockSpec((FC1_DIM, CLASS_PAD), lambda bi, ti: (0, 0)),  # W_fc2 (padded)
                pl.BlockSpec((1, CLASS_PAD), lambda bi, ti: (0, 0)),        # b_fc2 (padded)
            ],
            out_specs=pl.BlockSpec((Bt, CLASS_PAD), lambda bi, ti: (bi, 0)),
            scratch_shapes=[pltpu.VMEM((Bt, HIDDEN), jnp.float32),          # h carry
                            pltpu.VMEM((Bt, HIDDEN), jnp.float32)],         # c carry
        ),
        compiler_params=pltpu.CompilerParams(
            dimension_semantics=("parallel", "arbitrary"),
            vmem_limit_bytes=32 * 1024 * 1024,
        ),
    )(zx, w_hh, w_fc1, b_fc1, w_fc2, b_fc2)

    return out[:B, :NUM_CLASSES]


def _reference_forward(x, params, use_last_layer=True):
    """Pure-JAX f32 reference mirroring the PyTorch module."""
    b = params["b_ih"] + params["b_hh"]
    B, T, _ = x.shape
    h = jnp.zeros((B, HIDDEN), jnp.float32)
    c = jnp.zeros((B, HIDDEN), jnp.float32)
    for t in range(T):
        z = x[:, t, :] @ params["w_ih"] + h @ params["w_hh"] + b
        i = jax.nn.sigmoid(z[:, 0:HIDDEN])
        f = jax.nn.sigmoid(z[:, HIDDEN:2 * HIDDEN])
        g = jnp.tanh(z[:, 2 * HIDDEN:3 * HIDDEN])
        o = jax.nn.sigmoid(z[:, 3 * HIDDEN:4 * HIDDEN])
        c = f * c + i * g
        h = o * jnp.tanh(c)
    y = h @ params["w_fc1"] + params["b_fc1"]
    y = y @ params["w_fc2"] + params["b_fc2"]
    if use_last_layer:
        y = jax.nn.softmax(y, axis=1)
    return y


if __name__ == "__main__":
    key = jax.random.PRNGKey(0)
    k_param, k_x = jax.random.split(key)

    B, T = 2, 8
    params = init_params(k_param)
    x = jax.random.normal(k_x, (B, T, INPUT_SIZE), jnp.float32)

    out = rnn_model_forward(x, params, use_last_layer=True)
    out = jax.block_until_ready(out)

    ref = _reference_forward(x, params, use_last_layer=True)
    assert out.shape == (B, NUM_CLASSES)
    assert jnp.allclose(out, ref, atol=1e-5, rtol=1e-5), "mismatch vs reference"

    # also sanity-check the use_last_layer=False path (raw logits)
    out_logits = jax.block_until_ready(
        rnn_model_forward(x, params, use_last_layer=False))
    ref_logits = _reference_forward(x, params, use_last_layer=False)
    assert jnp.allclose(out_logits, ref_logits, atol=1e-4, rtol=1e-5), "logit mismatch"

    print("KERNEL_OK")
</pallas_src>

<mosaic_0001>
module attributes {stable_mosaic.version = 11 : i64} {
  func.func @_lstm_chunk_kernel(%arg0: i32, %arg1: i32, %arg2: memref<8x8x1024xf32, #tpu.memory_space<vmem>>, %arg3: memref<256x1024xf32, #tpu.memory_space<vmem>>, %arg4: memref<256x128xf32, #tpu.memory_space<vmem>>, %arg5: memref<1x128xf32, #tpu.memory_space<vmem>>, %arg6: memref<128x128xf32, #tpu.memory_space<vmem>>, %arg7: memref<1x128xf32, #tpu.memory_space<vmem>>, %arg8: memref<8x128xf32, #tpu.memory_space<vmem>>, %arg9: memref<8x256xf32, #tpu.memory_space<vmem>>, %arg10: memref<8x256xf32, #tpu.memory_space<vmem>>) attributes {dimension_semantics = [#tpu.dimension_semantics<parallel>, #tpu.dimension_semantics<arbitrary>], iteration_bounds = array<i64: 1, 1>, scalar_prefetch = 0 : i64, scratch_operands = 2 : i64, tpu.core_type = #tpu.core_type<tc>, window_params = [{transform_indices = @transform_0, window_bounds = array<i64: 8, 8, 1024>}, {pipeline_mode = #tpu.pipeline_mode<synchronous>, transform_indices = @transform_1, window_bounds = array<i64: 256, 1024>}, {pipeline_mode = #tpu.pipeline_mode<synchronous>, transform_indices = @transform_2, window_bounds = array<i64: 256, 128>}, {pipeline_mode = #tpu.pipeline_mode<synchronous>, transform_indices = @transform_3, window_bounds = array<i64: 1, 128>}, {pipeline_mode = #tpu.pipeline_mode<synchronous>, transform_indices = @transform_4, window_bounds = array<i64: 128, 128>}, {pipeline_mode = #tpu.pipeline_mode<synchronous>, transform_indices = @transform_5, window_bounds = array<i64: 1, 128>}, {transform_indices = @transform_6, window_bounds = array<i64: 8, 128>}]} {
    %c0_i32 = arith.constant 0 : i32
    %0 = arith.cmpi eq, %arg1, %c0_i32 : i32
    %1 = arith.extui %0 : i1 to i32
    %c0_i32_0 = arith.constant 0 : i32
    %2 = arith.cmpi ne, %1, %c0_i32_0 : i32
    scf.if %2 {
      %cst_74 = arith.constant 0.000000e+00 : f32
      %258 = vector.broadcast %cst_74 : f32 to vector<8x256xf32>
      %c0_75 = arith.constant 0 : index
      %c0_76 = arith.constant 0 : index
      %259 = vector.load %arg9[%c0_75, %c0_76] : memref<8x256xf32, #tpu.memory_space<vmem>>, vector<8x256xf32>
      tpu.vector_store %arg9[%c0_75, %c0_76], %258 {strides = array<i32>} : memref<8x256xf32, #tpu.memory_space<vmem>>, vector<8x256xf32>,
      %cst_77 = arith.constant 0.000000e+00 : f32
      %260 = vector.broadcast %cst_77 : f32 to vector<8x256xf32>
      %c0_78 = arith.constant 0 : index
      %c0_79 = arith.constant 0 : index
      %261 = vector.load %arg10[%c0_78, %c0_79] : memref<8x256xf32, #tpu.memory_space<vmem>>, vector<8x256xf32>
      tpu.vector_store %arg10[%c0_78, %c0_79], %260 {strides = array<i32>} : memref<8x256xf32, #tpu.memory_space<vmem>>, vector<8x256xf32>,
    } else {
    }
    %c0 = arith.constant 0 : index
    %c0_1 = arith.constant 0 : index
    %3 = vector.load %arg9[%c0, %c0_1] : memref<8x256xf32, #tpu.memory_space<vmem>>, vector<8x256xf32>
    %c0_2 = arith.constant 0 : index
    %c0_3 = arith.constant 0 : index
    %4 = vector.load %arg10[%c0_2, %c0_3] : memref<8x256xf32, #tpu.memory_space<vmem>>, vector<8x256xf32>
    %c0_i32_4 = arith.constant 0 : i32
    %5 = arith.index_cast %c0_i32_4 : i32 to index
    %c0_5 = arith.constant 0 : index
    %c0_6 = arith.constant 0 : index
    %6 = vector.load %arg2[%5, %c0_5, %c0_6] : memref<8x8x1024xf32, #tpu.memory_space<vmem>>, vector<1x8x1024xf32>
    %7 = vector.shape_cast %6 : vector<1x8x1024xf32> to vector<8x1024xf32>
    %c0_7 = arith.constant 0 : index
    %c0_8 = arith.constant 0 : index
    %8 = vector.load %arg3[%c0_7, %c0_8] : memref<256x1024xf32, #tpu.memory_space<vmem>>, vector<256x1024xf32>
    %cst = arith.constant dense<0.000000e+00> : vector<8x1024xf32>
    %9 = tpu.matmul %3, %8, %cst {dimension_numbers = #tpu.dot_dimension_numbers<[1], [0], [0], [1], [0, 0, 1, 1], [], []>} : vector<8x256xf32>, vector<256x1024xf32>, vector<8x1024xf32> -> vector<8x1024xf32>
    %10 = arith.addf %7, %9 : vector<8x1024xf32>
    %11 = vector.extract_strided_slice %10 {offsets = [0, 0], sizes = [8, 256], strides = [1, 1]} : vector<8x1024xf32> to vector<8x256xf32>
    %12 = arith.negf %11 : vector<8x256xf32>
    %13 = math.exp %12 : vector<8x256xf32>
    %cst_9 = arith.constant 1.000000e+00 : f32
    %14 = vector.broadcast %cst_9 : f32 to vector<8x256xf32>
    %15 = arith.addf %14, %13 : vector<8x256xf32>
    %16 = arith.divf %14, %15 : vector<8x256xf32>
    %17 = vector.extract_strided_slice %10 {offsets = [0, 256], sizes = [8, 256], strides = [1, 1]} : vector<8x1024xf32> to vector<8x256xf32>
    %18 = arith.negf %17 : vector<8x256xf32>
    %19 = math.exp %18 : vector<8x256xf32>
    %cst_10 = arith.constant 1.000000e+00 : f32
    %20 = vector.broadcast %cst_10 : f32 to vector<8x256xf32>
    %21 = arith.addf %20, %19 : vector<8x256xf32>
    %22 = arith.divf %20, %21 : vector<8x256xf32>
    %23 = vector.extract_strided_slice %10 {offsets = [0, 512], sizes = [8, 256], strides = [1, 1]} : vector<8x1024xf32> to vector<8x256xf32>
    %24 = math.tanh %23 : vector<8x256xf32>
    %25 = vector.extract_strided_slice %10 {offsets = [0, 768], sizes = [8, 256], strides = [1, 1]} : vector<8x1024xf32> to vector<8x256xf32>
    %26 = arith.negf %25 : vector<8x256xf32>
    %27 = math.exp %26 : vector<8x256xf32>
    %cst_11 = arith.constant 1.000000e+00 : f32
    %28 = vector.broadcast %cst_11 : f32 to vector<8x256xf32>
    %29 = arith.addf %28, %27 : vector<8x256xf32>
    %30 = arith.divf %28, %29 : vector<8x256xf32>
    %31 = arith.mulf %22, %4 : vector<8x256xf32>
    %32 = arith.mulf %16, %24 : vector<8x256xf32>
    %33 = arith.addf %31, %32 : vector<8x256xf32>
    %34 = math.tanh %33 : vector<8x256xf32>
    %35 = arith.mulf %30, %34 : vector<8x256xf32>
    %c1_i32 = arith.constant 1 : i32
    %36 = arith.index_cast %c1_i32 : i32 to index
    %c0_12 = arith.constant 0 : index
    %c0_13 = arith.constant 0 : index
    %37 = vector.load %arg2[%36, %c0_12, %c0_13] : memref<8x8x1024xf32, #tpu.memory_space<vmem>>, vector<1x8x1024xf32>
    %38 = vector.shape_cast %37 : vector<1x8x1024xf32> to vector<8x1024xf32>
    %c0_14 = arith.constant 0 : index
    %c0_15 = arith.constant 0 : index
    %39 = vector.load %arg3[%c0_14, %c0_15] : memref<256x1024xf32, #tpu.memory_space<vmem>>, vector<256x1024xf32>
    %cst_16 = arith.constant dense<0.000000e+00> : vector<8x1024xf32>
    %40 = tpu.matmul %35, %39, %cst_16 {dimension_numbers = #tpu.dot_dimension_numbers<[1], [0], [0], [1], [0, 0, 1, 1], [], []>} : vector<8x256xf32>, vector<256x1024xf32>, vector<8x1024xf32> -> vector<8x1024xf32>
    %41 = arith.addf %38, %40 : vector<8x1024xf32>
    %42 = vector.extract_strided_slice %41 {offsets = [0, 0], sizes = [8, 256], strides = [1, 1]} : vector<8x1024xf32> to vector<8x256xf32>
    %43 = arith.negf %42 : vector<8x256xf32>
    %44 = math.exp %43 : vector<8x256xf32>
    %cst_17 = arith.constant 1.000000e+00 : f32
    %45 = vector.broadcast %cst_17 : f32 to vector<8x256xf32>
    %46 = arith.addf %45, %44 : vector<8x256xf32>
    %47 = arith.divf %45, %46 : vector<8x256xf32>
    %48 = vector.extract_strided_slice %41 {offsets = [0, 256], sizes = [8, 256], strides = [1, 1]} : vector<8x1024xf32> to vector<8x256xf32>
    %49 = arith.negf %48 : vector<8x256xf32>
    %50 = math.exp %49 : vector<8x256xf32>
    %cst_18 = arith.constant 1.000000e+00 : f32
    %51 = vector.broadcast %cst_18 : f32 to vector<8x256xf32>
    %52 = arith.addf %51, %50 : vector<8x256xf32>
    %53 = arith.divf %51, %52 : vector<8x256xf32>
    %54 = vector.extract_strided_slice %41 {offsets = [0, 512], sizes = [8, 256], strides = [1, 1]} : vector<8x1024xf32> to vector<8x256xf32>
    %55 = math.tanh %54 : vector<8x256xf32>
    %56 = vector.extract_strided_slice %41 {offsets = [0, 768], sizes = [8, 256], strides = [1, 1]} : vector<8x1024xf32> to vector<8x256xf32>
    %57 = arith.negf %56 : vector<8x256xf32>
    %58 = math.exp %57 : vector<8x256xf32>
    %cst_19 = arith.constant 1.000000e+00 : f32
    %59 = vector.broadcast %cst_19 : f32 to vector<8x256xf32>
    %60 = arith.addf %59, %58 : vector<8x256xf32>
    %61 = arith.divf %59, %60 : vector<8x256xf32>
    %62 = arith.mulf %53, %33 : vector<8x256xf32>
    %63 = arith.mulf %47, %55 : vector<8x256xf32>
    %64 = arith.addf %62, %63 : vector<8x256xf32>
    %65 = math.tanh %64 : vector<8x256xf32>
    %66 = arith.mulf %61, %65 : vector<8x256xf32>
    %c2_i32 = arith.constant 2 : i32
    %67 = arith.index_cast %c2_i32 : i32 to index
    %c0_20 = arith.constant 0 : index
    %c0_21 = arith.constant 0 : index
    %68 = vector.load %arg2[%67, %c0_20, %c0_21] : memref<8x8x1024xf32, #tpu.memory_space<vmem>>, vector<1x8x1024xf32>
    %69 = vector.shape_cast %68 : vector<1x8x1024xf32> to vector<8x1024xf32>
    %c0_22 = arith.constant 0 : index
    %c0_23 = arith.constant 0 : index
    %70 = vector.load %arg3[%c0_22, %c0_23] : memref<256x1024xf32, #tpu.memory_space<vmem>>, vector<256x1024xf32>
    %cst_24 = arith.constant dense<0.000000e+00> : vector<8x1024xf32>
    %71 = tpu.matmul %66, %70, %cst_24 {dimension_numbers = #tpu.dot_dimension_numbers<[1], [0], [0], [1], [0, 0, 1, 1], [], []>} : vector<8x256xf32>, vector<256x1024xf32>, vector<8x1024xf32> -> vector<8x1024xf32>
    %72 = arith.addf %69, %71 : vector<8x1024xf32>
    %73 = vector.extract_strided_slice %72 {offsets = [0, 0], sizes = [8, 256], strides = [1, 1]} : vector<8x1024xf32> to vector<8x256xf32>
    %74 = arith.negf %73 : vector<8x256xf32>
    %75 = math.exp %74 : vector<8x256xf32>
    %cst_25 = arith.constant 1.000000e+00 : f32
    %76 = vector.broadcast %cst_25 : f32 to vector<8x256xf32>
    %77 = arith.addf %76, %75 : vector<8x256xf32>
    %78 = arith.divf %76, %77 : vector<8x256xf32>
    %79 = vector.extract_strided_slice %72 {offsets = [0, 256], sizes = [8, 256], strides = [1, 1]} : vector<8x1024xf32> to vector<8x256xf32>
    %80 = arith.negf %79 : vector<8x256xf32>
    %81 = math.exp %80 : vector<8x256xf32>
    %cst_26 = arith.constant 1.000000e+00 : f32
    %82 = vector.broadcast %cst_26 : f32 to vector<8x256xf32>
    %83 = arith.addf %82, %81 : vector<8x256xf32>
    %84 = arith.divf %82, %83 : vector<8x256xf32>
    %85 = vector.extract_strided_slice %72 {offsets = [0, 512], sizes = [8, 256], strides = [1, 1]} : vector<8x1024xf32> to vector<8x256xf32>
    %86 = math.tanh %85 : vector<8x256xf32>
    %87 = vector.extract_strided_slice %72 {offsets = [0, 768], sizes = [8, 256], strides = [1, 1]} : vector<8x1024xf32> to vector<8x256xf32>
    %88 = arith.negf %87 : vector<8x256xf32>
    %89 = math.exp %88 : vector<8x256xf32>
    %cst_27 = arith.constant 1.000000e+00 : f32
    %90 = vector.broadcast %cst_27 : f32 to vector<8x256xf32>
    %91 = arith.addf %90, %89 : vector<8x256xf32>
    %92 = arith.divf %90, %91 : vector<8x256xf32>
    %93 = arith.mulf %84, %64 : vector<8x256xf32>
    %94 = arith.mulf %78, %86 : vector<8x256xf32>
    %95 = arith.addf %93, %94 : vector<8x256xf32>
    %96 = math.tanh %95 : vector<8x256xf32>
    %97 = arith.mulf %92, %96 : vector<8x256xf32>
    %c3_i32 = arith.constant 3 : i32
    %98 = arith.index_cast %c3_i32 : i32 to index
    %c0_28 = arith.constant 0 : index
    %c0_29 = arith.constant 0 : index
    %99 = vector.load %arg2[%98, %c0_28, %c0_29] : memref<8x8x1024xf32, #tpu.memory_space<vmem>>, vector<1x8x1024xf32>
    %100 = vector.shape_cast %99 : vector<1x8x1024xf32> to vector<8x1024xf32>
    %c0_30 = arith.constant 0 : index
    %c0_31 = arith.constant 0 : index
    %101 = vector.load %arg3[%c0_30, %c0_31] : memref<256x1024xf32, #tpu.memory_space<vmem>>, vector<256x1024xf32>
    %cst_32 = arith.constant dense<0.000000e+00> : vector<8x1024xf32>
    %102 = tpu.matmul %97, %101, %cst_32 {dimension_numbers = #tpu.dot_dimension_numbers<[1], [0], [0], [1], [0, 0, 1, 1], [], []>} : vector<8x256xf32>, vector<256x1024xf32>, vector<8x1024xf32> -> vector<8x1024xf32>
    %103 = arith.addf %100, %102 : vector<8x1024xf32>
    %104 = vector.extract_strided_slice %103 {offsets = [0, 0], sizes = [8, 256], strides = [1, 1]} : vector<8x1024xf32> to vector<8x256xf32>
    %105 = arith.negf %104 : vector<8x256xf32>
    %106 = math.exp %105 : vector<8x256xf32>
    %cst_33 = arith.constant 1.000000e+00 : f32
    %107 = vector.broadcast %cst_33 : f32 to vector<8x256xf32>
    %108 = arith.addf %107, %106 : vector<8x256xf32>
    %109 = arith.divf %107, %108 : vector<8x256xf32>
    %110 = vector.extract_strided_slice %103 {offsets = [0, 256], sizes = [8, 256], strides = [1, 1]} : vector<8x1024xf32> to vector<8x256xf32>
    %111 = arith.negf %110 : vector<8x256xf32>
    %112 = math.exp %111 : vector<8x256xf32>
    %cst_34 = arith.constant 1.000000e+00 : f32
    %113 = vector.broadcast %cst_34 : f32 to vector<8x256xf32>
    %114 = arith.addf %113, %112 : vector<8x256xf32>
    %115 = arith.divf %113, %114 : vector<8x256xf32>
    %116 = vector.extract_strided_slice %103 {offsets = [0, 512], sizes = [8, 256], strides = [1, 1]} : vector<8x1024xf32> to vector<8x256xf32>
    %117 = math.tanh %116 : vector<8x256xf32>
    %118 = vector.extract_strided_slice %103 {offsets = [0, 768], sizes = [8, 256], strides = [1, 1]} : vector<8x1024xf32> to vector<8x256xf32>
    %119 = arith.negf %118 : vector<8x256xf32>
    %120 = math.exp %119 : vector<8x256xf32>
    %cst_35 = arith.constant 1.000000e+00 : f32
    %121 = vector.broadcast %cst_35 : f32 to vector<8x256xf32>
    %122 = arith.addf %121, %120 : vector<8x256xf32>
    %123 = arith.divf %121, %122 : vector<8x256xf32>
    %124 = arith.mulf %115, %95 : vector<8x256xf32>
    %125 = arith.mulf %109, %117 : vector<8x256xf32>
    %126 = arith.addf %124, %125 : vector<8x256xf32>
    %127 = math.tanh %126 : vector<8x256xf32>
    %128 = arith.mulf %123, %127 : vector<8x256xf32>
    %c4_i32 = arith.constant 4 : i32
    %129 = arith.index_cast %c4_i32 : i32 to index
    %c0_36 = arith.constant 0 : index
    %c0_37 = arith.constant 0 : index
    %130 = vector.load %arg2[%129, %c0_36, %c0_37] : memref<8x8x1024xf32, #tpu.memory_space<vmem>>, vector<1x8x1024xf32>
    %131 = vector.shape_cast %130 : vector<1x8x1024xf32> to vector<8x1024xf32>
    %c0_38 = arith.constant 0 : index
    %c0_39 = arith.constant 0 : index
    %132 = vector.load %arg3[%c0_38, %c0_39] : memref<256x1024xf32, #tpu.memory_space<vmem>>, vector<256x1024xf32>
    %cst_40 = arith.constant dense<0.000000e+00> : vector<8x1024xf32>
    %133 = tpu.matmul %128, %132, %cst_40 {dimension_numbers = #tpu.dot_dimension_numbers<[1], [0], [0], [1], [0, 0, 1, 1], [], []>} : vector<8x256xf32>, vector<256x1024xf32>, vector<8x1024xf32> -> vector<8x1024xf32>
    %134 = arith.addf %131, %133 : vector<8x1024xf32>
    %135 = vector.extract_strided_slice %134 {offsets = [0, 0], sizes = [8, 256], strides = [1, 1]} : vector<8x1024xf32> to vector<8x256xf32>
    %136 = arith.negf %135 : vector<8x256xf32>
    %137 = math.exp %136 : vector<8x256xf32>
    %cst_41 = arith.constant 1.000000e+00 : f32
    %138 = vector.broadcast %cst_41 : f32 to vector<8x256xf32>
    %139 = arith.addf %138, %137 : vector<8x256xf32>
    %140 = arith.divf %138, %139 : vector<8x256xf32>
    %141 = vector.extract_strided_slice %134 {offsets = [0, 256], sizes = [8, 256], strides = [1, 1]} : vector<8x1024xf32> to vector<8x256xf32>
    %142 = arith.negf %141 : vector<8x256xf32>
    %143 = math.exp %142 : vector<8x256xf32>
    %cst_42 = arith.constant 1.000000e+00 : f32
    %144 = vector.broadcast %cst_42 : f32 to vector<8x256xf32>
    %145 = arith.addf %144, %143 : vector<8x256xf32>
    %146 = arith.divf %144, %145 : vector<8x256xf32>
    %147 = vector.extract_strided_slice %134 {offsets = [0, 512], sizes = [8, 256], strides = [1, 1]} : vector<8x1024xf32> to vector<8x256xf32>
    %148 = math.tanh %147 : vector<8x256xf32>
    %149 = vector.extract_strided_slice %134 {offsets = [0, 768], sizes = [8, 256], strides = [1, 1]} : vector<8x1024xf32> to vector<8x256xf32>
    %150 = arith.negf %149 : vector<8x256xf32>
    %151 = math.exp %150 : vector<8x256xf32>
    %cst_43 = arith.constant 1.000000e+00 : f32
    %152 = vector.broadcast %cst_43 : f32 to vector<8x256xf32>
    %153 = arith.addf %152, %151 : vector<8x256xf32>
    %154 = arith.divf %152, %153 : vector<8x256xf32>
    %155 = arith.mulf %146, %126 : vector<8x256xf32>
    %156 = arith.mulf %140, %148 : vector<8x256xf32>
    %157 = arith.addf %155, %156 : vector<8x256xf32>
    %158 = math.tanh %157 : vector<8x256xf32>
    %159 = arith.mulf %154, %158 : vector<8x256xf32>
    %c5_i32 = arith.constant 5 : i32
    %160 = arith.index_cast %c5_i32 : i32 to index
    %c0_44 = arith.constant 0 : index
    %c0_45 = arith.constant 0 : index
    %161 = vector.load %arg2[%160, %c0_44, %c0_45] : memref<8x8x1024xf32, #tpu.memory_space<vmem>>, vector<1x8x1024xf32>
    %162 = vector.shape_cast %161 : vector<1x8x1024xf32> to vector<8x1024xf32>
    %c0_46 = arith.constant 0 : index
    %c0_47 = arith.constant 0 : index
    %163 = vector.load %arg3[%c0_46, %c0_47] : memref<256x1024xf32, #tpu.memory_space<vmem>>, vector<256x1024xf32>
    %cst_48 = arith.constant dense<0.000000e+00> : vector<8x1024xf32>
    %164 = tpu.matmul %159, %163, %cst_48 {dimension_numbers = #tpu.dot_dimension_numbers<[1], [0], [0], [1], [0, 0, 1, 1], [], []>} : vector<8x256xf32>, vector<256x1024xf32>, vector<8x1024xf32> -> vector<8x1024xf32>
    %165 = arith.addf %162, %164 : vector<8x1024xf32>
    %166 = vector.extract_strided_slice %165 {offsets = [0, 0], sizes = [8, 256], strides = [1, 1]} : vector<8x1024xf32> to vector<8x256xf32>
    %167 = arith.negf %166 : vector<8x256xf32>
    %168 = math.exp %167 : vector<8x256xf32>
    %cst_49 = arith.constant 1.000000e+00 : f32
    %169 = vector.broadcast %cst_49 : f32 to vector<8x256xf32>
    %170 = arith.addf %169, %168 : vector<8x256xf32>
    %171 = arith.divf %169, %170 : vector<8x256xf32>
    %172 = vector.extract_strided_slice %165 {offsets = [0, 256], sizes = [8, 256], strides = [1, 1]} : vector<8x1024xf32> to vector<8x256xf32>
    %173 = arith.negf %172 : vector<8x256xf32>
    %174 = math.exp %173 : vector<8x256xf32>
    %cst_50 = arith.constant 1.000000e+00 : f32
    %175 = vector.broadcast %cst_50 : f32 to vector<8x256xf32>
    %176 = arith.addf %175, %174 : vector<8x256xf32>
    %177 = arith.divf %175, %176 : vector<8x256xf32>
    %178 = vector.extract_strided_slice %165 {offsets = [0, 512], sizes = [8, 256], strides = [1, 1]} : vector<8x1024xf32> to vector<8x256xf32>
    %179 = math.tanh %178 : vector<8x256xf32>
    %180 = vector.extract_strided_slice %165 {offsets = [0, 768], sizes = [8, 256], strides = [1, 1]} : vector<8x1024xf32> to vector<8x256xf32>
    %181 = arith.negf %180 : vector<8x256xf32>
    %182 = math.exp %181 : vector<8x256xf32>
    %cst_51 = arith.constant 1.000000e+00 : f32
    %183 = vector.broadcast %cst_51 : f32 to vector<8x256xf32>
    %184 = arith.addf %183, %182 : vector<8x256xf32>
    %185 = arith.divf %183, %184 : vector<8x256xf32>
    %186 = arith.mulf %177, %157 : vector<8x256xf32>
    %187 = arith.mulf %171, %179 : vector<8x256xf32>
    %188 = arith.addf %186, %187 : vector<8x256xf32>
    %189 = math.tanh %188 : vector<8x256xf32>
    %190 = arith.mulf %185, %189 : vector<8x256xf32>
    %c6_i32 = arith.constant 6 : i32
    %191 = arith.index_cast %c6_i32 : i32 to index
    %c0_52 = arith.constant 0 : index
    %c0_53 = arith.constant 0 : index
    %192 = vector.load %arg2[%191, %c0_52, %c0_53] : memref<8x8x1024xf32, #tpu.memory_space<vmem>>, vector<1x8x1024xf32>
    %193 = vector.shape_cast %192 : vector<1x8x1024xf32> to vector<8x1024xf32>
    %c0_54 = arith.constant 0 : index
    %c0_55 = arith.constant 0 : index
    %194 = vector.load %arg3[%c0_54, %c0_55] : memref<256x1024xf32, #tpu.memory_space<vmem>>, vector<256x1024xf32>
    %cst_56 = arith.constant dense<0.000000e+00> : vector<8x1024xf32>
    %195 = tpu.matmul %190, %194, %cst_56 {dimension_numbers = #tpu.dot_dimension_numbers<[1], [0], [0], [1], [0, 0, 1, 1], [], []>} : vector<8x256xf32>, vector<256x1024xf32>, vector<8x1024xf32> -> vector<8x1024xf32>
    %196 = arith.addf %193, %195 : vector<8x1024xf32>
    %197 = vector.extract_strided_slice %196 {offsets = [0, 0], sizes = [8, 256], strides = [1, 1]} : vector<8x1024xf32> to vector<8x256xf32>
    %198 = arith.negf %197 : vector<8x256xf32>
    %199 = math.exp %198 : vector<8x256xf32>
    %cst_57 = arith.constant 1.000000e+00 : f32
    %200 = vector.broadcast %cst_57 : f32 to vector<8x256xf32>
    %201 = arith.addf %200, %199 : vector<8x256xf32>
    %202 = arith.divf %200, %201 : vector<8x256xf32>
    %203 = vector.extract_strided_slice %196 {offsets = [0, 256], sizes = [8, 256], strides = [1, 1]} : vector<8x1024xf32> to vector<8x256xf32>
    %204 = arith.negf %203 : vector<8x256xf32>
    %205 = math.exp %204 : vector<8x256xf32>
    %cst_58 = arith.constant 1.000000e+00 : f32
    %206 = vector.broadcast %cst_58 : f32 to vector<8x256xf32>
    %207 = arith.addf %206, %205 : vector<8x256xf32>
    %208 = arith.divf %206, %207 : vector<8x256xf32>
    %209 = vector.extract_strided_slice %196 {offsets = [0, 512], sizes = [8, 256], strides = [1, 1]} : vector<8x1024xf32> to vector<8x256xf32>
    %210 = math.tanh %209 : vector<8x256xf32>
    %211 = vector.extract_strided_slice %196 {offsets = [0, 768], sizes = [8, 256], strides = [1, 1]} : vector<8x1024xf32> to vector<8x256xf32>
    %212 = arith.negf %211 : vector<8x256xf32>
    %213 = math.exp %212 : vector<8x256xf32>
    %cst_59 = arith.constant 1.000000e+00 : f32
    %214 = vector.broadcast %cst_59 : f32 to vector<8x256xf32>
    %215 = arith.addf %214, %213 : vector<8x256xf32>
    %216 = arith.divf %214, %215 : vector<8x256xf32>
    %217 = arith.mulf %208, %188 : vector<8x256xf32>
    %218 = arith.mulf %202, %210 : vector<8x256xf32>
    %219 = arith.addf %217, %218 : vector<8x256xf32>
    %220 = math.tanh %219 : vector<8x256xf32>
    %221 = arith.mulf %216, %220 : vector<8x256xf32>
    %c7_i32 = arith.constant 7 : i32
    %222 = arith.index_cast %c7_i32 : i32 to index
    %c0_60 = arith.constant 0 : index
    %c0_61 = arith.constant 0 : index
    %223 = vector.load %arg2[%222, %c0_60, %c0_61] : memref<8x8x1024xf32, #tpu.memory_space<vmem>>, vector<1x8x1024xf32>
    %224 = vector.shape_cast %223 : vector<1x8x1024xf32> to vector<8x1024xf32>
    %c0_62 = arith.constant 0 : index
    %c0_63 = arith.constant 0 : index
    %225 = vector.load %arg3[%c0_62, %c0_63] : memref<256x1024xf32, #tpu.memory_space<vmem>>, vector<256x1024xf32>
    %cst_64 = arith.constant dense<0.000000e+00> : vector<8x1024xf32>
    %226 = tpu.matmul %221, %225, %cst_64 {dimension_numbers = #tpu.dot_dimension_numbers<[1], [0], [0], [1], [0, 0, 1, 1], [], []>} : vector<8x256xf32>, vector<256x1024xf32>, vector<8x1024xf32> -> vector<8x1024xf32>
    %227 = arith.addf %224, %226 : vector<8x1024xf32>
    %228 = vector.extract_strided_slice %227 {offsets = [0, 0], sizes = [8, 256], strides = [1, 1]} : vector<8x1024xf32> to vector<8x256xf32>
    %229 = arith.negf %228 : vector<8x256xf32>
    %230 = math.exp %229 : vector<8x256xf32>
    %cst_65 = arith.constant 1.000000e+00 : f32
    %231 = vector.broadcast %cst_65 : f32 to vector<8x256xf32>
    %232 = arith.addf %231, %230 : vector<8x256xf32>
    %233 = arith.divf %231, %232 : vector<8x256xf32>
    %234 = vector.extract_strided_slice %227 {offsets = [0, 256], sizes = [8, 256], strides = [1, 1]} : vector<8x1024xf32> to vector<8x256xf32>
    %235 = arith.negf %234 : vector<8x256xf32>
    %236 = math.exp %235 : vector<8x256xf32>
    %cst_66 = arith.constant 1.000000e+00 : f32
    %237 = vector.broadcast %cst_66 : f32 to vector<8x256xf32>
    %238 = arith.addf %237, %236 : vector<8x256xf32>
    %239 = arith.divf %237, %238 : vector<8x256xf32>
    %240 = vector.extract_strided_slice %227 {offsets = [0, 512], sizes = [8, 256], strides = [1, 1]} : vector<8x1024xf32> to vector<8x256xf32>
    %241 = math.tanh %240 : vector<8x256xf32>
    %242 = vector.extract_strided_slice %227 {offsets = [0, 768], sizes = [8, 256], strides = [1, 1]} : vector<8x1024xf32> to vector<8x256xf32>
    %243 = arith.negf %242 : vector<8x256xf32>
    %244 = math.exp %243 : vector<8x256xf32>
    %cst_67 = arith.constant 1.000000e+00 : f32
    %245 = vector.broadcast %cst_67 : f32 to vector<8x256xf32>
    %246 = arith.addf %245, %244 : vector<8x256xf32>
    %247 = arith.divf %245, %246 : vector<8x256xf32>
    %248 = arith.mulf %239, %219 : vector<8x256xf32>
    %249 = arith.mulf %233, %241 : vector<8x256xf32>
    %250 = arith.addf %248, %249 : vector<8x256xf32>
    %251 = math.tanh %250 : vector<8x256xf32>
    %252 = arith.mulf %247, %251 : vector<8x256xf32>
    %c8_i32 = arith.constant 8 : i32
    %c0_68 = arith.constant 0 : index
    %c0_69 = arith.constant 0 : index
    %253 = vector.load %arg9[%c0_68, %c0_69] : memref<8x256xf32, #tpu.memory_space<vmem>>, vector<8x256xf32>
    tpu.vector_store %arg9[%c0_68, %c0_69], %252 {strides = array<i32>} : memref<8x256xf32, #tpu.memory_space<vmem>>, vector<8x256xf32>,
    %c0_70 = arith.constant 0 : index
    %c0_71 = arith.constant 0 : index
    %254 = vector.load %arg10[%c0_70, %c0_71] : memref<8x256xf32, #tpu.memory_space<vmem>>, vector<8x256xf32>
    tpu.vector_store %arg10[%c0_70, %c0_71], %250 {strides = array<i32>} : memref<8x256xf32, #tpu.memory_space<vmem>>, vector<8x256xf32>,
    %c0_i32_72 = arith.constant 0 : i32
    %255 = arith.cmpi eq, %arg1, %c0_i32_72 : i32
    %256 = arith.extui %255 : i1 to i32
    %c0_i32_73 = arith.constant 0 : i32
    %257 = arith.cmpi ne, %256, %c0_i32_73 : i32
    scf.if %257 {
      %c0_74 = arith.constant 0 : index
      %c0_75 = arith.constant 0 : index
      %258 = vector.load %arg4[%c0_74, %c0_75] : memref<256x128xf32, #tpu.memory_space<vmem>>, vector<256x128xf32>
      %cst_76 = arith.constant dense<0.000000e+00> : vector<8x128xf32>
      %259 = tpu.matmul %252, %258, %cst_76 {dimension_numbers = #tpu.dot_dimension_numbers<[1], [0], [0], [1], [0, 0, 1, 1], [], []>} : vector<8x256xf32>, vector<256x128xf32>, vector<8x128xf32> -> vector<8x128xf32>
      %c0_77 = arith.constant 0 : index
      %c0_78 = arith.constant 0 : index
      %260 = vector.load %arg5[%c0_77, %c0_78] : memref<1x128xf32, #tpu.memory_space<vmem>>, vector<1x128xf32>
      %261 = vector.broadcast %260 : vector<1x128xf32> to vector<8x128xf32>
      %262 = arith.addf %259, %261 : vector<8x128xf32>
      %c0_79 = arith.constant 0 : index
      %c0_80 = arith.constant 0 : index
      %263 = vector.load %arg6[%c0_79, %c0_80] : memref<128x128xf32, #tpu.memory_space<vmem>>, vector<128x128xf32>
      %cst_81 = arith.constant dense<0.000000e+00> : vector<8x128xf32>
      %264 = tpu.matmul %262, %263, %cst_81 {dimension_numbers = #tpu.dot_dimension_numbers<[1], [0], [0], [1], [0, 0, 1, 1], [], []>} : vector<8x128xf32>, vector<128x128xf32>, vector<8x128xf32> -> vector<8x128xf32>
      %c0_82 = arith.constant 0 : index
      %c0_83 = arith.constant 0 : index
      %265 = vector.load %arg7[%c0_82, %c0_83] : memref<1x128xf32, #tpu.memory_space<vmem>>, vector<1x128xf32>
      %266 = vector.broadcast %265 : vector<1x128xf32> to vector<8x128xf32>
      %267 = arith.addf %264, %266 : vector<8x128xf32>
      %cst_84 = arith.constant dense<0xFF800000> : vector<8xf32>
      %268 = vector.multi_reduction <maximumf>, %267, %cst_84 [1] : vector<8x128xf32> to vector<8xf32>
      %269 = vector.shape_cast %268 : vector<8xf32> to vector<8x1xf32>
      %270 = vector.broadcast %269 : vector<8x1xf32> to vector<8x128xf32>
      %271 = arith.subf %267, %270 : vector<8x128xf32>
      %272 = math.exp %271 : vector<8x128xf32>
      %cst_85 = arith.constant dense<0.000000e+00> : vector<8xf32>
      %273 = vector.multi_reduction <add>, %272, %cst_85 [1] : vector<8x128xf32> to vector<8xf32>
      %274 = vector.shape_cast %273 : vector<8xf32> to vector<8x1xf32>
      %275 = vector.broadcast %274 : vector<8x1xf32> to vector<8x128xf32>
      %276 = arith.divf %272, %275 : vector<8x128xf32>
      %c0_86 = arith.constant 0 : index
      %c0_87 = arith.constant 0 : index
      %277 = vector.load %arg8[%c0_86, %c0_87] : memref<8x128xf32, #tpu.memory_space<vmem>>, vector<8x128xf32>
      tpu.vector_store %arg8[%c0_86, %c0_87], %276 {strides = array<i32>} : memref<8x128xf32, #tpu.memory_space<vmem>>, vector<8x128xf32>,
    } else {
    }
    return
  }
  func.func @transform_0(%arg0: i32, %arg1: i32) -> (i32, i32, i32) {
    %c0_i32 = arith.constant 0 : i32
    %c0_i32_0 = arith.constant 0 : i32
    return %arg1, %arg0, %c0_i32 : i32, i32, i32
  }
  func.func @transform_1(%arg0: i32, %arg1: i32) -> (i32, i32) {
    %c0_i32 = arith.constant 0 : i32
    %c0_i32_0 = arith.constant 0 : i32
    %c0_i32_1 = arith.constant 0 : i32
    return %c0_i32, %c0_i32_0 : i32, i32
  }
  func.func @transform_2(%arg0: i32, %arg1: i32) -> (i32, i32) {
    %c0_i32 = arith.constant 0 : i32
    %c0_i32_0 = arith.constant 0 : i32
    %c0_i32_1 = arith.constant 0 : i32
    return %c0_i32, %c0_i32_0 : i32, i32
  }
  func.func @transform_3(%arg0: i32, %arg1: i32) -> (i32, i32) {
    %c0_i32 = arith.constant 0 : i32
    %c0_i32_0 = arith.constant 0 : i32
    %c0_i32_1 = arith.constant 0 : i32
    return %c0_i32, %c0_i32_0 : i32, i32
  }
  func.func @transform_4(%arg0: i32, %arg1: i32) -> (i32, i32) {
    %c0_i32 = arith.constant 0 : i32
    %c0_i32_0 = arith.constant 0 : i32
    %c0_i32_1 = arith.constant 0 : i32
    return %c0_i32, %c0_i32_0 : i32, i32
  }
  func.func @transform_5(%arg0: i32, %arg1: i32) -> (i32, i32) {
    %c0_i32 = arith.constant 0 : i32
    %c0_i32_0 = arith.constant 0 : i32
    %c0_i32_1 = arith.constant 0 : i32
    return %c0_i32, %c0_i32_0 : i32, i32
  }
  func.func @transform_6(%arg0: i32, %arg1: i32) -> (i32, i32) {
    %c0_i32 = arith.constant 0 : i32
    %c0_i32_0 = arith.constant 0 : i32
    return %arg0, %c0_i32 : i32, i32
  }
}

</mosaic_0001>

<bundles_post_ra>
// kernel: rnn_model_forward.1
= control target key start
LH: loop header
LB: loop body
LE: loop exit
PB: predicated region body
PF: predicated region fallthrough
CT: control target
= control target key end

     0   :  { %11 = vsyncpa [#allocation5], 0  ;;  %s5907_s21 = smov [#allocation4]   ;;  %s7692_s0 = inlined_call_operand.vmem [shape: f32[8,8,1024], index: 0, kind: input, shape index: {}]   ;;  %s7693_s1 = inlined_call_operand.hbm [shape: f32[256,1024], index: 1, kind: input, shape index: {}]   ;;  %s7694_s2 = inlined_call_operand.vmem [shape: f32[256,128], index: 2, kind: input, shape index: {}]   ;;  %s7695_s3 = inlined_call_operand.vmem [shape: f32[1,128], index: 3, kind: input, shape index: {}]   ;;  %s7696_s4 = inlined_call_operand.vmem [shape: f32[128,128], index: 4, kind: input, shape index: {}]   ;;  %s7697_s5 = inlined_call_operand.vmem [shape: f32[1,128], index: 5, kind: input, shape index: {}]   ;;  %s7698_s6 = inlined_call_operand.vmem [shape: f32[8,128], index: 6, kind: output, shape index: {}]  }
   0x1   :  { %s19_s22 = sshll.u32 %s5907_s21, 4  ;;  %s5883_s25 = scalar_lea.hbm %s7693_s1, 32768  ;;  %s20_s22 = int_to_ptr.vmem [resolvable:$true] %s19_s22 }
   0x2   :  { %p5884_p0 = scmp.ne.s32.totalorder %s7693_s1, %s5883_s25  ;;  %p5887_p1 = scmp.lt.u32.totalorder %s5883_s25, %s7693_s1 }
   0x4   :  { %p5889_p2 = pnand %p5887_p1, %p5884_p0 }
   0x6   :  { %5892 = shalt.err (!%p5889_p2)
}
   0x7   :  { %s5893_s30 = scalar_lea.vmem %s20_s22, 32768  ;;  %p5898_p4 = scmp.lt.s32.totalorder %s20_s22, %s20_s22 }
   0x8   :  { %p5894_p3 = scmp.ne.s32.totalorder %s20_s22, %s5893_s30  ;;  %p5899_p5 = scmp.lt.s32.totalorder %s5893_s30, %s5893_s30 }
   0xa   :  { %p5900_p6 = por %p5899_p5, %p5898_p4 }
   0xc   :  { %p5901_p7 = pnand %p5900_p6, %p5894_p3 }
   0xe   :  { %5904 = shalt.err (!%p5901_p7)
}
   0xf   :  { %s5908_s7 = smov 1024   ;;  %s5909_s8 = smov 64  }
  0x10   :  { %25 = dma.hbm_to_vmem [thread:$0]  %s7693_s1, 32768, %s20_s22, [#allocation5], %s5908_s7, %s5908_s7, %s5909_s8  }
  0x11   :  { %5905 = dma.done.wait [#allocation5], 32768  }
  0x12   :  { %5906 = vsyncadd [#allocation5], 4294934528  ;;  %v7699_v0 = vmov 0.0   ;;  %v58_v1 = vld [vmem:[#allocation4 + $0x8] sm:$0xff]  ;;  %v60_v3 = vld [vmem:[#allocation4 + $0x18] sm:$0xff]  ;;  %vm5912_vm0 = vmmov 0  }
  0x13   :  { %377 = vmatprep.mubr.f32.mxu0 %v7699_v0  ;;  %448 = vmatprep.mubr.f32.mxu1 %v7699_v0  ;;  %v66_v2 = vld [vmem:[#allocation4 + $0x48] sm:$0xff]  ;;  %v68_v5 = vld [vmem:[#allocation4 + $0x58] sm:$0xff]  ;;  %v57_v6 = vld [vmem:[#allocation4] sm:$0xff] }
  0x14   :  { %v5962_v4 = vpack.c.bf16 %v66_v2, %v58_v1  ;;  %v65_v7 = vld [vmem:[#allocation4 + $0x40] sm:$0xff]  ;;  %v5964_v8 = vpack.c.bf16 %v68_v5, %v60_v3  ;;  %v59_v10 = vld [vmem:[#allocation4 + $0x10] sm:$0xff]  ;;  %v74_v12 = vld [vmem:[#allocation4 + $0x88] sm:$0xff] }
  0x15   :  { %v5966_v9 = vpack.c.bf16 %v65_v7, %v57_v6  ;;  %v67_v11 = vld [vmem:[#allocation4 + $0x50] sm:$0xff]  ;;  %v82_v14 = vld [vmem:[#allocation4 + $0xc8] sm:$0xff]  ;;  %v76_v15 = vld [vmem:[#allocation4 + $0x98] sm:$0xff] }
  0x16   :  { %7969 = vst [vmem:[#allocation7_spill] sm:$0xff] %v5962_v4  ;;  %7970 = vst [vmem:[#allocation8_spill] sm:$0xff] %v5964_v8  ;;  %3514 = vmatprep.subr.bf16.mxu0 %v5962_v4  ;;  %v5969_v13 = vpack.c.bf16 %v67_v11, %v59_v10  ;;  %v84_v16 = vld [vmem:[#allocation4 + $0xd8] sm:$0xff]  ;;  %3578 = vmatprep.subr.bf16.mxu1 %v5964_v8  ;;  %v5973_v17 = vpack.c.bf16 %v82_v14, %v74_v12  ;;  %v73_v19 = vld [vmem:[#allocation4 + $0x80] sm:$0xff] }
  0x17   :  { %7971 = vst [vmem:[#allocation9_spill] sm:$0xff] %v5966_v9  ;;  %3516 = vmatpush1.bf16.msra.mxu0 %v5966_v9  ;;  %v5975_v18 = vpack.c.bf16 %v84_v16, %v76_v15  ;;  %v81_v20 = vld [vmem:[#allocation4 + $0xc0] sm:$0xff]  ;;  %v75_v21 = vld [vmem:[#allocation4 + $0x90] sm:$0xff]  ;;  %v90_v24 = vld [vmem:[#allocation4 + $0x108] sm:$0xff] }
  0x18   :  { %7972 = vst [vmem:[#allocation10_spill] sm:$0xff] %v5969_v13  ;;  %7973 = vst [vmem:[#allocation11_spill] sm:$0xff] %v5973_v17  ;;  %3580 = vmatpush1.bf16.msra.mxu1 %v5969_v13  ;;  %v5978_v22 = vpack.c.bf16 %v81_v20, %v73_v19  ;;  %v83_v23 = vld [vmem:[#allocation4 + $0xd0] sm:$0xff]  ;;  %v98_v25 = vld [vmem:[#allocation4 + $0x148] sm:$0xff]  ;;  %3518 = vmatprep.subr.bf16.mxu0 %v5973_v17 }
  0x19   :  { %7974 = vst [vmem:[#allocation12_spill] sm:$0xff] %v5975_v18  ;;  %3582 = vmatprep.subr.bf16.mxu1 %v5975_v18  ;;  %v5982_v26 = vpack.c.bf16 %v83_v23, %v75_v21  ;;  %v5984_v27 = vpack.c.bf16 %v98_v25, %v90_v24  ;;  %v92_v28 = vld [vmem:[#allocation4 + $0x118] sm:$0xff]  ;;  %v89_v30 = vld [vmem:[#allocation4 + $0x100] sm:$0xff]  ;;  %v91_v33 = vld [vmem:[#allocation4 + $0x110] sm:$0xff] }
  0x1a   :  { %7975 = vst [vmem:[#allocation13_spill] sm:$0xff] %v5978_v22  ;;  %v100_v29 = vld [vmem:[#allocation4 + $0x158] sm:$0xff]  ;;  %v97_v32 = vld [vmem:[#allocation4 + $0x140] sm:$0xff]  ;;  %v99_v34 = vld [vmem:[#allocation4 + $0x150] sm:$0xff] }
  0x1b   :  { %7976 = vst [vmem:[#allocation14_spill] sm:$0xff] %v5982_v26  ;;  %7977 = vst [vmem:[#allocation15_spill] sm:$0xff] %v5984_v27  ;;  %v5986_v31 = vpack.c.bf16 %v100_v29, %v92_v28  ;;  %3520 = vmatpush1.bf16.msra.mxu0 %v5978_v22  ;;  %v5989_v35 = vpack.c.bf16 %v97_v32, %v89_v30  ;;  %v106_v36 = vld [vmem:[#allocation4 + $0x188] sm:$0xff]  ;;  %v108_v38 = vld [vmem:[#allocation4 + $0x198] sm:$0xff]  ;;  %v5993_v39 = vpack.c.bf16 %v99_v34, %v91_v33 }
  0x1c   :  { %v114_v37 = vld [vmem:[#allocation4 + $0x1c8] sm:$0xff]  ;;  %3584 = vmatpush1.bf16.msra.mxu1 %v5982_v26  ;;  %3522 = vmatprep.subr.bf16.mxu0 %v5984_v27  ;;  %v116_v41 = vld [vmem:[#allocation4 + $0x1d8] sm:$0xff]  ;;  %v105_v42 = vld [vmem:[#allocation4 + $0x180] sm:$0xff] }
  0x1d   :  { %7978 = vst [vmem:[#allocation16_spill] sm:$0xff] %v5986_v31  ;;  %7979 = vst [vmem:[#allocation17_spill] sm:$0xff] %v5989_v35  ;;  %v5995_v40 = vpack.c.bf16 %v114_v37, %v106_v36  ;;  %v113_v43 = vld [vmem:[#allocation4 + $0x1c0] sm:$0xff]  ;;  %3586 = vmatprep.subr.bf16.mxu1 %v5986_v31  ;;  %v5998_v44 = vpack.c.bf16 %v116_v41, %v108_v38  ;;  %v107_v45 = vld [vmem:[#allocation4 + $0x190] sm:$0xff] }
  0x1e   :  { %7980 = vst [vmem:[#allocation18_spill] sm:$0xff] %v5993_v39  ;;  %v115_v46 = vld [vmem:[#allocation4 + $0x1d0] sm:$0xff]  ;;  %v122_v47 = vld [vmem:[#allocation4 + $0x208] sm:$0xff]  ;;  %v124_v49 = vld [vmem:[#allocation4 + $0x218] sm:$0xff]  ;;  %v6001_v51 = vpack.c.bf16 %v113_v43, %v105_v42 }
  0x1f   :  { %7981 = vst [vmem:[#allocation19_spill] sm:$0xff] %v5995_v40  ;;  %7982 = vst [vmem:[#allocation20_spill] sm:$0xff] %v5998_v44  ;;  %v130_v48 = vld [vmem:[#allocation4 + $0x248] sm:$0xff]  ;;  %v132_v50 = vld [vmem:[#allocation4 + $0x258] sm:$0xff]  ;;  %3524 = vmatpush1.bf16.msra.mxu0 %v5989_v35  ;;  %v6005_v52 = vpack.c.bf16 %v115_v46, %v107_v45 }
  0x20   :  { %7983 = vst [vmem:[#allocation21_spill] sm:$0xff] %v6001_v51  ;;  %3588 = vmatpush1.bf16.msra.mxu1 %v5993_v39  ;;  %3526 = vmatprep.subr.bf16.mxu0 %v5995_v40  ;;  %v6007_v53 = vpack.c.bf16 %v130_v48, %v122_v47  ;;  %v121_v54 = vld [vmem:[#allocation4 + $0x200] sm:$0xff]  ;;  %v123_v56 = vld [vmem:[#allocation4 + $0x210] sm:$0xff]  ;;  %v6010_v57 = vpack.c.bf16 %v132_v50, %v124_v49  ;;  %v138_v59 = vld [vmem:[#allocation4 + $0x288] sm:$0xff] }
  0x21   :  { %7984 = vst [vmem:[#allocation22_spill] sm:$0xff] %v6005_v52  ;;  %v129_v55 = vld [vmem:[#allocation4 + $0x240] sm:$0xff]  ;;  %3590 = vmatprep.subr.bf16.mxu1 %v5998_v44  ;;  %v131_v58 = vld [vmem:[#allocation4 + $0x250] sm:$0xff]  ;;  %v146_v60 = vld [vmem:[#allocation4 + $0x2c8] sm:$0xff] }
  0x22   :  { %7985 = vst [vmem:[#allocation23_spill] sm:$0xff] %v6007_v53  ;;  %7986 = vst [vmem:[#allocation24_spill] sm:$0xff] %v6010_v57  ;;  %v140_v61 = vld [vmem:[#allocation4 + $0x298] sm:$0xff]  ;;  %v6013_v63 = vpack.c.bf16 %v129_v55, %v121_v54  ;;  %v6017_v1 = vpack.c.bf16 %v131_v58, %v123_v56  ;;  %v6019_v2 = vpack.c.bf16 %v146_v60, %v138_v59  ;;  %v137_v3 = vld [vmem:[#allocation4 + $0x280] sm:$0xff] }
  0x23   :  { %v148_v62 = vld [vmem:[#allocation4 + $0x2d8] sm:$0xff]  ;;  %3528 = vmatpush1.bf16.msra.mxu0 %v6001_v51  ;;  %v145_v5 = vld [vmem:[#allocation4 + $0x2c0] sm:$0xff]  ;;  %v139_v6 = vld [vmem:[#allocation4 + $0x290] sm:$0xff] }
  0x24   :  { %7987 = vst [vmem:[#allocation25_spill] sm:$0xff] %v6013_v63  ;;  %3592 = vmatpush1.bf16.msra.mxu1 %v6005_v52  ;;  %3530 = vmatprep.subr.bf16.mxu0 %v6007_v53  ;;  %7988 = vst [vmem:[#allocation26_spill] sm:$0xff] %v6017_v1  ;;  %v6022_v7 = vpack.c.bf16 %v148_v62, %v140_v61  ;;  %v147_v10 = vld [vmem:[#allocation4 + $0x2d0] sm:$0xff]  ;;  %v154_v11 = vld [vmem:[#allocation4 + $0x308] sm:$0xff]  ;;  %v6025_v16 = vpack.c.bf16 %v145_v5, %v137_v3 }
  0x25   :  { %7989 = vst [vmem:[#allocation27_spill] sm:$0xff] %v6019_v2  ;;  %3594 = vmatprep.subr.bf16.mxu1 %v6010_v57  ;;  %v162_v12 = vld [vmem:[#allocation4 + $0x348] sm:$0xff]  ;;  %v156_v14 = vld [vmem:[#allocation4 + $0x318] sm:$0xff]  ;;  %v6029_v19 = vpack.c.bf16 %v147_v10, %v139_v6  ;;  %v153_v21 = vld [vmem:[#allocation4 + $0x300] sm:$0xff] }
  0x26   :  { %7990 = vst [vmem:[#allocation28_spill] sm:$0xff] %v6022_v7  ;;  %v164_v15 = vld [vmem:[#allocation4 + $0x358] sm:$0xff]  ;;  %7991 = vst [vmem:[#allocation29_spill] sm:$0xff] %v6025_v16  ;;  %v6031_v20 = vpack.c.bf16 %v162_v12, %v154_v11  ;;  %v161_v23 = vld [vmem:[#allocation4 + $0x340] sm:$0xff] }
  0x27   :  { %3532 = vmatpush1.bf16.msra.mxu0 %v6013_v63  ;;  %7992 = vst [vmem:[#allocation30_spill] sm:$0xff] %v6029_v19  ;;  %v155_v24 = vld [vmem:[#allocation4 + $0x310] sm:$0xff]  ;;  %v6034_v25 = vpack.c.bf16 %v164_v15, %v156_v14  ;;  %v170_v29 = vld [vmem:[#allocation4 + $0x388] sm:$0xff]  ;;  %v172_v32 = vld [vmem:[#allocation4 + $0x398] sm:$0xff]  ;;  %v6037_v34 = vpack.c.bf16 %v161_v23, %v153_v21 }
  0x28   :  { %3596 = vmatpush1.bf16.msra.mxu1 %v6017_v1  ;;  %3534 = vmatprep.subr.bf16.mxu0 %v6019_v2  ;;  %7993 = vst [vmem:[#allocation31_spill] sm:$0xff] %v6031_v20  ;;  %v163_v28 = vld [vmem:[#allocation4 + $0x350] sm:$0xff]  ;;  %v178_v30 = vld [vmem:[#allocation4 + $0x3c8] sm:$0xff]  ;;  %v180_v33 = vld [vmem:[#allocation4 + $0x3d8] sm:$0xff] }
  0x29   :  { %3598 = vmatprep.subr.bf16.mxu1 %v6022_v7  ;;  %7994 = vst [vmem:[#allocation32_spill] sm:$0xff] %v6034_v25  ;;  %7995 = vst [vmem:[#allocation33_spill] sm:$0xff] %v6037_v34  ;;  %v6041_v36 = vpack.c.bf16 %v163_v28, %v155_v24  ;;  %v6043_v37 = vpack.c.bf16 %v178_v30, %v170_v29  ;;  %v169_v38 = vld [vmem:[#allocation4 + $0x380] sm:$0xff]  ;;  %v171_v42 = vld [vmem:[#allocation4 + $0x390] sm:$0xff]  ;;  %v6046_v43 = vpack.c.bf16 %v180_v33, %v172_v32 }
  0x2a   :  { %v177_v41 = vld [vmem:[#allocation4 + $0x3c0] sm:$0xff]  ;;  %v179_v45 = vld [vmem:[#allocation4 + $0x3d0] sm:$0xff]  ;;  %v186_v46 = vld [vmem:[#allocation4 + $0x408] sm:$0xff] }
  0x2b   :  { %3536 = vmatpush1.bf16.msra.mxu0 %v6025_v16  ;;  %7996 = vst [vmem:[#allocation34_spill] sm:$0xff] %v6041_v36  ;;  %7997 = vst [vmem:[#allocation35_spill] sm:$0xff] %v6043_v37  ;;  %v194_v47 = vld [vmem:[#allocation4 + $0x448] sm:$0xff]  ;;  %v188_v48 = vld [vmem:[#allocation4 + $0x418] sm:$0xff]  ;;  %v6049_v50 = vpack.c.bf16 %v177_v41, %v169_v38  ;;  %v6053_v54 = vpack.c.bf16 %v179_v45, %v171_v42 }
  0x2c   :  { %3600 = vmatpush1.bf16.msra.mxu1 %v6029_v19  ;;  %3538 = vmatprep.subr.bf16.mxu0 %v6031_v20  ;;  %7998 = vst [vmem:[#allocation36_spill] sm:$0xff] %v6046_v43  ;;  %v196_v49 = vld [vmem:[#allocation4 + $0x458] sm:$0xff]  ;;  %v6055_v55 = vpack.c.bf16 %v194_v47, %v186_v46  ;;  %v185_v56 = vld [vmem:[#allocation4 + $0x400] sm:$0xff]  ;;  %v187_v59 = vld [vmem:[#allocation4 + $0x410] sm:$0xff] }
  0x2d   :  { %3602 = vmatprep.subr.bf16.mxu1 %v6034_v25  ;;  %7999 = vst [vmem:[#allocation37_spill] sm:$0xff] %v6049_v50  ;;  %8000 = vst [vmem:[#allocation38_spill] sm:$0xff] %v6053_v54  ;;  %v193_v58 = vld [vmem:[#allocation4 + $0x440] sm:$0xff]  ;;  %v6058_v60 = vpack.c.bf16 %v196_v49, %v188_v48  ;;  %v195_v61 = vld [vmem:[#allocation4 + $0x450] sm:$0xff] }
  0x2e   :  { %8001 = vst [vmem:[#allocation39_spill] sm:$0xff] %v6055_v55  ;;  %v202_v62 = vld [vmem:[#allocation4 + $0x488] sm:$0xff]  ;;  %v204_v5 = vld [vmem:[#allocation4 + $0x498] sm:$0xff]  ;;  %v6061_v10 = vpack.c.bf16 %v193_v58, %v185_v56  ;;  %v6065_v11 = vpack.c.bf16 %v195_v61, %v187_v59  ;;  %v201_v14 = vld [vmem:[#allocation4 + $0x480] sm:$0xff] }
  0x2f   :  { %3540 = vmatpush1.bf16.msra.mxu0 %v6037_v34  ;;  %8002 = vst [vmem:[#allocation40_spill] sm:$0xff] %v6058_v60  ;;  %v210_v3 = vld [vmem:[#allocation4 + $0x4c8] sm:$0xff]  ;;  %v212_v6 = vld [vmem:[#allocation4 + $0x4d8] sm:$0xff]  ;;  %v209_v15 = vld [vmem:[#allocation4 + $0x4c0] sm:$0xff] }
  0x30   :  { %3604 = vmatpush1.bf16.msra.mxu1 %v6041_v36  ;;  %3542 = vmatprep.subr.bf16.mxu0 %v6043_v37  ;;  %8003 = vst [vmem:[#allocation41_spill] sm:$0xff] %v6061_v10  ;;  %8004 = vst [vmem:[#allocation42_spill] sm:$0xff] %v6065_v11  ;;  %v6067_v12 = vpack.c.bf16 %v210_v3, %v202_v62  ;;  %v203_v21 = vld [vmem:[#allocation4 + $0x490] sm:$0xff]  ;;  %v6070_v23 = vpack.c.bf16 %v212_v6, %v204_v5  ;;  %v218_v28 = vld [vmem:[#allocation4 + $0x508] sm:$0xff] }
  0x31   :  { %3606 = vmatprep.subr.bf16.mxu1 %v6046_v43  ;;  %v211_v24 = vld [vmem:[#allocation4 + $0x4d0] sm:$0xff]  ;;  %v226_v29 = vld [vmem:[#allocation4 + $0x548] sm:$0xff]  ;;  %v220_v30 = vld [vmem:[#allocation4 + $0x518] sm:$0xff]  ;;  %v6073_v33 = vpack.c.bf16 %v209_v15, %v201_v14 }
  0x32   :  { %8005 = vst [vmem:[#allocation43_spill] sm:$0xff] %v6067_v12  ;;  %8006 = vst [vmem:[#allocation44_spill] sm:$0xff] %v6070_v23  ;;  %v228_v32 = vld [vmem:[#allocation4 + $0x558] sm:$0xff]  ;;  %v6077_v38 = vpack.c.bf16 %v211_v24, %v203_v21  ;;  %v6079_v41 = vpack.c.bf16 %v226_v29, %v218_v28  ;;  %v217_v42 = vld [vmem:[#allocation4 + $0x500] sm:$0xff] }
  0x33   :  { %3544 = vmatpush1.bf16.msra.mxu0 %v6049_v50  ;;  %8007 = vst [vmem:[#allocation45_spill] sm:$0xff] %v6073_v33  ;;  %v225_v45 = vld [vmem:[#allocation4 + $0x540] sm:$0xff]  ;;  %v219_v46 = vld [vmem:[#allocation4 + $0x510] sm:$0xff]  ;;  %v6082_v47 = vpack.c.bf16 %v228_v32, %v220_v30  ;;  %v234_v49 = vld [vmem:[#allocation4 + $0x588] sm:$0xff] }
  0x34   :  { %3608 = vmatpush1.bf16.msra.mxu1 %v6053_v54  ;;  %3546 = vmatprep.subr.bf16.mxu0 %v6055_v55  ;;  %8008 = vst [vmem:[#allocation46_spill] sm:$0xff] %v6077_v38  ;;  %8009 = vst [vmem:[#allocation47_spill] sm:$0xff] %v6079_v41  ;;  %v227_v48 = vld [vmem:[#allocation4 + $0x550] sm:$0xff]  ;;  %v242_v56 = vld [vmem:[#allocation4 + $0x5c8] sm:$0xff]  ;;  %v6085_v61 = vpack.c.bf16 %v225_v45, %v217_v42 }
  0x35   :  { %3610 = vmatprep.subr.bf16.mxu1 %v6058_v60  ;;  %8010 = vst [vmem:[#allocation48_spill] sm:$0xff] %v6082_v47  ;;  %v236_v58 = vld [vmem:[#allocation4 + $0x598] sm:$0xff]  ;;  %v6089_v62 = vpack.c.bf16 %v227_v48, %v219_v46  ;;  %v6091_v3 = vpack.c.bf16 %v242_v56, %v234_v49  ;;  %v233_v5 = vld [vmem:[#allocation4 + $0x580] sm:$0xff]  ;;  %v235_v14 = vld [vmem:[#allocation4 + $0x590] sm:$0xff] }
  0x36   :  { %v244_v59 = vld [vmem:[#allocation4 + $0x5d8] sm:$0xff]  ;;  %8011 = vst [vmem:[#allocation49_spill] sm:$0xff] %v6085_v61  ;;  %v241_v6 = vld [vmem:[#allocation4 + $0x5c0] sm:$0xff]  ;;  %v243_v21 = vld [vmem:[#allocation4 + $0x5d0] sm:$0xff] }
  0x37   :  { %3548 = vmatpush1.bf16.msra.mxu0 %v6061_v10  ;;  %8012 = vst [vmem:[#allocation50_spill] sm:$0xff] %v6089_v62  ;;  %8013 = vst [vmem:[#allocation51_spill] sm:$0xff] %v6091_v3  ;;  %v6094_v15 = vpack.c.bf16 %v244_v59, %v236_v58  ;;  %v250_v24 = vld [vmem:[#allocation4 + $0x608] sm:$0xff]  ;;  %v252_v29 = vld [vmem:[#allocation4 + $0x618] sm:$0xff]  ;;  %v6097_v32 = vpack.c.bf16 %v241_v6, %v233_v5  ;;  %v6101_v42 = vpack.c.bf16 %v243_v21, %v235_v14 }
  0x38   :  { %3612 = vmatpush1.bf16.msra.mxu1 %v6065_v11  ;;  %3550 = vmatprep.subr.bf16.mxu0 %v6067_v12  ;;  %v258_v28 = vld [vmem:[#allocation4 + $0x648] sm:$0xff]  ;;  %v260_v30 = vld [vmem:[#allocation4 + $0x658] sm:$0xff]  ;;  %v249_v46 = vld [vmem:[#allocation4 + $0x600] sm:$0xff] }
  0x39   :  { %3614 = vmatprep.subr.bf16.mxu1 %v6070_v23  ;;  %8014 = vst [vmem:[#allocation52_spill] sm:$0xff] %v6094_v15  ;;  %8015 = vst [vmem:[#allocation53_spill] sm:$0xff] %v6097_v32  ;;  %v6103_v45 = vpack.c.bf16 %v258_v28, %v250_v24  ;;  %v257_v48 = vld [vmem:[#allocation4 + $0x640] sm:$0xff]  ;;  %v251_v49 = vld [vmem:[#allocation4 + $0x610] sm:$0xff]  ;;  %v6106_v56 = vpack.c.bf16 %v260_v30, %v252_v29 }
  0x3a   :  { %8016 = vst [vmem:[#allocation54_spill] sm:$0xff] %v6101_v42  ;;  %v259_v58 = vld [vmem:[#allocation4 + $0x650] sm:$0xff]  ;;  %v266_v59 = vld [vmem:[#allocation4 + $0x688] sm:$0xff]  ;;  %v268_v5 = vld [vmem:[#allocation4 + $0x698] sm:$0xff] }
  0x3b   :  { %3552 = vmatpush1.bf16.msra.mxu0 %v6073_v33  ;;  %8017 = vst [vmem:[#allocation55_spill] sm:$0xff] %v6103_v45  ;;  %8018 = vst [vmem:[#allocation56_spill] sm:$0xff] %v6106_v56  ;;  %v274_v0 = vld [vmem:[#allocation4 + $0x6c8] sm:$0xff]  ;;  %v276_v6 = vld [vmem:[#allocation4 + $0x6d8] sm:$0xff]  ;;  %v6113_v14 = vpack.c.bf16 %v259_v58, %v251_v49 }
  0x3c   :  { %3616 = vmatpush1.bf16.msra.mxu1 %v6077_v38  ;;  %3554 = vmatprep.subr.bf16.mxu0 %v6079_v41  ;;  %v6115_v21 = vpack.c.bf16 %v274_v0, %v266_v59  ;;  %v265_v24 = vld [vmem:[#allocation4 + $0x680] sm:$0xff]  ;;  %v267_v29 = vld [vmem:[#allocation4 + $0x690] sm:$0xff]  ;;  %v6118_v30 = vpack.c.bf16 %v276_v6, %v268_v5 }
  0x3d   :  { %3618 = vmatprep.subr.bf16.mxu1 %v6082_v47  ;;  %8020 = vst [vmem:[#allocation58_spill] sm:$0xff] %v6113_v14  ;;  %v273_v28 = vld [vmem:[#allocation4 + $0x6c0] sm:$0xff]  ;;  %v283_v5 = vld [vmem:[#allocation4 + $0x710] sm:$0xff] }
  0x3e   :  { %8021 = vst [vmem:[#allocation59_spill] sm:$0xff] %v6115_v21  ;;  %8022 = vst [vmem:[#allocation60_spill] sm:$0xff] %v6118_v30  ;;  %v281_v58 = vld [vmem:[#allocation4 + $0x700] sm:$0xff] }
  0x3f   :  { %3556 = vmatpush1.bf16.msra.mxu0 %v6085_v61  ;;  %v289_v59 = vld [vmem:[#allocation4 + $0x740] sm:$0xff]  ;;  %v110_v61 = vld [vmem:[#allocation4 + $0x1a8] sm:$0xff] }
  0x40   :  { %3620 = vmatpush1.bf16.msra.mxu1 %v6089_v62  ;;  %3558 = vmatprep.subr.bf16.mxu0 %v6091_v3  ;;  %v6109_v62 = vpack.c.bf16 %v257_v48, %v249_v46  ;;  %v282_v3 = vld [vmem:[#allocation4 + $0x708] sm:$0xff]  ;;  %v284_v46 = vld [vmem:[#allocation4 + $0x718] sm:$0xff] }
  0x41   :  { %3622 = vmatprep.subr.bf16.mxu1 %v6094_v15  ;;  %v275_v15 = vld [vmem:[#allocation4 + $0x6d0] sm:$0xff]  ;;  %v292_v48 = vld [vmem:[#allocation4 + $0x758] sm:$0xff] }
  0x42   :  { %8019 = vst [vmem:[#allocation57_spill] sm:$0xff] %v6109_v62  ;;  %v6125_v0 = vpack.c.bf16 %v275_v15, %v267_v29  ;;  %v6130_v6 = vpack.c.bf16 %v292_v48, %v284_v46  ;;  %v305_v29 = vld [vmem:[#allocation4 + $0x7c0] sm:$0xff]  ;;  %v299_v46 = vld [vmem:[#allocation4 + $0x790] sm:$0xff] }
  0x43   :  { %3560 = vmatpush1.bf16.msra.mxu0 %v6097_v32  ;;  %v290_v32 = vld [vmem:[#allocation4 + $0x748] sm:$0xff] }
  0x44   :  { %3624 = vmatpush1.bf16.msra.mxu1 %v6101_v42  ;;  %3562 = vmatprep.subr.bf16.mxu0 %v6103_v45  ;;  %v6121_v42 = vpack.c.bf16 %v273_v28, %v265_v24  ;;  %8024 = vst [vmem:[#allocation62_spill] sm:$0xff] %v6125_v0  ;;  %v6127_v49 = vpack.c.bf16 %v290_v32, %v282_v3  ;;  %8026 = vst [vmem:[#allocation64_spill] sm:$0xff] %v6130_v6  ;;  %v298_v45 = vld [vmem:[#allocation4 + $0x788] sm:$0xff]  ;;  %v300_v24 = vld [vmem:[#allocation4 + $0x798] sm:$0xff] }
  0x45   :  { %3626 = vmatprep.subr.bf16.mxu1 %v6106_v56  ;;  %v291_v56 = vld [vmem:[#allocation4 + $0x750] sm:$0xff]  ;;  %v308_v28 = vld [vmem:[#allocation4 + $0x7d8] sm:$0xff]  ;;  %v297_v32 = vld [vmem:[#allocation4 + $0x780] sm:$0xff] }
  0x46   :  { %8023 = vst [vmem:[#allocation61_spill] sm:$0xff] %v6121_v42  ;;  %8025 = vst [vmem:[#allocation63_spill] sm:$0xff] %v6127_v49  ;;  %v6137_v3 = vpack.c.bf16 %v291_v56, %v283_v5  ;;  %v6142_v48 = vpack.c.bf16 %v308_v28, %v300_v24  ;;  %v61_v56 = vld [vmem:[#allocation4 + $0x20] sm:$0xff]  ;;  %v63_v24 = vld [vmem:[#allocation4 + $0x30] sm:$0xff] }
  0x47   :  { %3564 = vmatpush1.bf16.msra.mxu0 %v6109_v62  ;;  %v306_v62 = vld [vmem:[#allocation4 + $0x7c8] sm:$0xff]  ;;  %v69_v5 = vld [vmem:[#allocation4 + $0x60] sm:$0xff] }
  0x48   :  { %3628 = vmatpush1.bf16.msra.mxu1 %v6113_v14  ;;  %3566 = vmatprep.subr.bf16.mxu0 %v6115_v21  ;;  %v6133_v14 = vpack.c.bf16 %v289_v59, %v281_v58  ;;  %8028 = vst [vmem:[#allocation66_spill] sm:$0xff] %v6137_v3  ;;  %v6139_v15 = vpack.c.bf16 %v306_v62, %v298_v45  ;;  %8030 = vst [vmem:[#allocation68_spill] sm:$0xff] %v6142_v48  ;;  %v62_v21 = vld [vmem:[#allocation4 + $0x28] sm:$0xff]  ;;  %v64_v58 = vld [vmem:[#allocation4 + $0x38] sm:$0xff] }
  0x49   :  { %3630 = vmatprep.subr.bf16.mxu1 %v6118_v30  ;;  %v307_v30 = vld [vmem:[#allocation4 + $0x7d0] sm:$0xff]  ;;  %v72_v59 = vld [vmem:[#allocation4 + $0x78] sm:$0xff] }
  0x4a   :  { %8027 = vst [vmem:[#allocation65_spill] sm:$0xff] %v6133_v14  ;;  %8029 = vst [vmem:[#allocation67_spill] sm:$0xff] %v6139_v15  ;;  %v6149_v62 = vpack.c.bf16 %v307_v30, %v299_v46  ;;  %v6154_v28 = vpack.c.bf16 %v72_v59, %v64_v58  ;;  %v77_v30 = vld [vmem:[#allocation4 + $0xa0] sm:$0xff]  ;;  %v79_v58 = vld [vmem:[#allocation4 + $0xb0] sm:$0xff] }
  0x4b   :  { %3568 = vmatpush1.bf16.msra.mxu0 %v6121_v42  ;;  %v70_v42 = vld [vmem:[#allocation4 + $0x68] sm:$0xff]  ;;  %v85_v46 = vld [vmem:[#allocation4 + $0xe0] sm:$0xff] }
  0x4c   :  { %3632 = vmatpush1.bf16.msra.mxu1 %v6125_v0  ;;  %3570 = vmatprep.subr.bf16.mxu0 %v6127_v49  ;;  %v6145_v0 = vpack.c.bf16 %v305_v29, %v297_v32  ;;  %8032 = vst [vmem:[#allocation70_spill] sm:$0xff] %v6149_v62  ;;  %v6151_v45 = vpack.c.bf16 %v70_v42, %v62_v21  ;;  %8034 = vst [vmem:[#allocation72_spill] sm:$0xff] %v6154_v28  ;;  %v78_v49 = vld [vmem:[#allocation4 + $0xa8] sm:$0xff]  ;;  %v80_v32 = vld [vmem:[#allocation4 + $0xb8] sm:$0xff] }
  0x4d   :  { %3634 = vmatprep.subr.bf16.mxu1 %v6130_v6  ;;  %v71_v6 = vld [vmem:[#allocation4 + $0x70] sm:$0xff]  ;;  %v88_v29 = vld [vmem:[#allocation4 + $0xf8] sm:$0xff] }
  0x4e   :  { %8031 = vst [vmem:[#allocation69_spill] sm:$0xff] %v6145_v0  ;;  %8033 = vst [vmem:[#allocation71_spill] sm:$0xff] %v6151_v45  ;;  %v6161_v42 = vpack.c.bf16 %v71_v6, %v63_v24  ;;  %v6166_v59 = vpack.c.bf16 %v88_v29, %v80_v32  ;;  %v93_v24 = vld [vmem:[#allocation4 + $0x120] sm:$0xff]  ;;  %v95_v29 = vld [vmem:[#allocation4 + $0x130] sm:$0xff] }
  0x4f   :  { %3572 = vmatpush1.bf16.msra.mxu0 %v6133_v14  ;;  %v86_v14 = vld [vmem:[#allocation4 + $0xe8] sm:$0xff]  ;;  %v101_v32 = vld [vmem:[#allocation4 + $0x160] sm:$0xff] }
  0x50   :  { %3636 = vmatpush1.bf16.msra.mxu1 %v6137_v3  ;;  %3574 = vmatprep.subr.bf16.mxu0 %v6139_v15  ;;  %v6157_v3 = vpack.c.bf16 %v69_v5, %v61_v56  ;;  %8036 = vst [vmem:[#allocation74_spill] sm:$0xff] %v6161_v42  ;;  %v6163_v21 = vpack.c.bf16 %v86_v14, %v78_v49  ;;  %8038 = vst [vmem:[#allocation76_spill] sm:$0xff] %v6166_v59  ;;  %v94_v15 = vld [vmem:[#allocation4 + $0x128] sm:$0xff]  ;;  %v8039_v56 = vmov 0.0   ;;  %v96_v5 = vld [vmem:[#allocation4 + $0x138] sm:$0xff] }
  0x51   :  { %3638 = vmatprep.subr.bf16.mxu1 %v6142_v48  ;;  %v87_v48 = vld [vmem:[#allocation4 + $0xf0] sm:$0xff]  ;;  %v6171_v14 = vpack.c.bf16 %v85_v46, %v77_v30  ;;  %v112_v30 = vld [vmem:[#allocation4 + $0x1b8] sm:$0xff] }
  0x52   :  { %8035 = vst [vmem:[#allocation73_spill] sm:$0xff] %v6157_v3  ;;  %8037 = vst [vmem:[#allocation75_spill] sm:$0xff] %v6163_v21  ;;  %v6175_v49 = vpack.c.bf16 %v87_v48, %v79_v58  ;;  %v120_v46 = vld [vmem:[#allocation4 + $0x1f8] sm:$0xff]  ;;  %v117_v58 = vld [vmem:[#allocation4 + $0x1e0] sm:$0xff] }
  0x53   :  { %3576 = vmatpush1.bf16.msra.mxu0 %v6145_v0  ;;  %v102_v0 = vld [vmem:[#allocation4 + $0x168] sm:$0xff]  ;;  %8040 = vst [vmem:[#allocation77_spill] sm:$0xff] %v6171_v14 }
  0x54   :  { %3640 = vmatpush1.bf16.msra.mxu1 %v6149_v62  ;;  %3642 = vmatprep.subr.bf16.mxu0 %v6151_v45  ;;  %v104_v62 = vld [vmem:[#allocation4 + $0x178] sm:$0xff]  ;;  %8041 = vst [vmem:[#allocation78_spill] sm:$0xff] %v6175_v49  ;;  %v6177_v6 = vpack.c.bf16 %v102_v0, %v94_v15  ;;  %v103_v45 = vld [vmem:[#allocation4 + $0x170] sm:$0xff]  ;;  %v6185_v0 = vpack.c.bf16 %v101_v32, %v93_v24 }
  0x55   :  { %3706 = vmatprep.subr.bf16.mxu1 %v6154_v28  ;;  %v6180_v28 = vpack.c.bf16 %v104_v62, %v96_v5  ;;  %v6189_v15 = vpack.c.bf16 %v103_v45, %v95_v29  ;;  %v109_v62 = vld [vmem:[#allocation4 + $0x1a0] sm:$0xff]  ;;  %v111_v5 = vld [vmem:[#allocation4 + $0x1b0] sm:$0xff]  ;;  %v128_v24 = vld [vmem:[#allocation4 + $0x238] sm:$0xff] }
  0x56   :  { %378 = vmatmul.mubr.f32.vlgmr.msra.gmra.mrb[0].mxu0 %v8039_v56  ;;  %8042 = vst [vmem:[#allocation79_spill] sm:$0xff] %v6177_v6  ;;  %8044 = vst [vmem:[#allocation81_spill] sm:$0xff] %v6185_v0  ;;  %v136_v32 = vld [vmem:[#allocation4 + $0x278] sm:$0xff]  ;;  %v125_v45 = vld [vmem:[#allocation4 + $0x220] sm:$0xff] }
  0x57   :  { %449 = vmatmul.mubr.f32.vlgmr.msra.gmra.mrb[0].mxu1 %v8039_v56  ;;  %3644 = vmatpush1.bf16.msra.mxu0 %v6157_v3  ;;  %8043 = vst [vmem:[#allocation80_spill] sm:$0xff] %v6180_v28  ;;  %v118_v3 = vld [vmem:[#allocation4 + $0x1e8] sm:$0xff]  ;;  %8045 = vst [vmem:[#allocation82_spill] sm:$0xff] %v6189_v15  ;;  %v133_v29 = vld [vmem:[#allocation4 + $0x260] sm:$0xff] }
  0x58   :  { %3708 = vmatpush1.bf16.msra.mxu1 %v6161_v42  ;;  %3646 = vmatprep.subr.bf16.mxu0 %v6163_v21  ;;  %v6191_v48 = vpack.c.bf16 %v118_v3, %v110_v61  ;;  %v119_v21 = vld [vmem:[#allocation4 + $0x1f0] sm:$0xff]  ;;  %v126_v42 = vld [vmem:[#allocation4 + $0x228] sm:$0xff] }
  0x59   :  { %3710 = vmatprep.subr.bf16.mxu1 %v6166_v59  ;;  %519 = vmatprep.mubr.f32.mxu0 %v8039_v56  ;;  %v6194_v59 = vpack.c.bf16 %v120_v46, %v112_v30  ;;  %v6201_v61 = vpack.c.bf16 %v119_v21, %v111_v5  ;;  %v127_v30 = vld [vmem:[#allocation4 + $0x230] sm:$0xff]  ;;  %v6206_v46 = vpack.c.bf16 %v136_v32, %v128_v24  ;;  %v149_v5 = vld [vmem:[#allocation4 + $0x2e0] sm:$0xff] }
  0x5a   :  { %590 = vmatprep.mubr.f32.mxu1 %v8039_v56  ;;  %8046 = vst [vmem:[#allocation83_spill] sm:$0xff] %v6191_v48  ;;  %v143_v24 = vld [vmem:[#allocation4 + $0x2b0] sm:$0xff] }
  0x5b   :  { %3648 = vmatpush1.bf16.msra.mxu0 %v6171_v14  ;;  %8047 = vst [vmem:[#allocation84_spill] sm:$0xff] %v6194_v59  ;;  %v134_v14 = vld [vmem:[#allocation4 + $0x268] sm:$0xff]  ;;  %8049 = vst [vmem:[#allocation86_spill] sm:$0xff] %v6201_v61 }
  0x5c   :  { %3712 = vmatpush1.bf16.msra.mxu1 %v6175_v49  ;;  %3650 = vmatprep.subr.bf16.mxu0 %v6177_v6  ;;  %v6197_v49 = vpack.c.bf16 %v117_v58, %v109_v62  ;;  %v6203_v3 = vpack.c.bf16 %v134_v14, %v126_v42  ;;  %8051 = vst [vmem:[#allocation88_spill] sm:$0xff] %v6206_v46  ;;  %v142_v6 = vld [vmem:[#allocation4 + $0x2a8] sm:$0xff]  ;;  %v144_v62 = vld [vmem:[#allocation4 + $0x2b8] sm:$0xff]  ;;  %v141_v14 = vld [vmem:[#allocation4 + $0x2a0] sm:$0xff] }
  0x5d   :  { %3714 = vmatprep.subr.bf16.mxu1 %v6180_v28  ;;  %v135_v28 = vld [vmem:[#allocation4 + $0x270] sm:$0xff]  ;;  %v152_v58 = vld [vmem:[#allocation4 + $0x2f8] sm:$0xff] }
  0x5e   :  { %8048 = vst [vmem:[#allocation85_spill] sm:$0xff] %v6197_v49  ;;  %8050 = vst [vmem:[#allocation87_spill] sm:$0xff] %v6203_v3  ;;  %v6213_v42 = vpack.c.bf16 %v135_v28, %v127_v30  ;;  %v6218_v32 = vpack.c.bf16 %v152_v58, %v144_v62  ;;  %v165_v30 = vld [vmem:[#allocation4 + $0x360] sm:$0xff]  ;;  %v159_v62 = vld [vmem:[#allocation4 + $0x330] sm:$0xff] }
  0x5f   :  { %3652 = vmatpush1.bf16.msra.mxu0 %v6185_v0  ;;  %v150_v0 = vld [vmem:[#allocation4 + $0x2e8] sm:$0xff] }
  0x60   :  { %3716 = vmatpush1.bf16.msra.mxu1 %v6189_v15  ;;  %3654 = vmatprep.subr.bf16.mxu0 %v6191_v48  ;;  %v6209_v15 = vpack.c.bf16 %v133_v29, %v125_v45  ;;  %8053 = vst [vmem:[#allocation90_spill] sm:$0xff] %v6213_v42  ;;  %v6215_v21 = vpack.c.bf16 %v150_v0, %v142_v6  ;;  %8055 = vst [vmem:[#allocation92_spill] sm:$0xff] %v6218_v32  ;;  %v158_v48 = vld [vmem:[#allocation4 + $0x328] sm:$0xff]  ;;  %v160_v45 = vld [vmem:[#allocation4 + $0x338] sm:$0xff] }
  0x61   :  { %3718 = vmatprep.subr.bf16.mxu1 %v6194_v59  ;;  %v151_v59 = vld [vmem:[#allocation4 + $0x2f0] sm:$0xff]  ;;  %v168_v29 = vld [vmem:[#allocation4 + $0x378] sm:$0xff]  ;;  %v157_v0 = vld [vmem:[#allocation4 + $0x320] sm:$0xff] }
  0x62   :  { %8052 = vst [vmem:[#allocation89_spill] sm:$0xff] %v6209_v15  ;;  %8054 = vst [vmem:[#allocation91_spill] sm:$0xff] %v6215_v21  ;;  %v6225_v28 = vpack.c.bf16 %v151_v59, %v143_v24  ;;  %v6230_v58 = vpack.c.bf16 %v168_v29, %v160_v45  ;;  %v181_v24 = vld [vmem:[#allocation4 + $0x3e0] sm:$0xff]  ;;  %v175_v45 = vld [vmem:[#allocation4 + $0x3b0] sm:$0xff] }
  0x63   :  { %3656 = vmatpush1.bf16.msra.mxu0 %v6197_v49  ;;  %v166_v49 = vld [vmem:[#allocation4 + $0x368] sm:$0xff] }
  0x64   :  { %3720 = vmatpush1.bf16.msra.mxu1 %v6201_v61  ;;  %3658 = vmatprep.subr.bf16.mxu0 %v6203_v3  ;;  %v6221_v61 = vpack.c.bf16 %v149_v5, %v141_v14  ;;  %8057 = vst [vmem:[#allocation94_spill] sm:$0xff] %v6225_v28  ;;  %v6227_v6 = vpack.c.bf16 %v166_v49, %v158_v48  ;;  %8059 = vst [vmem:[#allocation96_spill] sm:$0xff] %v6230_v58  ;;  %v174_v3 = vld [vmem:[#allocation4 + $0x3a8] sm:$0xff]  ;;  %v176_v14 = vld [vmem:[#allocation4 + $0x3b8] sm:$0xff] }
  0x65   :  { %3722 = vmatprep.subr.bf16.mxu1 %v6206_v46  ;;  %v167_v46 = vld [vmem:[#allocation4 + $0x370] sm:$0xff]  ;;  %v184_v5 = vld [vmem:[#allocation4 + $0x3f8] sm:$0xff]  ;;  %v173_v48 = vld [vmem:[#allocation4 + $0x3a0] sm:$0xff] }
  0x66   :  { %8056 = vst [vmem:[#allocation93_spill] sm:$0xff] %v6221_v61  ;;  %8058 = vst [vmem:[#allocation95_spill] sm:$0xff] %v6227_v6  ;;  %v6237_v59 = vpack.c.bf16 %v167_v46, %v159_v62  ;;  %v6242_v29 = vpack.c.bf16 %v184_v5, %v176_v14  ;;  %v189_v46 = vld [vmem:[#allocation4 + $0x420] sm:$0xff]  ;;  %v191_v14 = vld [vmem:[#allocation4 + $0x430] sm:$0xff] }
  0x67   :  { %3660 = vmatpush1.bf16.msra.mxu0 %v6209_v15  ;;  %v182_v15 = vld [vmem:[#allocation4 + $0x3e8] sm:$0xff]  ;;  %v197_v62 = vld [vmem:[#allocation4 + $0x460] sm:$0xff] }
  0x68   :  { %3724 = vmatpush1.bf16.msra.mxu1 %v6213_v42  ;;  %3662 = vmatprep.subr.bf16.mxu0 %v6215_v21  ;;  %v6233_v42 = vpack.c.bf16 %v165_v30, %v157_v0  ;;  %8061 = vst [vmem:[#allocation98_spill] sm:$0xff] %v6237_v59  ;;  %v6239_v49 = vpack.c.bf16 %v182_v15, %v174_v3  ;;  %8063 = vst [vmem:[#allocation100_spill] sm:$0xff] %v6242_v29  ;;  %v190_v21 = vld [vmem:[#allocation4 + $0x428] sm:$0xff]  ;;  %v192_v0 = vld [vmem:[#allocation4 + $0x438] sm:$0xff] }
  0x69   :  { %3726 = vmatprep.subr.bf16.mxu1 %v6218_v32  ;;  %v183_v32 = vld [vmem:[#allocation4 + $0x3f0] sm:$0xff]  ;;  %v200_v30 = vld [vmem:[#allocation4 + $0x478] sm:$0xff] }
  0x6a   :  { %8060 = vst [vmem:[#allocation97_spill] sm:$0xff] %v6233_v42  ;;  %8062 = vst [vmem:[#allocation99_spill] sm:$0xff] %v6239_v49  ;;  %v6249_v15 = vpack.c.bf16 %v183_v32, %v175_v45  ;;  %v6254_v5 = vpack.c.bf16 %v200_v30, %v192_v0  ;;  %v205_v32 = vld [vmem:[#allocation4 + $0x4a0] sm:$0xff]  ;;  %v207_v0 = vld [vmem:[#allocation4 + $0x4b0] sm:$0xff] }
  0x6b   :  { %3664 = vmatpush1.bf16.msra.mxu0 %v6221_v61  ;;  %v198_v61 = vld [vmem:[#allocation4 + $0x468] sm:$0xff]  ;;  %v213_v45 = vld [vmem:[#allocation4 + $0x4e0] sm:$0xff] }
  0x6c   :  { %3728 = vmatpush1.bf16.msra.mxu1 %v6225_v28  ;;  %3666 = vmatprep.subr.bf16.mxu0 %v6227_v6  ;;  %v6245_v28 = vpack.c.bf16 %v181_v24, %v173_v48  ;;  %8065 = vst [vmem:[#allocation102_spill] sm:$0xff] %v6249_v15  ;;  %v6251_v3 = vpack.c.bf16 %v198_v61, %v190_v21  ;;  %8067 = vst [vmem:[#allocation104_spill] sm:$0xff] %v6254_v5  ;;  %v206_v6 = vld [vmem:[#allocation4 + $0x4a8] sm:$0xff]  ;;  %v208_v48 = vld [vmem:[#allocation4 + $0x4b8] sm:$0xff] }
  0x6d   :  { %3730 = vmatprep.subr.bf16.mxu1 %v6230_v58  ;;  %v199_v58 = vld [vmem:[#allocation4 + $0x470] sm:$0xff]  ;;  %v216_v24 = vld [vmem:[#allocation4 + $0x4f8] sm:$0xff] }
  0x6e   :  { %8064 = vst [vmem:[#allocation101_spill] sm:$0xff] %v6245_v28  ;;  %8066 = vst [vmem:[#allocation103_spill] sm:$0xff] %v6251_v3  ;;  %v6261_v61 = vpack.c.bf16 %v199_v58, %v191_v14  ;;  %v6266_v30 = vpack.c.bf16 %v216_v24, %v208_v48  ;;  %v221_v58 = vld [vmem:[#allocation4 + $0x520] sm:$0xff]  ;;  %v223_v48 = vld [vmem:[#allocation4 + $0x530] sm:$0xff] }
  0x6f   :  { %3668 = vmatpush1.bf16.msra.mxu0 %v6233_v42  ;;  %v214_v42 = vld [vmem:[#allocation4 + $0x4e8] sm:$0xff]  ;;  %v229_v14 = vld [vmem:[#allocation4 + $0x560] sm:$0xff] }
  0x70   :  { %3732 = vmatpush1.bf16.msra.mxu1 %v6237_v59  ;;  %3670 = vmatprep.subr.bf16.mxu0 %v6239_v49  ;;  %v6257_v59 = vpack.c.bf16 %v197_v62, %v189_v46  ;;  %8069 = vst [vmem:[#allocation106_spill] sm:$0xff] %v6261_v61  ;;  %v6263_v21 = vpack.c.bf16 %v214_v42, %v206_v6  ;;  %8071 = vst [vmem:[#allocation108_spill] sm:$0xff] %v6266_v30  ;;  %v222_v49 = vld [vmem:[#allocation4 + $0x528] sm:$0xff]  ;;  %v224_v46 = vld [vmem:[#allocation4 + $0x538] sm:$0xff] }
  0x71   :  { %3734 = vmatprep.subr.bf16.mxu1 %v6242_v29  ;;  %v215_v29 = vld [vmem:[#allocation4 + $0x4f0] sm:$0xff]  ;;  %v232_v62 = vld [vmem:[#allocation4 + $0x578] sm:$0xff] }
  0x72   :  { %8068 = vst [vmem:[#allocation105_spill] sm:$0xff] %v6257_v59  ;;  %8070 = vst [vmem:[#allocation107_spill] sm:$0xff] %v6263_v21  ;;  %v6273_v42 = vpack.c.bf16 %v215_v29, %v207_v0  ;;  %v6278_v24 = vpack.c.bf16 %v232_v62, %v224_v46  ;;  %v237_v29 = vld [vmem:[#allocation4 + $0x5a0] sm:$0xff]  ;;  %v239_v46 = vld [vmem:[#allocation4 + $0x5b0] sm:$0xff] }
  0x73   :  { %3672 = vmatpush1.bf16.msra.mxu0 %v6245_v28  ;;  %v230_v28 = vld [vmem:[#allocation4 + $0x568] sm:$0xff]  ;;  %v245_v0 = vld [vmem:[#allocation4 + $0x5e0] sm:$0xff] }
  0x74   :  { %3736 = vmatpush1.bf16.msra.mxu1 %v6249_v15  ;;  %3674 = vmatprep.subr.bf16.mxu0 %v6251_v3  ;;  %v6269_v15 = vpack.c.bf16 %v213_v45, %v205_v32  ;;  %8073 = vst [vmem:[#allocation110_spill] sm:$0xff] %v6273_v42  ;;  %v6275_v6 = vpack.c.bf16 %v230_v28, %v222_v49  ;;  %8075 = vst [vmem:[#allocation112_spill] sm:$0xff] %v6278_v24  ;;  %v238_v3 = vld [vmem:[#allocation4 + $0x5a8] sm:$0xff]  ;;  %v240_v32 = vld [vmem:[#allocation4 + $0x5b8] sm:$0xff] }
  0x75   :  { %3738 = vmatprep.subr.bf16.mxu1 %v6254_v5  ;;  %v231_v5 = vld [vmem:[#allocation4 + $0x570] sm:$0xff]  ;;  %v248_v45 = vld [vmem:[#allocation4 + $0x5f8] sm:$0xff] }
  0x76   :  { %8072 = vst [vmem:[#allocation109_spill] sm:$0xff] %v6269_v15  ;;  %8074 = vst [vmem:[#allocation111_spill] sm:$0xff] %v6275_v6  ;;  %v6285_v28 = vpack.c.bf16 %v231_v5, %v223_v48  ;;  %v6290_v62 = vpack.c.bf16 %v248_v45, %v240_v32  ;;  %v253_v5 = vld [vmem:[#allocation4 + $0x620] sm:$0xff]  ;;  %v255_v32 = vld [vmem:[#allocation4 + $0x630] sm:$0xff] }
  0x77   :  { %3676 = vmatpush1.bf16.msra.mxu0 %v6257_v59  ;;  %v246_v59 = vld [vmem:[#allocation4 + $0x5e8] sm:$0xff]  ;;  %v261_v48 = vld [vmem:[#allocation4 + $0x660] sm:$0xff] }
  0x78   :  { %3740 = vmatpush1.bf16.msra.mxu1 %v6261_v61  ;;  %3678 = vmatprep.subr.bf16.mxu0 %v6263_v21  ;;  %v6281_v61 = vpack.c.bf16 %v229_v14, %v221_v58  ;;  %8077 = vst [vmem:[#allocation114_spill] sm:$0xff] %v6285_v28  ;;  %v6287_v49 = vpack.c.bf16 %v246_v59, %v238_v3  ;;  %8079 = vst [vmem:[#allocation116_spill] sm:$0xff] %v6290_v62  ;;  %v254_v21 = vld [vmem:[#allocation4 + $0x628] sm:$0xff]  ;;  %v256_v58 = vld [vmem:[#allocation4 + $0x638] sm:$0xff] }
  0x79   :  { %3742 = vmatprep.subr.bf16.mxu1 %v6266_v30  ;;  %v247_v30 = vld [vmem:[#allocation4 + $0x5f0] sm:$0xff]  ;;  %v264_v14 = vld [vmem:[#allocation4 + $0x678] sm:$0xff] }
  0x7a   :  { %8076 = vst [vmem:[#allocation113_spill] sm:$0xff] %v6281_v61  ;;  %8078 = vst [vmem:[#allocation115_spill] sm:$0xff] %v6287_v49  ;;  %v6297_v59 = vpack.c.bf16 %v247_v30, %v239_v46  ;;  %v6302_v45 = vpack.c.bf16 %v264_v14, %v256_v58  ;;  %v269_v30 = vld [vmem:[#allocation4 + $0x6a0] sm:$0xff]  ;;  %v271_v58 = vld [vmem:[#allocation4 + $0x6b0] sm:$0xff] }
  0x7b   :  { %3680 = vmatpush1.bf16.msra.mxu0 %v6269_v15  ;;  %v262_v15 = vld [vmem:[#allocation4 + $0x668] sm:$0xff]  ;;  %v277_v46 = vld [vmem:[#allocation4 + $0x6e0] sm:$0xff] }
  0x7c   :  { %3744 = vmatpush1.bf16.msra.mxu1 %v6273_v42  ;;  %3682 = vmatprep.subr.bf16.mxu0 %v6275_v6  ;;  %v6293_v42 = vpack.c.bf16 %v245_v0, %v237_v29  ;;  %8081 = vst [vmem:[#allocation118_spill] sm:$0xff] %v6297_v59  ;;  %v6299_v3 = vpack.c.bf16 %v262_v15, %v254_v21  ;;  %8083 = vst [vmem:[#allocation120_spill] sm:$0xff] %v6302_v45  ;;  %v270_v6 = vld [vmem:[#allocation4 + $0x6a8] sm:$0xff]  ;;  %v272_v29 = vld [vmem:[#allocation4 + $0x6b8] sm:$0xff] }
  0x7d   :  { %3746 = vmatprep.subr.bf16.mxu1 %v6278_v24  ;;  %v263_v24 = vld [vmem:[#allocation4 + $0x670] sm:$0xff]  ;;  %v280_v0 = vld [vmem:[#allocation4 + $0x6f8] sm:$0xff] }
  0x7e   :  { %8080 = vst [vmem:[#allocation117_spill] sm:$0xff] %v6293_v42  ;;  %8082 = vst [vmem:[#allocation119_spill] sm:$0xff] %v6299_v3  ;;  %v6309_v15 = vpack.c.bf16 %v263_v24, %v255_v32  ;;  %v6314_v14 = vpack.c.bf16 %v280_v0, %v272_v29  ;;  %v285_v24 = vld [vmem:[#allocation4 + $0x720] sm:$0xff]  ;;  %v287_v29 = vld [vmem:[#allocation4 + $0x730] sm:$0xff] }
  0x7f   :  { %3684 = vmatpush1.bf16.msra.mxu0 %v6281_v61  ;;  %v278_v61 = vld [vmem:[#allocation4 + $0x6e8] sm:$0xff]  ;;  %v293_v32 = vld [vmem:[#allocation4 + $0x760] sm:$0xff] }
  0x80   :  { %3748 = vmatpush1.bf16.msra.mxu1 %v6285_v28  ;;  %3686 = vmatprep.subr.bf16.mxu0 %v6287_v49  ;;  %v6305_v28 = vpack.c.bf16 %v261_v48, %v253_v5  ;;  %8085 = vst [vmem:[#allocation122_spill] sm:$0xff] %v6309_v15  ;;  %v6311_v21 = vpack.c.bf16 %v278_v61, %v270_v6  ;;  %8087 = vst [vmem:[#allocation124_spill] sm:$0xff] %v6314_v14  ;;  %v286_v49 = vld [vmem:[#allocation4 + $0x728] sm:$0xff]  ;;  %v288_v5 = vld [vmem:[#allocation4 + $0x738] sm:$0xff] }
  0x81   :  { %3750 = vmatprep.subr.bf16.mxu1 %v6290_v62  ;;  %v279_v62 = vld [vmem:[#allocation4 + $0x6f0] sm:$0xff]  ;;  %v296_v48 = vld [vmem:[#allocation4 + $0x778] sm:$0xff] }
  0x82   :  { %8084 = vst [vmem:[#allocation121_spill] sm:$0xff] %v6305_v28  ;;  %8086 = vst [vmem:[#allocation123_spill] sm:$0xff] %v6311_v21  ;;  %v6321_v61 = vpack.c.bf16 %v279_v62, %v271_v58  ;;  %v6326_v0 = vpack.c.bf16 %v296_v48, %v288_v5  ;;  %v301_v62 = vld [vmem:[#allocation4 + $0x7a0] sm:$0xff]  ;;  %v303_v48 = vld [vmem:[#allocation4 + $0x7b0] sm:$0xff] }
  0x83   :  { %3688 = vmatpush1.bf16.msra.mxu0 %v6293_v42  ;;  %v294_v42 = vld [vmem:[#allocation4 + $0x768] sm:$0xff]  ;;  %v309_v58 = vld [vmem:[#allocation4 + $0x7e0] sm:$0xff] }
  0x84   :  { %3752 = vmatpush1.bf16.msra.mxu1 %v6297_v59  ;;  %3690 = vmatprep.subr.bf16.mxu0 %v6299_v3  ;;  %v6317_v59 = vpack.c.bf16 %v277_v46, %v269_v30  ;;  %8089 = vst [vmem:[#allocation126_spill] sm:$0xff] %v6321_v61  ;;  %v6323_v6 = vpack.c.bf16 %v294_v42, %v286_v49  ;;  %8091 = vst [vmem:[#allocation128_spill] sm:$0xff] %v6326_v0  ;;  %v302_v3 = vld [vmem:[#allocation4 + $0x7a8] sm:$0xff]  ;;  %v304_v30 = vld [vmem:[#allocation4 + $0x7b8] sm:$0xff] }
  0x85   :  { %3754 = vmatprep.subr.bf16.mxu1 %v6302_v45  ;;  %v295_v45 = vld [vmem:[#allocation4 + $0x770] sm:$0xff]  ;;  %v312_v46 = vld [vmem:[#allocation4 + $0x7f8] sm:$0xff] }
  0x86   :  { %8088 = vst [vmem:[#allocation125_spill] sm:$0xff] %v6317_v59  ;;  %8090 = vst [vmem:[#allocation127_spill] sm:$0xff] %v6323_v6  ;;  %v6333_v42 = vpack.c.bf16 %v295_v45, %v287_v29  ;;  %v6338_v5 = vpack.c.bf16 %v312_v46, %v304_v30  ;;  %v8102_v29 = vld [vmem:[#allocation53_spill] sm:$0xff]  ;;  %v8103_v30 = vld [vmem:[#allocation54_spill] sm:$0xff] }
  0x87   :  { %3692 = vmatpush1.bf16.msra.mxu0 %v6305_v28  ;;  %v310_v28 = vld [vmem:[#allocation4 + $0x7e8] sm:$0xff]  ;;  %v8104_v46 = vld [vmem:[#allocation55_spill] sm:$0xff] }
  0x88   :  { %3756 = vmatpush1.bf16.msra.mxu1 %v6309_v15  ;;  %3694 = vmatprep.subr.bf16.mxu0 %v6311_v21  ;;  %v6329_v15 = vpack.c.bf16 %v293_v32, %v285_v24  ;;  %8093 = vst [vmem:[#allocation130_spill] sm:$0xff] %v6333_v42  ;;  %v6335_v49 = vpack.c.bf16 %v310_v28, %v302_v3  ;;  %8095 = vst [vmem:[#allocation132_spill] sm:$0xff] %v6338_v5  ;;  %v8098_v28 = vld [vmem:[#allocation49_spill] sm:$0xff]  ;;  %v8099_v3 = vld [vmem:[#allocation50_spill] sm:$0xff] }
  0x89   :  { %3758 = vmatprep.subr.bf16.mxu1 %v6314_v14  ;;  %v311_v14 = vld [vmem:[#allocation4 + $0x7f0] sm:$0xff]  ;;  %v6341_v24 = vpack.c.bf16 %v309_v58, %v301_v62  ;;  %v8101_v32 = vld [vmem:[#allocation52_spill] sm:$0xff] }
  0x8a   :  { %8092 = vst [vmem:[#allocation129_spill] sm:$0xff] %v6329_v15  ;;  %8094 = vst [vmem:[#allocation131_spill] sm:$0xff] %v6335_v49  ;;  %v6345_v45 = vpack.c.bf16 %v311_v14, %v303_v48  ;;  %v8100_v14 = vld [vmem:[#allocation51_spill] sm:$0xff]  ;;  %v8105_v62 = vld [vmem:[#allocation56_spill] sm:$0xff] }
  0x8b   :  { %3696 = vmatpush1.bf16.msra.mxu0 %v6317_v59  ;;  %8096 = vst [vmem:[#allocation133_spill] sm:$0xff] %v6341_v24  ;;  %v8106_v58 = vld [vmem:[#allocation57_spill] sm:$0xff]  ;;  %v8107_v48 = vld [vmem:[#allocation58_spill] sm:$0xff] }
  0x8c   :  { %3760 = vmatpush1.bf16.msra.mxu1 %v6321_v61  ;;  %3698 = vmatprep.subr.bf16.mxu0 %v6323_v6  ;;  %8097 = vst [vmem:[#allocation134_spill] sm:$0xff] %v6345_v45 }
  0x8d   :  { %3762 = vmatprep.subr.bf16.mxu1 %v6326_v0 }
  0x8f   :  { %3700 = vmatpush1.bf16.msra.mxu0 %v6329_v15 }
  0x90   :  { %3764 = vmatpush1.bf16.msra.mxu1 %v6333_v42  ;;  %3702 = vmatprep.subr.bf16.mxu0 %v6335_v49 }
  0x91   :  { %3766 = vmatprep.subr.bf16.mxu1 %v6338_v5 }
  0x93   :  { %3704 = vmatpush1.bf16.msra.mxu0 %v6341_v24 }
  0x94   :  { %3768 = vmatpush1.bf16.msra.mxu1 %v6345_v45  ;;  %3770 = vmatprep.subr.bf16.mxu0 %v5962_v4 }
  0x95   :  { %3834 = vmatprep.subr.bf16.mxu1 %v5964_v8 }
  0x96   :  { %520 = vmatmul.mubr.f32.vlgmr.msra.gmra.mrb[2].mxu0 %v8039_v56 }
  0x97   :  { %591 = vmatmul.mubr.f32.vlgmr.msra.gmra.mrb[2].mxu1 %v8039_v56  ;;  %3772 = vmatpush1.bf16.msra.mxu0 %v5966_v9  ;;  %v8108_v56 = vld [vmem:[#allocation59_spill] sm:$0xff] }
  0x98   :  { %3836 = vmatpush1.bf16.msra.mxu1 %v5969_v13  ;;  %3774 = vmatprep.subr.bf16.mxu0 %v5973_v17 }
  0x99   :  { %3838 = vmatprep.subr.bf16.mxu1 %v5975_v18 }
  0x9b   :  { %3776 = vmatpush1.bf16.msra.mxu0 %v5978_v22 }
  0x9c   :  { %3840 = vmatpush1.bf16.msra.mxu1 %v5982_v26  ;;  %3778 = vmatprep.subr.bf16.mxu0 %v5984_v27 }
  0x9d   :  { %3842 = vmatprep.subr.bf16.mxu1 %v5986_v31 }
  0x9f   :  { %3780 = vmatpush1.bf16.msra.mxu0 %v5989_v35 }
  0xa0   :  { %3844 = vmatpush1.bf16.msra.mxu1 %v5993_v39  ;;  %3782 = vmatprep.subr.bf16.mxu0 %v5995_v40 }
  0xa1   :  { %3846 = vmatprep.subr.bf16.mxu1 %v5998_v44 }
  0xa3   :  { %3784 = vmatpush1.bf16.msra.mxu0 %v6001_v51 }
  0xa4   :  { %3848 = vmatpush1.bf16.msra.mxu1 %v6005_v52  ;;  %3786 = vmatprep.subr.bf16.mxu0 %v6007_v53 }
  0xa5   :  { %3850 = vmatprep.subr.bf16.mxu1 %v6010_v57 }
  0xa7   :  { %3788 = vmatpush1.bf16.msra.mxu0 %v6013_v63 }
  0xa8   :  { %3852 = vmatpush1.bf16.msra.mxu1 %v6017_v1  ;;  %3790 = vmatprep.subr.bf16.mxu0 %v6019_v2 }
  0xa9   :  { %3854 = vmatprep.subr.bf16.mxu1 %v6022_v7 }
  0xab   :  { %3792 = vmatpush1.bf16.msra.mxu0 %v6025_v16 }
  0xac   :  { %3856 = vmatpush1.bf16.msra.mxu1 %v6029_v19  ;;  %3794 = vmatprep.subr.bf16.mxu0 %v6031_v20 }
  0xad   :  { %3858 = vmatprep.subr.bf16.mxu1 %v6034_v25 }
  0xaf   :  { %3796 = vmatpush1.bf16.msra.mxu0 %v6037_v34 }
  0xb0   :  { %3860 = vmatpush1.bf16.msra.mxu1 %v6041_v36  ;;  %3798 = vmatprep.subr.bf16.mxu0 %v6043_v37 }
  0xb1   :  { %3862 = vmatprep.subr.bf16.mxu1 %v6046_v43 }
  0xb3   :  { %3800 = vmatpush1.bf16.msra.mxu0 %v6049_v50 }
  0xb4   :  { %3864 = vmatpush1.bf16.msra.mxu1 %v6053_v54  ;;  %3802 = vmatprep.subr.bf16.mxu0 %v6055_v55 }
  0xb5   :  { %3866 = vmatprep.subr.bf16.mxu1 %v6058_v60 }
  0xb7   :  { %3804 = vmatpush1.bf16.msra.mxu0 %v6061_v10 }
  0xb8   :  { %3868 = vmatpush1.bf16.msra.mxu1 %v6065_v11  ;;  %3806 = vmatprep.subr.bf16.mxu0 %v6067_v12 }
  0xb9   :  { %3870 = vmatprep.subr.bf16.mxu1 %v6070_v23 }
  0xbb   :  { %3808 = vmatpush1.bf16.msra.mxu0 %v6073_v33 }
  0xbc   :  { %3872 = vmatpush1.bf16.msra.mxu1 %v6077_v38  ;;  %3810 = vmatprep.subr.bf16.mxu0 %v6079_v41 }
  0xbd   :  { %3874 = vmatprep.subr.bf16.mxu1 %v6082_v47 }
  0xbf   :  { %3812 = vmatpush1.bf16.msra.mxu0 %v8098_v28  ;;  %v8109_v28 = vld [vmem:[#allocation60_spill] sm:$0xff] }
  0xc0   :  { %3876 = vmatpush1.bf16.msra.mxu1 %v8099_v3  ;;  %3814 = vmatprep.subr.bf16.mxu0 %v8100_v14  ;;  %v8110_v3 = vld [vmem:[#allocation61_spill] sm:$0xff]  ;;  %v8111_v14 = vld [vmem:[#allocation62_spill] sm:$0xff] }
  0xc1   :  { %3878 = vmatprep.subr.bf16.mxu1 %v8101_v32  ;;  %v8112_v32 = vld [vmem:[#allocation63_spill] sm:$0xff] }
  0xc3   :  { %3816 = vmatpush1.bf16.msra.mxu0 %v8102_v29  ;;  %v8113_v29 = vld [vmem:[#allocation64_spill] sm:$0xff] }
  0xc4   :  { %3880 = vmatpush1.bf16.msra.mxu1 %v8103_v30  ;;  %3818 = vmatprep.subr.bf16.mxu0 %v8104_v46  ;;  %v8114_v30 = vld [vmem:[#allocation65_spill] sm:$0xff]  ;;  %v8115_v46 = vld [vmem:[#allocation66_spill] sm:$0xff] }
  0xc5   :  { %3882 = vmatprep.subr.bf16.mxu1 %v8105_v62  ;;  %v8116_v62 = vld [vmem:[#allocation67_spill] sm:$0xff] }
  0xc7   :  { %3820 = vmatpush1.bf16.msra.mxu0 %v8106_v58  ;;  %v8117_v58 = vld [vmem:[#allocation68_spill] sm:$0xff] }
  0xc8   :  { %3884 = vmatpush1.bf16.msra.mxu1 %v8107_v48  ;;  %3822 = vmatprep.subr.bf16.mxu0 %v8108_v56  ;;  %v8118_v48 = vld [vmem:[#allocation69_spill] sm:$0xff]  ;;  %v8119_v56 = vld [vmem:[#allocation70_spill] sm:$0xff] }
  0xc9   :  { %3886 = vmatprep.subr.bf16.mxu1 %v8109_v28  ;;  %v8120_v28 = vld [vmem:[#allocation71_spill] sm:$0xff] }
  0xcb   :  { %3824 = vmatpush1.bf16.msra.mxu0 %v8110_v3  ;;  %v8121_v3 = vld [vmem:[#allocation72_spill] sm:$0xff] }
  0xcc   :  { %3888 = vmatpush1.bf16.msra.mxu1 %v8111_v14  ;;  %3826 = vmatprep.subr.bf16.mxu0 %v8112_v32 }
  0xcd   :  { %3890 = vmatprep.subr.bf16.mxu1 %v8113_v29 }
  0xcf   :  { %3828 = vmatpush1.bf16.msra.mxu0 %v8114_v30 }
  0xd0   :  { %3892 = vmatpush1.bf16.msra.mxu1 %v8115_v46  ;;  %3830 = vmatprep.subr.bf16.mxu0 %v8116_v62  ;;  %v49_v46 = vld [vmem:[%s7692_s0] sm:$0xff] }
  0xd1   :  { %3894 = vmatprep.subr.bf16.mxu1 %v8117_v58  ;;  %v51_v58 = vld [vmem:[%s7692_s0 + $0x10] sm:$0xff] }
  0xd3   :  { %3832 = vmatpush1.bf16.msra.mxu0 %v8118_v48 }
  0xd4   :  { %3896 = vmatpush1.bf16.msra.mxu1 %v8119_v56  ;;  %3898 = vmatprep.subr.bf16.mxu0 %v8120_v28  ;;  %v50_v56 = vld [vmem:[%s7692_s0 + $0x8] sm:$0xff] }
  0xd5   :  { %3962 = vmatprep.subr.bf16.mxu1 %v8121_v3  ;;  %v52_v3 = vld [vmem:[%s7692_s0 + $0x18] sm:$0xff] }
 0x129   :  { %v379_v14 = vpop.f32.mrb[0].mxu0 }
 0x12a   :  { %v450_v32 = vpop.f32.mrb[0].mxu1  ;;  %v381_v47 = vpop.f32.mrb[1].mxu0  ;;  %v597_v48 = vadd.f32 %v379_v14, %v49_v46 }
 0x12b   :  { %v452_v29 = vpop.f32.mrb[1].mxu1  ;;  %v599_v28 = vadd.f32 %v450_v32, %v51_v58  ;;  %v598_v62 = vadd.f32 %v381_v47, %v50_v56  ;;  %v53_v47 = vld [vmem:[%s7692_s0 + $0x20] sm:$0xff] }
 0x12c   :  { %v600_v30 = vadd.f32 %v452_v29, %v52_v3  ;;  %v3320_v41 = vmul.f32 -1.442695, %v597_v48 }
 0x12d   :  { %v3322_v38 = vmul.f32 -1.442695, %v599_v28  ;;  %v3321_v33 = vmul.f32 -1.442695, %v598_v62 }
 0x12e   :  { %v3323_v23 = vmul.f32 -1.442695, %v600_v30  ;;  %5623 = vpow2.f32 %v3320_v41  ;;  %v55_v41 = vld [vmem:[%s7692_s0 + $0x30] sm:$0xff] }
 0x12f   :  { %5625 = vpow2.f32 %v3322_v38 }
 0x130   :  { %5627 = vpow2.f32 %v3321_v33 }
 0x131   :  { %5629 = vpow2.f32 %v3323_v23  ;;  %v54_v23 = vld [vmem:[%s7692_s0 + $0x28] sm:$0xff] }
 0x138   :  { %v5624_v12 = vpop.eup %5623 }
 0x139   :  { %v5626_v11 = vpop.eup %5625  ;;  %v611_v14 = vadd.f32 1.0, %v5624_v12 }
 0x13a   :  { %v5628_v10 = vpop.eup %5627  ;;  %v623_v46 = vadd.f32 1.0, %v5626_v11 }
 0x13b   :  { %v5630_v60 = vpop.eup %5629  ;;  %v612_v55 = vadd.f32 1.0, %v5628_v10  ;;  %5631 = vrcp.f32 %v611_v14  ;;  %v56_v10 = vld [vmem:[%s7692_s0 + $0x38] sm:$0xff] }
 0x13c   :  { %v624_v54 = vadd.f32 1.0, %v5630_v60  ;;  %5633 = vrcp.f32 %v623_v46 }
 0x13d   :  { %5635 = vrcp.f32 %v612_v55 }
 0x13e   :  { %5637 = vrcp.f32 %v624_v54 }
 0x145   :  { %v5632_v30 = vpop.eup %5631 }
 0x146   :  { %v5634_v62 = vpop.eup %5633 }
 0x147   :  { %v5636_v58 = vpop.eup %5635  ;;  %v643_v46 = vmul.f32 0.0, %v5634_v62  ;;  %v8123_v62 = vld [vmem:[#allocation74_spill] sm:$0xff] }
 0x148   :  { %v5638_v48 = vpop.eup %5637 }
 0x169   :  { %v521_v33 = vpop.f32.mrb[2].mxu0 }
 0x16a   :  { %v601_v60 = vadd.f32 %v521_v33, %v53_v47  ;;  %v592_v11 = vpop.f32.mrb[2].mxu1  ;;  %v523_v12 = vpop.f32.mrb[3].mxu0  ;;  %v644_v33 = vmul.f32 0.0, %v5638_v48  ;;  %v8125_v48 = vld [vmem:[#allocation76_spill] sm:$0xff] }
 0x16b   :  { %v603_v38 = vadd.f32 %v592_v11, %v55_v41  ;;  %v602_v56 = vadd.f32 %v523_v12, %v54_v23  ;;  %v594_v28 = vpop.f32.mrb[3].mxu1 }
 0x16c   :  { %5639 = vtanh.f32 %v601_v60  ;;  %v604_v3 = vadd.f32 %v594_v28, %v56_v10 }
 0x16d   :  { %v3324_v32 = vmul.f32 -1.442695, %v603_v38  ;;  %5641 = vtanh.f32 %v602_v56 }
 0x16e   :  { %v3325_v29 = vmul.f32 -1.442695, %v604_v3 }
 0x16f   :  { %5643 = vpow2.f32 %v3324_v32 }
 0x170   :  { %5645 = vpow2.f32 %v3325_v29 }
 0x176   :  { %v5640_v14 = vpop.eup %5639 }
 0x177   :  { %v5642_v55 = vpop.eup %5641  ;;  %v645_v47 = vmul.f32 %v5640_v14, %v5632_v30  ;;  %v8122_v30 = vld [vmem:[#allocation73_spill] sm:$0xff] }
 0x178   :  { %v646_v54 = vmul.f32 %v5642_v55, %v5636_v58  ;;  %v8124_v58 = vld [vmem:[#allocation75_spill] sm:$0xff]  ;;  %v8126_v14 = vld [vmem:[#allocation77_spill] sm:$0xff]  ;;  %v8127_v55 = vld [vmem:[#allocation78_spill] sm:$0xff] }
 0x179   :  { %v5644_v41 = vpop.eup %5643  ;;  %v6442_v23 = vadd.f32 %v645_v47, %v643_v46  ;;  %v8128_v46 = vld [vmem:[#allocation79_spill] sm:$0xff]  ;;  %v8129_v47 = vld [vmem:[#allocation80_spill] sm:$0xff] }
 0x17a   :  { %v5646_v60 = vpop.eup %5645  ;;  %v637_v10 = vadd.f32 1.0, %v5644_v41  ;;  %v6444_v11 = vadd.f32 %v646_v54, %v644_v33  ;;  %v8130_v33 = vld [vmem:[#allocation81_spill] sm:$0xff]  ;;  %v8131_v54 = vld [vmem:[#allocation82_spill] sm:$0xff]  ;;  %v8132_v41 = vld [vmem:[#allocation83_spill] sm:$0xff] }
 0x17b   :  { %5647 = vtanh.f32 %v6442_v23  ;;  %v638_v12 = vadd.f32 1.0, %v5646_v60  ;;  %v8133_v60 = vld [vmem:[#allocation84_spill] sm:$0xff] }
 0x17c   :  { %5649 = vrcp.f32 %v637_v10  ;;  %v8134_v10 = vld [vmem:[#allocation85_spill] sm:$0xff] }
 0x17d   :  { %5651 = vtanh.f32 %v6444_v11 }
 0x17e   :  { %5653 = vrcp.f32 %v638_v12  ;;  %v8135_v12 = vld [vmem:[#allocation86_spill] sm:$0xff] }
 0x185   :  { %v5648_v38 = vpop.eup %5647 }
 0x186   :  { %v5650_v56 = vpop.eup %5649 }
 0x187   :  { %v5652_v28 = vpop.eup %5651  ;;  %v6448_v29 = vmul.f32 %v5650_v56, %v5648_v38  ;;  %v8136_v38 = vld [vmem:[#allocation87_spill] sm:$0xff]  ;;  %v8137_v56 = vld [vmem:[#allocation88_spill] sm:$0xff] }
 0x188   :  { %v5654_v3 = vpop.eup %5653 }
 0x189   :  { %v652_v32 = vmul.f32 %v5654_v3, %v5652_v28  ;;  %v8138_v28 = vld [vmem:[#allocation89_spill] sm:$0xff]  ;;  %v8139_v3 = vld [vmem:[#allocation90_spill] sm:$0xff] }
 0x18b   :  { %726 = vmatprep.mubr.f32.mxu0 %v652_v32  ;;  %797 = vmatprep.mubr.f32.mxu1 %v652_v32 }
 0x18c   :  { %727 = vmatmul.mubr.f32.vlgmr.msra.gmra.mrb[4].mxu0 %v6448_v29  ;;  %798 = vmatmul.mubr.f32.vlgmr.msra.gmra.mrb[4].mxu1 %v6448_v29 }
 0x18d   :  { %3900 = vmatpush1.bf16.msra.mxu0 %v8122_v30  ;;  %3964 = vmatpush1.bf16.msra.mxu1 %v8123_v62 }
 0x18e   :  { %868 = vmatprep.mubr.f32.mxu0 %v652_v32  ;;  %939 = vmatprep.mubr.f32.mxu1 %v652_v32  ;;  %v8140_v32 = vld [vmem:[#allocation91_spill] sm:$0xff] }
 0x18f   :  { %3902 = vmatprep.subr.bf16.mxu0 %v8124_v58  ;;  %3966 = vmatprep.subr.bf16.mxu1 %v8125_v48 }
 0x191   :  { %3904 = vmatpush1.bf16.msra.mxu0 %v8126_v14  ;;  %3968 = vmatpush1.bf16.msra.mxu1 %v8127_v55 }
 0x192   :  { %3906 = vmatprep.subr.bf16.mxu0 %v8128_v46  ;;  %3970 = vmatprep.subr.bf16.mxu1 %v8129_v47 }
 0x195   :  { %3908 = vmatpush1.bf16.msra.mxu0 %v8130_v33  ;;  %3972 = vmatpush1.bf16.msra.mxu1 %v8131_v54  ;;  %v8141_v33 = vld [vmem:[#allocation92_spill] sm:$0xff]  ;;  %v8142_v54 = vld [vmem:[#allocation93_spill] sm:$0xff] }
 0x196   :  { %3910 = vmatprep.subr.bf16.mxu0 %v8132_v41  ;;  %3974 = vmatprep.subr.bf16.mxu1 %v8133_v60  ;;  %v8143_v41 = vld [vmem:[#allocation94_spill] sm:$0xff]  ;;  %v8144_v60 = vld [vmem:[#allocation95_spill] sm:$0xff] }
 0x199   :  { %3912 = vmatpush1.bf16.msra.mxu0 %v8134_v10  ;;  %3976 = vmatpush1.bf16.msra.mxu1 %v8135_v12  ;;  %v8145_v10 = vld [vmem:[#allocation96_spill] sm:$0xff]  ;;  %v8146_v12 = vld [vmem:[#allocation97_spill] sm:$0xff] }
 0x19a   :  { %3914 = vmatprep.subr.bf16.mxu0 %v8136_v38  ;;  %3978 = vmatprep.subr.bf16.mxu1 %v8137_v56  ;;  %v8147_v38 = vld [vmem:[#allocation98_spill] sm:$0xff]  ;;  %v8148_v56 = vld [vmem:[#allocation99_spill] sm:$0xff] }
 0x19d   :  { %3916 = vmatpush1.bf16.msra.mxu0 %v8138_v28  ;;  %3980 = vmatpush1.bf16.msra.mxu1 %v8139_v3  ;;  %v8149_v28 = vld [vmem:[#allocation100_spill] sm:$0xff]  ;;  %v8150_v3 = vld [vmem:[#allocation101_spill] sm:$0xff] }
 0x19e   :  { %3918 = vmatprep.subr.bf16.mxu0 %v8140_v32  ;;  %3982 = vmatprep.subr.bf16.mxu1 %v8141_v33  ;;  %v8151_v32 = vld [vmem:[#allocation102_spill] sm:$0xff]  ;;  %v8152_v33 = vld [vmem:[#allocation103_spill] sm:$0xff] }
 0x1a1   :  { %3920 = vmatpush1.bf16.msra.mxu0 %v8142_v54  ;;  %3984 = vmatpush1.bf16.msra.mxu1 %v8143_v41  ;;  %v8153_v54 = vld [vmem:[#allocation104_spill] sm:$0xff]  ;;  %v8154_v41 = vld [vmem:[#allocation105_spill] sm:$0xff] }
 0x1a2   :  { %3922 = vmatprep.subr.bf16.mxu0 %v8144_v60  ;;  %3986 = vmatprep.subr.bf16.mxu1 %v8145_v10  ;;  %v8155_v60 = vld [vmem:[#allocation106_spill] sm:$0xff]  ;;  %v8156_v10 = vld [vmem:[#allocation107_spill] sm:$0xff] }
 0x1a5   :  { %3924 = vmatpush1.bf16.msra.mxu0 %v8146_v12  ;;  %3988 = vmatpush1.bf16.msra.mxu1 %v8147_v38  ;;  %v8157_v12 = vld [vmem:[#allocation108_spill] sm:$0xff]  ;;  %v8158_v38 = vld [vmem:[#allocation109_spill] sm:$0xff] }
 0x1a6   :  { %3926 = vmatprep.subr.bf16.mxu0 %v8148_v56  ;;  %3990 = vmatprep.subr.bf16.mxu1 %v8149_v28  ;;  %v8159_v56 = vld [vmem:[#allocation110_spill] sm:$0xff]  ;;  %v8160_v28 = vld [vmem:[#allocation111_spill] sm:$0xff] }
 0x1a9   :  { %3928 = vmatpush1.bf16.msra.mxu0 %v8150_v3  ;;  %3992 = vmatpush1.bf16.msra.mxu1 %v8151_v32  ;;  %v8161_v3 = vld [vmem:[#allocation112_spill] sm:$0xff]  ;;  %v8162_v32 = vld [vmem:[#allocation113_spill] sm:$0xff] }
 0x1aa   :  { %3930 = vmatprep.subr.bf16.mxu0 %v8152_v33  ;;  %3994 = vmatprep.subr.bf16.mxu1 %v8153_v54  ;;  %v8163_v33 = vld [vmem:[#allocation114_spill] sm:$0xff]  ;;  %v8164_v54 = vld [vmem:[#allocation115_spill] sm:$0xff] }
 0x1ad   :  { %3932 = vmatpush1.bf16.msra.mxu0 %v8154_v41  ;;  %3996 = vmatpush1.bf16.msra.mxu1 %v8155_v60  ;;  %v8165_v41 = vld [vmem:[#allocation116_spill] sm:$0xff]  ;;  %v8166_v60 = vld [vmem:[#allocation117_spill] sm:$0xff] }
 0x1ae   :  { %3934 = vmatprep.subr.bf16.mxu0 %v8156_v10  ;;  %3998 = vmatprep.subr.bf16.mxu1 %v8157_v12  ;;  %v8167_v10 = vld [vmem:[#allocation118_spill] sm:$0xff]  ;;  %v8168_v12 = vld [vmem:[#allocation119_spill] sm:$0xff] }
 0x1b1   :  { %3936 = vmatpush1.bf16.msra.mxu0 %v8158_v38  ;;  %4000 = vmatpush1.bf16.msra.mxu1 %v8159_v56  ;;  %v8169_v38 = vld [vmem:[#allocation120_spill] sm:$0xff]  ;;  %v8170_v56 = vld [vmem:[#allocation121_spill] sm:$0xff] }
 0x1b2   :  { %3938 = vmatprep.subr.bf16.mxu0 %v8160_v28  ;;  %4002 = vmatprep.subr.bf16.mxu1 %v8161_v3  ;;  %v8171_v28 = vld [vmem:[#allocation122_spill] sm:$0xff] }
 0x1b5   :  { %3940 = vmatpush1.bf16.msra.mxu0 %v8162_v32  ;;  %4004 = vmatpush1.bf16.msra.mxu1 %v8163_v33  ;;  %v8172_v32 = vld [vmem:[#allocation124_spill] sm:$0xff] }
 0x1b6   :  { %3942 = vmatprep.subr.bf16.mxu0 %v8164_v54  ;;  %4006 = vmatprep.subr.bf16.mxu1 %v8165_v41 }
 0x1b9   :  { %3944 = vmatpush1.bf16.msra.mxu0 %v8166_v60  ;;  %4008 = vmatpush1.bf16.msra.mxu1 %v8167_v10 }
 0x1ba   :  { %3946 = vmatprep.subr.bf16.mxu0 %v8168_v12  ;;  %4010 = vmatprep.subr.bf16.mxu1 %v8169_v38 }
 0x1bd   :  { %3948 = vmatpush1.bf16.msra.mxu0 %v8170_v56  ;;  %4012 = vmatpush1.bf16.msra.mxu1 %v8171_v28 }
 0x1be   :  { %3950 = vmatprep.subr.bf16.mxu0 %v6311_v21  ;;  %4014 = vmatprep.subr.bf16.mxu1 %v8172_v32 }
 0x1c1   :  { %3952 = vmatpush1.bf16.msra.mxu0 %v6317_v59  ;;  %4016 = vmatpush1.bf16.msra.mxu1 %v6321_v61 }
 0x1c2   :  { %3954 = vmatprep.subr.bf16.mxu0 %v6323_v6  ;;  %4018 = vmatprep.subr.bf16.mxu1 %v6326_v0 }
 0x1c5   :  { %3956 = vmatpush1.bf16.msra.mxu0 %v6329_v15  ;;  %4020 = vmatpush1.bf16.msra.mxu1 %v6333_v42 }
 0x1c6   :  { %3958 = vmatprep.subr.bf16.mxu0 %v6335_v49  ;;  %4022 = vmatprep.subr.bf16.mxu1 %v6338_v5 }
 0x1c9   :  { %3960 = vmatpush1.bf16.msra.mxu0 %v6341_v24  ;;  %4024 = vmatpush1.bf16.msra.mxu1 %v6345_v45 }
 0x1ca   :  { %4026 = vmatprep.subr.bf16.mxu0 %v5962_v4  ;;  %4090 = vmatprep.subr.bf16.mxu1 %v5964_v8 }
 0x1cc   :  { %869 = vmatmul.mubr.f32.vlgmr.msra.gmra.mrb[6].mxu0 %v6448_v29  ;;  %940 = vmatmul.mubr.f32.vlgmr.msra.gmra.mrb[6].mxu1 %v6448_v29  ;;  %v8173_v29 = vld [vmem:[#allocation38_spill] sm:$0xff] }
 0x1cd   :  { %4028 = vmatpush1.bf16.msra.mxu0 %v5966_v9  ;;  %4092 = vmatpush1.bf16.msra.mxu1 %v5969_v13 }
 0x1ce   :  { %4030 = vmatprep.subr.bf16.mxu0 %v5973_v17  ;;  %4094 = vmatprep.subr.bf16.mxu1 %v5975_v18 }
 0x1d1   :  { %4032 = vmatpush1.bf16.msra.mxu0 %v5978_v22  ;;  %4096 = vmatpush1.bf16.msra.mxu1 %v5982_v26 }
 0x1d2   :  { %4034 = vmatprep.subr.bf16.mxu0 %v5984_v27  ;;  %4098 = vmatprep.subr.bf16.mxu1 %v5986_v31 }
 0x1d5   :  { %4036 = vmatpush1.bf16.msra.mxu0 %v5989_v35  ;;  %4100 = vmatpush1.bf16.msra.mxu1 %v5993_v39 }
 0x1d6   :  { %4038 = vmatprep.subr.bf16.mxu0 %v5995_v40  ;;  %4102 = vmatprep.subr.bf16.mxu1 %v5998_v44 }
 0x1d9   :  { %4040 = vmatpush1.bf16.msra.mxu0 %v6001_v51  ;;  %4104 = vmatpush1.bf16.msra.mxu1 %v6005_v52 }
 0x1da   :  { %4042 = vmatprep.subr.bf16.mxu0 %v6007_v53  ;;  %4106 = vmatprep.subr.bf16.mxu1 %v6010_v57 }
 0x1dd   :  { %4044 = vmatpush1.bf16.msra.mxu0 %v6013_v63  ;;  %4108 = vmatpush1.bf16.msra.mxu1 %v6017_v1 }
 0x1de   :  { %4046 = vmatprep.subr.bf16.mxu0 %v6019_v2  ;;  %4110 = vmatprep.subr.bf16.mxu1 %v6022_v7  ;;  %v8174_v7 = vld [vmem:[#allocation39_spill] sm:$0xff] }
 0x1e1   :  { %4048 = vmatpush1.bf16.msra.mxu0 %v6025_v16  ;;  %4112 = vmatpush1.bf16.msra.mxu1 %v6029_v19  ;;  %v8175_v16 = vld [vmem:[#allocation40_spill] sm:$0xff]  ;;  %v8176_v19 = vld [vmem:[#allocation41_spill] sm:$0xff] }
 0x1e2   :  { %4050 = vmatprep.subr.bf16.mxu0 %v6031_v20  ;;  %4114 = vmatprep.subr.bf16.mxu1 %v6034_v25  ;;  %v8177_v20 = vld [vmem:[#allocation42_spill] sm:$0xff]  ;;  %v8178_v25 = vld [vmem:[#allocation43_spill] sm:$0xff] }
 0x1e5   :  { %4052 = vmatpush1.bf16.msra.mxu0 %v6037_v34  ;;  %4116 = vmatpush1.bf16.msra.mxu1 %v6041_v36  ;;  %v8179_v34 = vld [vmem:[#allocation44_spill] sm:$0xff]  ;;  %v8180_v36 = vld [vmem:[#allocation45_spill] sm:$0xff] }
 0x1e6   :  { %4054 = vmatprep.subr.bf16.mxu0 %v6043_v37  ;;  %4118 = vmatprep.subr.bf16.mxu1 %v6046_v43  ;;  %v8181_v37 = vld [vmem:[#allocation46_spill] sm:$0xff]  ;;  %v8182_v43 = vld [vmem:[#allocation47_spill] sm:$0xff] }
 0x1e9   :  { %4056 = vmatpush1.bf16.msra.mxu0 %v6049_v50  ;;  %4120 = vmatpush1.bf16.msra.mxu1 %v8173_v29  ;;  %v8183_v50 = vld [vmem:[#allocation48_spill] sm:$0xff]  ;;  %v8184_v29 = vld [vmem:[#allocation49_spill] sm:$0xff] }
 0x1ea   :  { %4058 = vmatprep.subr.bf16.mxu0 %v8174_v7  ;;  %4122 = vmatprep.subr.bf16.mxu1 %v8175_v16  ;;  %v8185_v7 = vld [vmem:[#allocation50_spill] sm:$0xff]  ;;  %v8186_v16 = vld [vmem:[#allocation51_spill] sm:$0xff] }
 0x1ed   :  { %4060 = vmatpush1.bf16.msra.mxu0 %v8176_v19  ;;  %4124 = vmatpush1.bf16.msra.mxu1 %v8177_v20  ;;  %v8187_v19 = vld [vmem:[#allocation52_spill] sm:$0xff]  ;;  %v8188_v20 = vld [vmem:[#allocation53_spill] sm:$0xff] }
 0x1ee   :  { %4062 = vmatprep.subr.bf16.mxu0 %v8178_v25  ;;  %4126 = vmatprep.subr.bf16.mxu1 %v8179_v34  ;;  %v8189_v25 = vld [vmem:[#allocation54_spill] sm:$0xff]  ;;  %v8190_v34 = vld [vmem:[#allocation55_spill] sm:$0xff] }
 0x1f1   :  { %4064 = vmatpush1.bf16.msra.mxu0 %v8180_v36  ;;  %4128 = vmatpush1.bf16.msra.mxu1 %v8181_v37  ;;  %v8191_v36 = vld [vmem:[#allocation56_spill] sm:$0xff]  ;;  %v8192_v37 = vld [vmem:[#allocation57_spill] sm:$0xff] }
 0x1f2   :  { %4066 = vmatprep.subr.bf16.mxu0 %v8182_v43  ;;  %4130 = vmatprep.subr.bf16.mxu1 %v8183_v50  ;;  %v8193_v43 = vld [vmem:[#allocation58_spill] sm:$0xff]  ;;  %v8194_v50 = vld [vmem:[#allocation59_spill] sm:$0xff] }
 0x1f5   :  { %4068 = vmatpush1.bf16.msra.mxu0 %v8184_v29  ;;  %4132 = vmatpush1.bf16.msra.mxu1 %v8185_v7  ;;  %v8195_v29 = vld [vmem:[#allocation60_spill] sm:$0xff]  ;;  %v8196_v7 = vld [vmem:[#allocation61_spill] sm:$0xff] }
 0x1f6   :  { %4070 = vmatprep.subr.bf16.mxu0 %v8186_v16  ;;  %4134 = vmatprep.subr.bf16.mxu1 %v8187_v19  ;;  %v8197_v16 = vld [vmem:[#allocation62_spill] sm:$0xff]  ;;  %v8198_v19 = vld [vmem:[#allocation63_spill] sm:$0xff] }
 0x1f9   :  { %4072 = vmatpush1.bf16.msra.mxu0 %v8188_v20  ;;  %4136 = vmatpush1.bf16.msra.mxu1 %v8189_v25  ;;  %v8199_v20 = vld [vmem:[#allocation64_spill] sm:$0xff]  ;;  %v8200_v25 = vld [vmem:[#allocation65_spill] sm:$0xff] }
 0x1fa   :  { %4074 = vmatprep.subr.bf16.mxu0 %v8190_v34  ;;  %4138 = vmatprep.subr.bf16.mxu1 %v8191_v36  ;;  %v8201_v34 = vld [vmem:[#allocation66_spill] sm:$0xff]  ;;  %v8202_v36 = vld [vmem:[#allocation67_spill] sm:$0xff] }
 0x1fd   :  { %4076 = vmatpush1.bf16.msra.mxu0 %v8192_v37  ;;  %4140 = vmatpush1.bf16.msra.mxu1 %v8193_v43  ;;  %v8203_v37 = vld [vmem:[#allocation68_spill] sm:$0xff]  ;;  %v8204_v43 = vld [vmem:[#allocation69_spill] sm:$0xff] }
 0x1fe   :  { %4078 = vmatprep.subr.bf16.mxu0 %v8194_v50  ;;  %4142 = vmatprep.subr.bf16.mxu1 %v8195_v29  ;;  %v8205_v50 = vld [vmem:[#allocation70_spill] sm:$0xff]  ;;  %v8206_v29 = vld [vmem:[#allocation71_spill] sm:$0xff] }
 0x201   :  { %4080 = vmatpush1.bf16.msra.mxu0 %v8196_v7  ;;  %4144 = vmatpush1.bf16.msra.mxu1 %v8197_v16  ;;  %v8207_v7 = vld [vmem:[#allocation72_spill] sm:$0xff] }
 0x202   :  { %4082 = vmatprep.subr.bf16.mxu0 %v8198_v19  ;;  %4146 = vmatprep.subr.bf16.mxu1 %v8199_v20 }
 0x205   :  { %4084 = vmatpush1.bf16.msra.mxu0 %v8200_v25  ;;  %4148 = vmatpush1.bf16.msra.mxu1 %v8201_v34  ;;  %v3326_v34 = vld [vmem:[%s7692_s0 + $0x40] sm:$0xff] }
 0x206   :  { %4086 = vmatprep.subr.bf16.mxu0 %v8202_v36  ;;  %4150 = vmatprep.subr.bf16.mxu1 %v8203_v37  ;;  %v3328_v37 = vld [vmem:[%s7692_s0 + $0x50] sm:$0xff] }
 0x209   :  { %4088 = vmatpush1.bf16.msra.mxu0 %v8204_v43  ;;  %4152 = vmatpush1.bf16.msra.mxu1 %v8205_v50  ;;  %v3327_v50 = vld [vmem:[%s7692_s0 + $0x48] sm:$0xff] }
 0x20a   :  { %4154 = vmatprep.subr.bf16.mxu0 %v8206_v29  ;;  %4218 = vmatprep.subr.bf16.mxu1 %v8207_v7  ;;  %v3329_v7 = vld [vmem:[%s7692_s0 + $0x58] sm:$0xff] }
 0x25f   :  { %v728_v16 = vpop.f32.mrb[4].mxu0  ;;  %v799_v19 = vpop.f32.mrb[4].mxu1 }
 0x260   :  { %v730_v2 = vpop.f32.mrb[5].mxu0  ;;  %v801_v20 = vpop.f32.mrb[5].mxu1  ;;  %v946_v43 = vadd.f32 %v3326_v34, %v728_v16  ;;  %v948_v29 = vadd.f32 %v3328_v37, %v799_v19 }
 0x261   :  { %v947_v36 = vadd.f32 %v3327_v50, %v730_v2  ;;  %v949_v25 = vadd.f32 %v3329_v7, %v801_v20  ;;  %v3330_v2 = vld [vmem:[%s7692_s0 + $0x60] sm:$0xff]  ;;  %v3332_v7 = vld [vmem:[%s7692_s0 + $0x70] sm:$0xff] }
 0x262   :  { %v3334_v1 = vmul.f32 -1.442695, %v946_v43  ;;  %v3336_v63 = vmul.f32 -1.442695, %v948_v29 }
 0x263   :  { %v3335_v57 = vmul.f32 -1.442695, %v947_v36  ;;  %v3337_v53 = vmul.f32 -1.442695, %v949_v25 }
 0x264   :  { %5655 = vpow2.f32 %v3334_v1 }
 0x265   :  { %5657 = vpow2.f32 %v3336_v63 }
 0x266   :  { %5659 = vpow2.f32 %v3335_v57 }
 0x267   :  { %5661 = vpow2.f32 %v3337_v53  ;;  %v3331_v53 = vld [vmem:[%s7692_s0 + $0x68] sm:$0xff] }
 0x26e   :  { %v5656_v52 = vpop.eup %5655 }
 0x26f   :  { %v5658_v51 = vpop.eup %5657  ;;  %v960_v16 = vadd.f32 1.0, %v5656_v52  ;;  %v3333_v52 = vld [vmem:[%s7692_s0 + $0x78] sm:$0xff] }
 0x270   :  { %v5660_v44 = vpop.eup %5659  ;;  %v972_v34 = vadd.f32 1.0, %v5658_v51 }
 0x271   :  { %v5662_v40 = vpop.eup %5661  ;;  %v961_v39 = vadd.f32 1.0, %v5660_v44  ;;  %5663 = vrcp.f32 %v960_v16 }
 0x272   :  { %v973_v35 = vadd.f32 1.0, %v5662_v40  ;;  %5665 = vrcp.f32 %v972_v34 }
 0x273   :  { %5667 = vrcp.f32 %v961_v39 }
 0x274   :  { %5669 = vrcp.f32 %v973_v35 }
 0x27b   :  { %v5664_v37 = vpop.eup %5663 }
 0x27c   :  { %v5666_v43 = vpop.eup %5665 }
 0x27d   :  { %v5668_v50 = vpop.eup %5667  ;;  %v992_v39 = vmul.f32 %v5666_v43, %v6442_v23  ;;  %v8211_v43 = vld [vmem:[#allocation84_spill] sm:$0xff] }
 0x27e   :  { %v5670_v29 = vpop.eup %5669 }
 0x27f   :  { %v993_v35 = vmul.f32 %v5670_v29, %v6444_v11  ;;  %v8213_v29 = vld [vmem:[#allocation86_spill] sm:$0xff] }
 0x29f   :  { %v870_v44 = vpop.f32.mrb[6].mxu0  ;;  %v941_v40 = vpop.f32.mrb[6].mxu1 }
 0x2a0   :  { %v950_v51 = vadd.f32 %v3330_v2, %v870_v44  ;;  %v952_v57 = vadd.f32 %v3332_v7, %v941_v40  ;;  %v872_v63 = vpop.f32.mrb[7].mxu0  ;;  %v943_v1 = vpop.f32.mrb[7].mxu1 }
 0x2a1   :  { %v951_v19 = vadd.f32 %v3331_v53, %v872_v63  ;;  %v953_v20 = vadd.f32 %v3333_v52, %v943_v1 }
 0x2a2   :  { %5671 = vtanh.f32 %v950_v51  ;;  %v3338_v25 = vmul.f32 -1.442695, %v952_v57 }
 0x2a3   :  { %5673 = vtanh.f32 %v951_v19  ;;  %v3339_v36 = vmul.f32 -1.442695, %v953_v20 }
 0x2a4   :  { %5675 = vpow2.f32 %v3338_v25  ;;  %v8208_v25 = vld [vmem:[#allocation81_spill] sm:$0xff] }
 0x2a5   :  { %5677 = vpow2.f32 %v3339_v36  ;;  %v8209_v36 = vld [vmem:[#allocation82_spill] sm:$0xff] }
 0x2ac   :  { %v5672_v16 = vpop.eup %5671 }
 0x2ad   :  { %v5674_v34 = vpop.eup %5673  ;;  %v994_v2 = vmul.f32 %v5672_v16, %v5664_v37  ;;  %v8210_v37 = vld [vmem:[#allocation83_spill] sm:$0xff] }
 0x2ae   :  { %v5676_v7 = vpop.eup %5675  ;;  %v995_v53 = vmul.f32 %v5674_v34, %v5668_v50  ;;  %v8212_v50 = vld [vmem:[#allocation85_spill] sm:$0xff]  ;;  %v8214_v16 = vld [vmem:[#allocation87_spill] sm:$0xff]  ;;  %v8215_v34 = vld [vmem:[#allocation88_spill] sm:$0xff] }
 0x2af   :  { %v5678_v52 = vpop.eup %5677  ;;  %v6608_v44 = vadd.f32 %v994_v2, %v992_v39  ;;  %v986_v40 = vadd.f32 1.0, %v5676_v7  ;;  %v8216_v39 = vld [vmem:[#allocation89_spill] sm:$0xff]  ;;  %v8217_v2 = vld [vmem:[#allocation90_spill] sm:$0xff]  ;;  %v8218_v7 = vld [vmem:[#allocation91_spill] sm:$0xff] }
 0x2b0   :  { %v6610_v51 = vadd.f32 %v995_v53, %v993_v35  ;;  %v987_v57 = vadd.f32 1.0, %v5678_v52  ;;  %v8219_v35 = vld [vmem:[#allocation92_spill] sm:$0xff]  ;;  %v8220_v53 = vld [vmem:[#allocation93_spill] sm:$0xff]  ;;  %v8221_v52 = vld [vmem:[#allocation94_spill] sm:$0xff] }
 0x2b1   :  { %5679 = vtanh.f32 %v6608_v44 }
 0x2b2   :  { %5681 = vrcp.f32 %v986_v40  ;;  %v8222_v40 = vld [vmem:[#allocation95_spill] sm:$0xff] }
 0x2b3   :  { %5683 = vtanh.f32 %v6610_v51 }
 0x2b4   :  { %5685 = vrcp.f32 %v987_v57  ;;  %v8223_v57 = vld [vmem:[#allocation96_spill] sm:$0xff] }
 0x2bb   :  { %v5680_v63 = vpop.eup %5679 }
 0x2bc   :  { %v5682_v23 = vpop.eup %5681 }
 0x2bd   :  { %v5684_v1 = vpop.eup %5683  ;;  %v6614_v11 = vmul.f32 %v5682_v23, %v5680_v63  ;;  %v8224_v63 = vld [vmem:[#allocation97_spill] sm:$0xff]  ;;  %v8225_v23 = vld [vmem:[#allocation98_spill] sm:$0xff] }
 0x2be   :  { %v5686_v19 = vpop.eup %5685 }
 0x2bf   :  { %v1001_v20 = vmul.f32 %v5686_v19, %v5684_v1  ;;  %v8226_v1 = vld [vmem:[#allocation99_spill] sm:$0xff]  ;;  %v8227_v19 = vld [vmem:[#allocation100_spill] sm:$0xff] }
 0x2c1   :  { %1075 = vmatprep.mubr.f32.mxu0 %v1001_v20  ;;  %1146 = vmatprep.mubr.f32.mxu1 %v1001_v20 }
 0x2c2   :  { %1076 = vmatmul.mubr.f32.vlgmr.msra.gmra.mrb[8].mxu0 %v6614_v11  ;;  %1147 = vmatmul.mubr.f32.vlgmr.msra.gmra.mrb[8].mxu1 %v6614_v11 }
 0x2c3   :  { %4156 = vmatpush1.bf16.msra.mxu0 %v8122_v30  ;;  %4220 = vmatpush1.bf16.msra.mxu1 %v8123_v62 }
 0x2c4   :  { %1217 = vmatprep.mubr.f32.mxu0 %v1001_v20  ;;  %1288 = vmatprep.mubr.f32.mxu1 %v1001_v20  ;;  %v8228_v20 = vld [vmem:[#allocation101_spill] sm:$0xff] }
 0x2c5   :  { %4158 = vmatprep.subr.bf16.mxu0 %v8124_v58  ;;  %4222 = vmatprep.subr.bf16.mxu1 %v8125_v48 }
 0x2c7   :  { %4160 = vmatpush1.bf16.msra.mxu0 %v8126_v14  ;;  %4224 = vmatpush1.bf16.msra.mxu1 %v8127_v55 }
 0x2c8   :  { %4162 = vmatprep.subr.bf16.mxu0 %v8128_v46  ;;  %4226 = vmatprep.subr.bf16.mxu1 %v8129_v47 }
 0x2cb   :  { %4164 = vmatpush1.bf16.msra.mxu0 %v8208_v25  ;;  %4228 = vmatpush1.bf16.msra.mxu1 %v8209_v36 }
 0x2cc   :  { %4166 = vmatprep.subr.bf16.mxu0 %v8210_v37  ;;  %4230 = vmatprep.subr.bf16.mxu1 %v8211_v43 }
 0x2cf   :  { %4168 = vmatpush1.bf16.msra.mxu0 %v8212_v50  ;;  %4232 = vmatpush1.bf16.msra.mxu1 %v8213_v29 }
 0x2d0   :  { %4170 = vmatprep.subr.bf16.mxu0 %v8214_v16  ;;  %4234 = vmatprep.subr.bf16.mxu1 %v8215_v34 }
 0x2d3   :  { %4172 = vmatpush1.bf16.msra.mxu0 %v8216_v39  ;;  %4236 = vmatpush1.bf16.msra.mxu1 %v8217_v2 }
 0x2d4   :  { %4174 = vmatprep.subr.bf16.mxu0 %v8218_v7  ;;  %4238 = vmatprep.subr.bf16.mxu1 %v8219_v35  ;;  %v8229_v7 = vld [vmem:[#allocation102_spill] sm:$0xff]  ;;  %v8230_v35 = vld [vmem:[#allocation103_spill] sm:$0xff] }
 0x2d7   :  { %4176 = vmatpush1.bf16.msra.mxu0 %v8220_v53  ;;  %4240 = vmatpush1.bf16.msra.mxu1 %v8221_v52  ;;  %v8231_v53 = vld [vmem:[#allocation104_spill] sm:$0xff]  ;;  %v8232_v52 = vld [vmem:[#allocation105_spill] sm:$0xff] }
 0x2d8   :  { %4178 = vmatprep.subr.bf16.mxu0 %v8222_v40  ;;  %4242 = vmatprep.subr.bf16.mxu1 %v8223_v57  ;;  %v8233_v40 = vld [vmem:[#allocation106_spill] sm:$0xff]  ;;  %v8234_v57 = vld [vmem:[#allocation107_spill] sm:$0xff] }
 0x2db   :  { %4180 = vmatpush1.bf16.msra.mxu0 %v8224_v63  ;;  %4244 = vmatpush1.bf16.msra.mxu1 %v8225_v23  ;;  %v8235_v63 = vld [vmem:[#allocation108_spill] sm:$0xff]  ;;  %v8236_v23 = vld [vmem:[#allocation109_spill] sm:$0xff] }
 0x2dc   :  { %4182 = vmatprep.subr.bf16.mxu0 %v8226_v1  ;;  %4246 = vmatprep.subr.bf16.mxu1 %v8227_v19  ;;  %v8237_v1 = vld [vmem:[#allocation110_spill] sm:$0xff]  ;;  %v8238_v19 = vld [vmem:[#allocation111_spill] sm:$0xff] }
 0x2df   :  { %4184 = vmatpush1.bf16.msra.mxu0 %v8228_v20  ;;  %4248 = vmatpush1.bf16.msra.mxu1 %v8229_v7  ;;  %v8239_v7 = vld [vmem:[#allocation113_spill] sm:$0xff] }
 0x2e0   :  { %4186 = vmatprep.subr.bf16.mxu0 %v8230_v35  ;;  %4250 = vmatprep.subr.bf16.mxu1 %v8231_v53 }
 0x2e3   :  { %4188 = vmatpush1.bf16.msra.mxu0 %v8232_v52  ;;  %4252 = vmatpush1.bf16.msra.mxu1 %v8233_v40 }
 0x2e4   :  { %4190 = vmatprep.subr.bf16.mxu0 %v8234_v57  ;;  %4254 = vmatprep.subr.bf16.mxu1 %v8235_v63 }
 0x2e7   :  { %4192 = vmatpush1.bf16.msra.mxu0 %v8236_v23  ;;  %4256 = vmatpush1.bf16.msra.mxu1 %v8237_v1 }
 0x2e8   :  { %4194 = vmatprep.subr.bf16.mxu0 %v8238_v19  ;;  %4258 = vmatprep.subr.bf16.mxu1 %v8161_v3 }
 0x2eb   :  { %4196 = vmatpush1.bf16.msra.mxu0 %v8239_v7  ;;  %4260 = vmatpush1.bf16.msra.mxu1 %v8163_v33 }
 0x2ec   :  { %4198 = vmatprep.subr.bf16.mxu0 %v8164_v54  ;;  %4262 = vmatprep.subr.bf16.mxu1 %v8165_v41 }
 0x2ef   :  { %4200 = vmatpush1.bf16.msra.mxu0 %v8166_v60  ;;  %4264 = vmatpush1.bf16.msra.mxu1 %v8167_v10 }
 0x2f0   :  { %4202 = vmatprep.subr.bf16.mxu0 %v8168_v12  ;;  %4266 = vmatprep.subr.bf16.mxu1 %v8169_v38 }
 0x2f3   :  { %4204 = vmatpush1.bf16.msra.mxu0 %v8170_v56  ;;  %4268 = vmatpush1.bf16.msra.mxu1 %v8171_v28 }
 0x2f4   :  { %4206 = vmatprep.subr.bf16.mxu0 %v6311_v21  ;;  %4270 = vmatprep.subr.bf16.mxu1 %v8172_v32 }
 0x2f7   :  { %4208 = vmatpush1.bf16.msra.mxu0 %v6317_v59  ;;  %4272 = vmatpush1.bf16.msra.mxu1 %v6321_v61 }
 0x2f8   :  { %4210 = vmatprep.subr.bf16.mxu0 %v6323_v6  ;;  %4274 = vmatprep.subr.bf16.mxu1 %v6326_v0 }
 0x2fb   :  { %4212 = vmatpush1.bf16.msra.mxu0 %v6329_v15  ;;  %4276 = vmatpush1.bf16.msra.mxu1 %v6333_v42 }
 0x2fc   :  { %4214 = vmatprep.subr.bf16.mxu0 %v6335_v49  ;;  %4278 = vmatprep.subr.bf16.mxu1 %v6338_v5 }
 0x2ff   :  { %4216 = vmatpush1.bf16.msra.mxu0 %v6341_v24  ;;  %4280 = vmatpush1.bf16.msra.mxu1 %v6345_v45 }
 0x300   :  { %4282 = vmatprep.subr.bf16.mxu0 %v5962_v4  ;;  %4346 = vmatprep.subr.bf16.mxu1 %v5964_v8  ;;  %v8240_v8 = vld [vmem:[#allocation17_spill] sm:$0xff]  ;;  %v8241_v4 = vld [vmem:[#allocation18_spill] sm:$0xff] }
 0x302   :  { %1218 = vmatmul.mubr.f32.vlgmr.msra.gmra.mrb[10].mxu0 %v6614_v11  ;;  %1289 = vmatmul.mubr.f32.vlgmr.msra.gmra.mrb[10].mxu1 %v6614_v11  ;;  %v8242_v11 = vld [vmem:[#allocation19_spill] sm:$0xff] }
 0x303   :  { %4284 = vmatpush1.bf16.msra.mxu0 %v5966_v9  ;;  %4348 = vmatpush1.bf16.msra.mxu1 %v5969_v13  ;;  %v8243_v9 = vld [vmem:[#allocation20_spill] sm:$0xff]  ;;  %v8244_v13 = vld [vmem:[#allocation21_spill] sm:$0xff] }
 0x304   :  { %4286 = vmatprep.subr.bf16.mxu0 %v5973_v17  ;;  %4350 = vmatprep.subr.bf16.mxu1 %v5975_v18  ;;  %v8245_v17 = vld [vmem:[#allocation22_spill] sm:$0xff]  ;;  %v8246_v18 = vld [vmem:[#allocation23_spill] sm:$0xff] }
 0x307   :  { %4288 = vmatpush1.bf16.msra.mxu0 %v5978_v22  ;;  %4352 = vmatpush1.bf16.msra.mxu1 %v5982_v26  ;;  %v8247_v22 = vld [vmem:[#allocation24_spill] sm:$0xff]  ;;  %v8248_v26 = vld [vmem:[#allocation25_spill] sm:$0xff] }
 0x308   :  { %4290 = vmatprep.subr.bf16.mxu0 %v5984_v27  ;;  %4354 = vmatprep.subr.bf16.mxu1 %v5986_v31  ;;  %v8249_v27 = vld [vmem:[#allocation26_spill] sm:$0xff]  ;;  %v8250_v31 = vld [vmem:[#allocation27_spill] sm:$0xff] }
 0x30b   :  { %4292 = vmatpush1.bf16.msra.mxu0 %v8240_v8  ;;  %4356 = vmatpush1.bf16.msra.mxu1 %v8241_v4  ;;  %v8251_v8 = vld [vmem:[#allocation28_spill] sm:$0xff]  ;;  %v8252_v4 = vld [vmem:[#allocation29_spill] sm:$0xff] }
 0x30c   :  { %4294 = vmatprep.subr.bf16.mxu0 %v8242_v11  ;;  %4358 = vmatprep.subr.bf16.mxu1 %v8243_v9  ;;  %v8253_v11 = vld [vmem:[#allocation30_spill] sm:$0xff]  ;;  %v8254_v9 = vld [vmem:[#allocation31_spill] sm:$0xff] }
 0x30f   :  { %4296 = vmatpush1.bf16.msra.mxu0 %v8244_v13  ;;  %4360 = vmatpush1.bf16.msra.mxu1 %v8245_v17  ;;  %v8255_v13 = vld [vmem:[#allocation32_spill] sm:$0xff]  ;;  %v8256_v17 = vld [vmem:[#allocation33_spill] sm:$0xff] }
 0x310   :  { %4298 = vmatprep.subr.bf16.mxu0 %v8246_v18  ;;  %4362 = vmatprep.subr.bf16.mxu1 %v8247_v22  ;;  %v8257_v18 = vld [vmem:[#allocation34_spill] sm:$0xff]  ;;  %v8258_v22 = vld [vmem:[#allocation35_spill] sm:$0xff] }
 0x313   :  { %4300 = vmatpush1.bf16.msra.mxu0 %v8248_v26  ;;  %4364 = vmatpush1.bf16.msra.mxu1 %v8249_v27  ;;  %v8259_v26 = vld [vmem:[#allocation36_spill] sm:$0xff]  ;;  %v8260_v27 = vld [vmem:[#allocation37_spill] sm:$0xff] }
 0x314   :  { %4302 = vmatprep.subr.bf16.mxu0 %v8250_v31  ;;  %4366 = vmatprep.subr.bf16.mxu1 %v8251_v8  ;;  %v8261_v31 = vld [vmem:[#allocation38_spill] sm:$0xff]  ;;  %v8262_v8 = vld [vmem:[#allocation39_spill] sm:$0xff] }
 0x317   :  { %4304 = vmatpush1.bf16.msra.mxu0 %v8252_v4  ;;  %4368 = vmatpush1.bf16.msra.mxu1 %v8253_v11  ;;  %v8263_v4 = vld [vmem:[#allocation40_spill] sm:$0xff]  ;;  %v8264_v11 = vld [vmem:[#allocation41_spill] sm:$0xff] }
 0x318   :  { %4306 = vmatprep.subr.bf16.mxu0 %v8254_v9  ;;  %4370 = vmatprep.subr.bf16.mxu1 %v8255_v13  ;;  %v8265_v9 = vld [vmem:[#allocation42_spill] sm:$0xff]  ;;  %v8266_v13 = vld [vmem:[#allocation43_spill] sm:$0xff] }
 0x31b   :  { %4308 = vmatpush1.bf16.msra.mxu0 %v8256_v17  ;;  %4372 = vmatpush1.bf16.msra.mxu1 %v8257_v18  ;;  %v8267_v17 = vld [vmem:[#allocation44_spill] sm:$0xff]  ;;  %v8268_v18 = vld [vmem:[#allocation45_spill] sm:$0xff] }
 0x31c   :  { %4310 = vmatprep.subr.bf16.mxu0 %v8258_v22  ;;  %4374 = vmatprep.subr.bf16.mxu1 %v8259_v26  ;;  %v8269_v22 = vld [vmem:[#allocation46_spill] sm:$0xff]  ;;  %v8270_v26 = vld [vmem:[#allocation47_spill] sm:$0xff] }
 0x31f   :  { %4312 = vmatpush1.bf16.msra.mxu0 %v8260_v27  ;;  %4376 = vmatpush1.bf16.msra.mxu1 %v8261_v31  ;;  %v8271_v27 = vld [vmem:[#allocation48_spill] sm:$0xff]  ;;  %v8272_v31 = vld [vmem:[#allocation49_spill] sm:$0xff] }
 0x320   :  { %4314 = vmatprep.subr.bf16.mxu0 %v8262_v8  ;;  %4378 = vmatprep.subr.bf16.mxu1 %v8263_v4  ;;  %v8273_v8 = vld [vmem:[#allocation50_spill] sm:$0xff]  ;;  %v8274_v4 = vld [vmem:[#allocation51_spill] sm:$0xff] }
 0x323   :  { %4316 = vmatpush1.bf16.msra.mxu0 %v8264_v11  ;;  %4380 = vmatpush1.bf16.msra.mxu1 %v8265_v9  ;;  %v8275_v11 = vld [vmem:[#allocation52_spill] sm:$0xff]  ;;  %v8276_v9 = vld [vmem:[#allocation53_spill] sm:$0xff] }
 0x324   :  { %4318 = vmatprep.subr.bf16.mxu0 %v8266_v13  ;;  %4382 = vmatprep.subr.bf16.mxu1 %v8267_v17  ;;  %v8277_v13 = vld [vmem:[#allocation54_spill] sm:$0xff]  ;;  %v8278_v17 = vld [vmem:[#allocation55_spill] sm:$0xff] }
 0x327   :  { %4320 = vmatpush1.bf16.msra.mxu0 %v8268_v18  ;;  %4384 = vmatpush1.bf16.msra.mxu1 %v8269_v22  ;;  %v8279_v18 = vld [vmem:[#allocation56_spill] sm:$0xff]  ;;  %v8280_v22 = vld [vmem:[#allocation57_spill] sm:$0xff] }
 0x328   :  { %4322 = vmatprep.subr.bf16.mxu0 %v8270_v26  ;;  %4386 = vmatprep.subr.bf16.mxu1 %v8271_v27  ;;  %v8281_v26 = vld [vmem:[#allocation58_spill] sm:$0xff]  ;;  %v8282_v27 = vld [vmem:[#allocation59_spill] sm:$0xff] }
 0x32b   :  { %4324 = vmatpush1.bf16.msra.mxu0 %v8272_v31  ;;  %4388 = vmatpush1.bf16.msra.mxu1 %v8273_v8  ;;  %v8283_v31 = vld [vmem:[#allocation60_spill] sm:$0xff]  ;;  %v8284_v8 = vld [vmem:[#allocation61_spill] sm:$0xff] }
 0x32c   :  { %4326 = vmatprep.subr.bf16.mxu0 %v8274_v4  ;;  %4390 = vmatprep.subr.bf16.mxu1 %v8275_v11  ;;  %v8285_v4 = vld [vmem:[#allocation62_spill] sm:$0xff]  ;;  %v8286_v11 = vld [vmem:[#allocation63_spill] sm:$0xff] }
 0x32f   :  { %4328 = vmatpush1.bf16.msra.mxu0 %v8276_v9  ;;  %4392 = vmatpush1.bf16.msra.mxu1 %v8277_v13  ;;  %v8287_v9 = vld [vmem:[#allocation64_spill] sm:$0xff]  ;;  %v8288_v13 = vld [vmem:[#allocation65_spill] sm:$0xff] }
 0x330   :  { %4330 = vmatprep.subr.bf16.mxu0 %v8278_v17  ;;  %4394 = vmatprep.subr.bf16.mxu1 %v8279_v18  ;;  %v8289_v17 = vld [vmem:[#allocation66_spill] sm:$0xff]  ;;  %v8290_v18 = vld [vmem:[#allocation67_spill] sm:$0xff] }
 0x333   :  { %4332 = vmatpush1.bf16.msra.mxu0 %v8280_v22  ;;  %4396 = vmatpush1.bf16.msra.mxu1 %v8281_v26  ;;  %v8291_v22 = vld [vmem:[#allocation68_spill] sm:$0xff]  ;;  %v8292_v26 = vld [vmem:[#allocation69_spill] sm:$0xff] }
 0x334   :  { %4334 = vmatprep.subr.bf16.mxu0 %v8282_v27  ;;  %4398 = vmatprep.subr.bf16.mxu1 %v8283_v31  ;;  %v8293_v27 = vld [vmem:[#allocation70_spill] sm:$0xff]  ;;  %v8294_v31 = vld [vmem:[#allocation71_spill] sm:$0xff] }
 0x337   :  { %4336 = vmatpush1.bf16.msra.mxu0 %v8284_v8  ;;  %4400 = vmatpush1.bf16.msra.mxu1 %v8285_v4  ;;  %v8295_v8 = vld [vmem:[#allocation72_spill] sm:$0xff] }
 0x338   :  { %4338 = vmatprep.subr.bf16.mxu0 %v8286_v11  ;;  %4402 = vmatprep.subr.bf16.mxu1 %v8287_v9 }
 0x33b   :  { %4340 = vmatpush1.bf16.msra.mxu0 %v8288_v13  ;;  %4404 = vmatpush1.bf16.msra.mxu1 %v8289_v17  ;;  %v3340_v17 = vld [vmem:[%s7692_s0 + $0x80] sm:$0xff] }
 0x33c   :  { %4342 = vmatprep.subr.bf16.mxu0 %v8290_v18  ;;  %4406 = vmatprep.subr.bf16.mxu1 %v8291_v22  ;;  %v3342_v22 = vld [vmem:[%s7692_s0 + $0x90] sm:$0xff] }
 0x33f   :  { %4344 = vmatpush1.bf16.msra.mxu0 %v8292_v26  ;;  %4408 = vmatpush1.bf16.msra.mxu1 %v8293_v27  ;;  %v3341_v27 = vld [vmem:[%s7692_s0 + $0x88] sm:$0xff] }
 0x340   :  { %4410 = vmatprep.subr.bf16.mxu0 %v8294_v31  ;;  %4474 = vmatprep.subr.bf16.mxu1 %v8295_v8  ;;  %v3343_v8 = vld [vmem:[%s7692_s0 + $0x98] sm:$0xff] }
 0x395   :  { %v1077_v4 = vpop.f32.mrb[8].mxu0  ;;  %v1148_v11 = vpop.f32.mrb[8].mxu1 }
 0x396   :  { %v1079_v45 = vpop.f32.mrb[9].mxu0  ;;  %v1150_v9 = vpop.f32.mrb[9].mxu1  ;;  %v1295_v26 = vadd.f32 %v3340_v17, %v1077_v4  ;;  %v1297_v31 = vadd.f32 %v3342_v22, %v1148_v11 }
 0x397   :  { %v1296_v18 = vadd.f32 %v3341_v27, %v1079_v45  ;;  %v1298_v13 = vadd.f32 %v3343_v8, %v1150_v9  ;;  %v3344_v8 = vld [vmem:[%s7692_s0 + $0xa0] sm:$0xff]  ;;  %v3346_v9 = vld [vmem:[%s7692_s0 + $0xb0] sm:$0xff] }
 0x398   :  { %v3348_v24 = vmul.f32 -1.442695, %v1295_v26  ;;  %v3350_v5 = vmul.f32 -1.442695, %v1297_v31 }
 0x399   :  { %v3349_v49 = vmul.f32 -1.442695, %v1296_v18  ;;  %v3351_v42 = vmul.f32 -1.442695, %v1298_v13  ;;  %v3345_v13 = vld [vmem:[%s7692_s0 + $0xa8] sm:$0xff]  ;;  %v3347_v18 = vld [vmem:[%s7692_s0 + $0xb8] sm:$0xff] }
 0x39a   :  { %5687 = vpow2.f32 %v3348_v24 }
 0x39b   :  { %5689 = vpow2.f32 %v3350_v5 }
 0x39c   :  { %5691 = vpow2.f32 %v3349_v49 }
 0x39d   :  { %5693 = vpow2.f32 %v3351_v42 }
 0x3a4   :  { %v5688_v15 = vpop.eup %5687 }
 0x3a5   :  { %v5690_v0 = vpop.eup %5689  ;;  %v1309_v4 = vadd.f32 1.0, %v5688_v15 }
 0x3a6   :  { %v5692_v6 = vpop.eup %5691  ;;  %v1321_v17 = vadd.f32 1.0, %v5690_v0 }
 0x3a7   :  { %v5694_v61 = vpop.eup %5693  ;;  %v1310_v59 = vadd.f32 1.0, %v5692_v6  ;;  %5695 = vrcp.f32 %v1309_v4 }
 0x3a8   :  { %v1322_v32 = vadd.f32 1.0, %v5694_v61  ;;  %5697 = vrcp.f32 %v1321_v17 }
 0x3a9   :  { %5699 = vrcp.f32 %v1310_v59 }
 0x3aa   :  { %5701 = vrcp.f32 %v1322_v32 }
 0x3b1   :  { %v5696_v5 = vpop.eup %5695 }
 0x3b2   :  { %v5698_v24 = vpop.eup %5697 }
 0x3b3   :  { %v5700_v45 = vpop.eup %5699  ;;  %v1341_v59 = vmul.f32 %v5698_v24, %v6608_v44  ;;  %v8299_v24 = vld [vmem:[#allocation94_spill] sm:$0xff] }
 0x3b4   :  { %v5702_v11 = vpop.eup %5701 }
 0x3b5   :  { %v1342_v32 = vmul.f32 %v5702_v11, %v6610_v51  ;;  %v8301_v11 = vld [vmem:[#allocation96_spill] sm:$0xff] }
 0x3d5   :  { %v1219_v22 = vpop.f32.mrb[10].mxu0  ;;  %v1290_v26 = vpop.f32.mrb[10].mxu1 }
 0x3d6   :  { %v1299_v27 = vadd.f32 %v3344_v8, %v1219_v22  ;;  %v1301_v31 = vadd.f32 %v3346_v9, %v1290_v26  ;;  %v1221_v15 = vpop.f32.mrb[11].mxu0  ;;  %v1292_v61 = vpop.f32.mrb[11].mxu1 }
 0x3d7   :  { %v1300_v6 = vadd.f32 %v3345_v13, %v1221_v15  ;;  %v1302_v0 = vadd.f32 %v3347_v18, %v1292_v61 }
 0x3d8   :  { %5703 = vtanh.f32 %v1299_v27  ;;  %v3352_v42 = vmul.f32 -1.442695, %v1301_v31 }
 0x3d9   :  { %5705 = vtanh.f32 %v1300_v6  ;;  %v3353_v49 = vmul.f32 -1.442695, %v1302_v0 }
 0x3da   :  { %5707 = vpow2.f32 %v3352_v42  ;;  %v8296_v42 = vld [vmem:[#allocation91_spill] sm:$0xff] }
 0x3db   :  { %5709 = vpow2.f32 %v3353_v49  ;;  %v8297_v49 = vld [vmem:[#allocation92_spill] sm:$0xff] }
 0x3e2   :  { %v5704_v4 = vpop.eup %5703 }
 0x3e3   :  { %v5706_v17 = vpop.eup %5705  ;;  %v1343_v8 = vmul.f32 %v5704_v4, %v5696_v5  ;;  %v8298_v5 = vld [vmem:[#allocation93_spill] sm:$0xff] }
 0x3e4   :  { %v5708_v9 = vpop.eup %5707  ;;  %v1344_v13 = vmul.f32 %v5706_v17, %v5700_v45  ;;  %v8300_v45 = vld [vmem:[#allocation95_spill] sm:$0xff]  ;;  %v8302_v4 = vld [vmem:[#allocation97_spill] sm:$0xff]  ;;  %v8303_v17 = vld [vmem:[#allocation98_spill] sm:$0xff] }
 0x3e5   :  { %v5710_v18 = vpop.eup %5709  ;;  %v6774_v22 = vadd.f32 %v1343_v8, %v1341_v59  ;;  %v1335_v26 = vadd.f32 1.0, %v5708_v9  ;;  %v8304_v59 = vld [vmem:[#allocation99_spill] sm:$0xff]  ;;  %v8305_v8 = vld [vmem:[#allocation100_spill] sm:$0xff]  ;;  %v8306_v9 = vld [vmem:[#allocation102_spill] sm:$0xff] }
 0x3e6   :  { %v6776_v27 = vadd.f32 %v1344_v13, %v1342_v32  ;;  %v1336_v31 = vadd.f32 1.0, %v5710_v18  ;;  %v8307_v32 = vld [vmem:[#allocation124_spill] sm:$0xff]  ;;  %v8308_v13 = vld [vmem:[#allocation125_spill] sm:$0xff]  ;;  %v8309_v18 = vld [vmem:[#allocation126_spill] sm:$0xff] }
 0x3e7   :  { %5711 = vtanh.f32 %v6774_v22 }
 0x3e8   :  { %5713 = vrcp.f32 %v1335_v26  ;;  %v8310_v26 = vld [vmem:[#allocation127_spill] sm:$0xff] }
 0x3e9   :  { %5715 = vtanh.f32 %v6776_v27 }
 0x3ea   :  { %5717 = vrcp.f32 %v1336_v31  ;;  %v8311_v31 = vld [vmem:[#allocation128_spill] sm:$0xff] }
 0x3f1   :  { %v5712_v15 = vpop.eup %5711 }
 0x3f2   :  { %v5714_v44 = vpop.eup %5713 }
 0x3f3   :  { %v5716_v61 = vpop.eup %5715  ;;  %v6780_v51 = vmul.f32 %v5714_v44, %v5712_v15  ;;  %v8312_v15 = vld [vmem:[#allocation129_spill] sm:$0xff]  ;;  %v8313_v44 = vld [vmem:[#allocation130_spill] sm:$0xff] }
 0x3f4   :  { %v5718_v6 = vpop.eup %5717 }
 0x3f5   :  { %v1350_v0 = vmul.f32 %v5718_v6, %v5716_v61  ;;  %v8314_v61 = vld [vmem:[#allocation131_spill] sm:$0xff]  ;;  %v8315_v6 = vld [vmem:[#allocation132_spill] sm:$0xff] }
 0x3f7   :  { %1424 = vmatprep.mubr.f32.mxu0 %v1350_v0  ;;  %1495 = vmatprep.mubr.f32.mxu1 %v1350_v0 }
 0x3f8   :  { %1425 = vmatmul.mubr.f32.vlgmr.msra.gmra.mrb[12].mxu0 %v6780_v51  ;;  %1496 = vmatmul.mubr.f32.vlgmr.msra.gmra.mrb[12].mxu1 %v6780_v51 }
 0x3f9   :  { %4412 = vmatpush1.bf16.msra.mxu0 %v8122_v30  ;;  %4476 = vmatpush1.bf16.msra.mxu1 %v8123_v62 }
 0x3fa   :  { %1566 = vmatprep.mubr.f32.mxu0 %v1350_v0  ;;  %1637 = vmatprep.mubr.f32.mxu1 %v1350_v0  ;;  %v8316_v0 = vld [vmem:[#allocation133_spill] sm:$0xff] }
 0x3fb   :  { %4414 = vmatprep.subr.bf16.mxu0 %v8124_v58  ;;  %4478 = vmatprep.subr.bf16.mxu1 %v8125_v48 }
 0x3fd   :  { %4416 = vmatpush1.bf16.msra.mxu0 %v8126_v14  ;;  %4480 = vmatpush1.bf16.msra.mxu1 %v8127_v55 }
 0x3fe   :  { %4418 = vmatprep.subr.bf16.mxu0 %v8128_v46  ;;  %4482 = vmatprep.subr.bf16.mxu1 %v8129_v47 }
 0x401   :  { %4420 = vmatpush1.bf16.msra.mxu0 %v8208_v25  ;;  %4484 = vmatpush1.bf16.msra.mxu1 %v8209_v36 }
 0x402   :  { %4422 = vmatprep.subr.bf16.mxu0 %v8210_v37  ;;  %4486 = vmatprep.subr.bf16.mxu1 %v8211_v43 }
 0x405   :  { %4424 = vmatpush1.bf16.msra.mxu0 %v8212_v50  ;;  %4488 = vmatpush1.bf16.msra.mxu1 %v8213_v29 }
 0x406   :  { %4426 = vmatprep.subr.bf16.mxu0 %v8214_v16  ;;  %4490 = vmatprep.subr.bf16.mxu1 %v8215_v34 }
 0x409   :  { %4428 = vmatpush1.bf16.msra.mxu0 %v8216_v39  ;;  %4492 = vmatpush1.bf16.msra.mxu1 %v8217_v2 }
 0x40a   :  { %4430 = vmatprep.subr.bf16.mxu0 %v8296_v42  ;;  %4494 = vmatprep.subr.bf16.mxu1 %v8297_v49 }
 0x40d   :  { %4432 = vmatpush1.bf16.msra.mxu0 %v8298_v5  ;;  %4496 = vmatpush1.bf16.msra.mxu1 %v8299_v24 }
 0x40e   :  { %4434 = vmatprep.subr.bf16.mxu0 %v8300_v45  ;;  %4498 = vmatprep.subr.bf16.mxu1 %v8301_v11 }
 0x411   :  { %4436 = vmatpush1.bf16.msra.mxu0 %v8302_v4  ;;  %4500 = vmatpush1.bf16.msra.mxu1 %v8303_v17 }
 0x412   :  { %4438 = vmatprep.subr.bf16.mxu0 %v8304_v59  ;;  %4502 = vmatprep.subr.bf16.mxu1 %v8305_v8 }
 0x415   :  { %4440 = vmatpush1.bf16.msra.mxu0 %v8228_v20  ;;  %4504 = vmatpush1.bf16.msra.mxu1 %v8306_v9 }
 0x416   :  { %4442 = vmatprep.subr.bf16.mxu0 %v8230_v35  ;;  %4506 = vmatprep.subr.bf16.mxu1 %v8231_v53 }
 0x419   :  { %4444 = vmatpush1.bf16.msra.mxu0 %v8232_v52  ;;  %4508 = vmatpush1.bf16.msra.mxu1 %v8233_v40 }
 0x41a   :  { %4446 = vmatprep.subr.bf16.mxu0 %v8234_v57  ;;  %4510 = vmatprep.subr.bf16.mxu1 %v8235_v63 }
 0x41d   :  { %4448 = vmatpush1.bf16.msra.mxu0 %v8236_v23  ;;  %4512 = vmatpush1.bf16.msra.mxu1 %v8237_v1 }
 0x41e   :  { %4450 = vmatprep.subr.bf16.mxu0 %v8238_v19  ;;  %4514 = vmatprep.subr.bf16.mxu1 %v8161_v3 }
 0x421   :  { %4452 = vmatpush1.bf16.msra.mxu0 %v8239_v7  ;;  %4516 = vmatpush1.bf16.msra.mxu1 %v8163_v33 }
 0x422   :  { %4454 = vmatprep.subr.bf16.mxu0 %v8164_v54  ;;  %4518 = vmatprep.subr.bf16.mxu1 %v8165_v41 }
 0x425   :  { %4456 = vmatpush1.bf16.msra.mxu0 %v8166_v60  ;;  %4520 = vmatpush1.bf16.msra.mxu1 %v8167_v10 }
 0x426   :  { %4458 = vmatprep.subr.bf16.mxu0 %v8168_v12  ;;  %4522 = vmatprep.subr.bf16.mxu1 %v8169_v38 }
 0x429   :  { %4460 = vmatpush1.bf16.msra.mxu0 %v8170_v56  ;;  %4524 = vmatpush1.bf16.msra.mxu1 %v8171_v28 }
 0x42a   :  { %4462 = vmatprep.subr.bf16.mxu0 %v6311_v21  ;;  %4526 = vmatprep.subr.bf16.mxu1 %v8307_v32  ;;  %v8317_v21 = vld [vmem:[#allocation134_spill] sm:$0xff]  ;;  %v8318_v32 = vld [vmem:[#allocation7_spill] sm:$0xff] }
 0x42d   :  { %4464 = vmatpush1.bf16.msra.mxu0 %v8308_v13  ;;  %4528 = vmatpush1.bf16.msra.mxu1 %v8309_v18  ;;  %v8319_v13 = vld [vmem:[#allocation8_spill] sm:$0xff] }
 0x42e   :  { %4466 = vmatprep.subr.bf16.mxu0 %v8310_v26  ;;  %4530 = vmatprep.subr.bf16.mxu1 %v8311_v31  ;;  %v8320_v31 = vld [vmem:[#allocation9_spill] sm:$0xff]  ;;  %v8329_v26 = vld [vmem:[#allocation18_spill] sm:$0xff] }
 0x431   :  { %4468 = vmatpush1.bf16.msra.mxu0 %v8312_v15  ;;  %4532 = vmatpush1.bf16.msra.mxu1 %v8313_v44  ;;  %v8321_v15 = vld [vmem:[#allocation10_spill] sm:$0xff]  ;;  %v8322_v44 = vld [vmem:[#allocation11_spill] sm:$0xff] }
 0x432   :  { %4470 = vmatprep.subr.bf16.mxu0 %v8314_v61  ;;  %4534 = vmatprep.subr.bf16.mxu1 %v8315_v6  ;;  %v8323_v61 = vld [vmem:[#allocation12_spill] sm:$0xff]  ;;  %v8324_v6 = vld [vmem:[#allocation13_spill] sm:$0xff] }
 0x435   :  { %4472 = vmatpush1.bf16.msra.mxu0 %v8316_v0  ;;  %4536 = vmatpush1.bf16.msra.mxu1 %v8317_v21  ;;  %v8325_v0 = vld [vmem:[#allocation14_spill] sm:$0xff]  ;;  %v8326_v21 = vld [vmem:[#allocation15_spill] sm:$0xff] }
 0x436   :  { %4538 = vmatprep.subr.bf16.mxu0 %v8318_v32  ;;  %4602 = vmatprep.subr.bf16.mxu1 %v8319_v13  ;;  %v8327_v32 = vld [vmem:[#allocation16_spill] sm:$0xff]  ;;  %v8328_v13 = vld [vmem:[#allocation17_spill] sm:$0xff] }
 0x438   :  { %1567 = vmatmul.mubr.f32.vlgmr.msra.gmra.mrb[14].mxu0 %v6780_v51  ;;  %1638 = vmatmul.mubr.f32.vlgmr.msra.gmra.mrb[14].mxu1 %v6780_v51  ;;  %v8330_v51 = vld [vmem:[#allocation19_spill] sm:$0xff] }
 0x439   :  { %4540 = vmatpush1.bf16.msra.mxu0 %v8320_v31  ;;  %4604 = vmatpush1.bf16.msra.mxu1 %v8321_v15  ;;  %v8331_v31 = vld [vmem:[#allocation20_spill] sm:$0xff]  ;;  %v8332_v15 = vld [vmem:[#allocation21_spill] sm:$0xff] }
 0x43a   :  { %4542 = vmatprep.subr.bf16.mxu0 %v8322_v44  ;;  %4606 = vmatprep.subr.bf16.mxu1 %v8323_v61  ;;  %v8333_v44 = vld [vmem:[#allocation22_spill] sm:$0xff]  ;;  %v8334_v61 = vld [vmem:[#allocation23_spill] sm:$0xff] }
 0x43d   :  { %4544 = vmatpush1.bf16.msra.mxu0 %v8324_v6  ;;  %4608 = vmatpush1.bf16.msra.mxu1 %v8325_v0  ;;  %v8335_v6 = vld [vmem:[#allocation24_spill] sm:$0xff]  ;;  %v8336_v0 = vld [vmem:[#allocation25_spill] sm:$0xff] }
 0x43e   :  { %4546 = vmatprep.subr.bf16.mxu0 %v8326_v21  ;;  %4610 = vmatprep.subr.bf16.mxu1 %v8327_v32  ;;  %v8337_v21 = vld [vmem:[#allocation26_spill] sm:$0xff]  ;;  %v8338_v32 = vld [vmem:[#allocation27_spill] sm:$0xff] }
 0x441   :  { %4548 = vmatpush1.bf16.msra.mxu0 %v8328_v13  ;;  %4612 = vmatpush1.bf16.msra.mxu1 %v8329_v26  ;;  %v8339_v13 = vld [vmem:[#allocation28_spill] sm:$0xff]  ;;  %v8340_v26 = vld [vmem:[#allocation29_spill] sm:$0xff] }
 0x442   :  { %4550 = vmatprep.subr.bf16.mxu0 %v8330_v51  ;;  %4614 = vmatprep.subr.bf16.mxu1 %v8331_v31  ;;  %v8341_v51 = vld [vmem:[#allocation30_spill] sm:$0xff]  ;;  %v8342_v31 = vld [vmem:[#allocation31_spill] sm:$0xff] }
 0x445   :  { %4552 = vmatpush1.bf16.msra.mxu0 %v8332_v15  ;;  %4616 = vmatpush1.bf16.msra.mxu1 %v8333_v44  ;;  %v8343_v15 = vld [vmem:[#allocation32_spill] sm:$0xff]  ;;  %v8344_v44 = vld [vmem:[#allocation33_spill] sm:$0xff] }
 0x446   :  { %4554 = vmatprep.subr.bf16.mxu0 %v8334_v61  ;;  %4618 = vmatprep.subr.bf16.mxu1 %v8335_v6  ;;  %v8345_v61 = vld [vmem:[#allocation34_spill] sm:$0xff]  ;;  %v8346_v6 = vld [vmem:[#allocation35_spill] sm:$0xff] }
 0x449   :  { %4556 = vmatpush1.bf16.msra.mxu0 %v8336_v0  ;;  %4620 = vmatpush1.bf16.msra.mxu1 %v8337_v21  ;;  %v8347_v0 = vld [vmem:[#allocation36_spill] sm:$0xff]  ;;  %v8348_v21 = vld [vmem:[#allocation37_spill] sm:$0xff] }
 0x44a   :  { %4558 = vmatprep.subr.bf16.mxu0 %v8338_v32  ;;  %4622 = vmatprep.subr.bf16.mxu1 %v8339_v13  ;;  %v8349_v32 = vld [vmem:[#allocation38_spill] sm:$0xff]  ;;  %v8350_v13 = vld [vmem:[#allocation39_spill] sm:$0xff] }
 0x44d   :  { %4560 = vmatpush1.bf16.msra.mxu0 %v8340_v26  ;;  %4624 = vmatpush1.bf16.msra.mxu1 %v8341_v51  ;;  %v8351_v26 = vld [vmem:[#allocation40_spill] sm:$0xff]  ;;  %v8352_v51 = vld [vmem:[#allocation41_spill] sm:$0xff] }
 0x44e   :  { %4562 = vmatprep.subr.bf16.mxu0 %v8342_v31  ;;  %4626 = vmatprep.subr.bf16.mxu1 %v8343_v15  ;;  %v8353_v31 = vld [vmem:[#allocation42_spill] sm:$0xff]  ;;  %v8354_v15 = vld [vmem:[#allocation43_spill] sm:$0xff] }
 0x451   :  { %4564 = vmatpush1.bf16.msra.mxu0 %v8344_v44  ;;  %4628 = vmatpush1.bf16.msra.mxu1 %v8345_v61  ;;  %v8355_v44 = vld [vmem:[#allocation44_spill] sm:$0xff]  ;;  %v8356_v61 = vld [vmem:[#allocation45_spill] sm:$0xff] }
 0x452   :  { %4566 = vmatprep.subr.bf16.mxu0 %v8346_v6  ;;  %4630 = vmatprep.subr.bf16.mxu1 %v8347_v0  ;;  %v8357_v6 = vld [vmem:[#allocation46_spill] sm:$0xff]  ;;  %v8358_v0 = vld [vmem:[#allocation47_spill] sm:$0xff] }
 0x455   :  { %4568 = vmatpush1.bf16.msra.mxu0 %v8348_v21  ;;  %4632 = vmatpush1.bf16.msra.mxu1 %v8349_v32  ;;  %v8359_v21 = vld [vmem:[#allocation48_spill] sm:$0xff]  ;;  %v8360_v32 = vld [vmem:[#allocation49_spill] sm:$0xff] }
 0x456   :  { %4570 = vmatprep.subr.bf16.mxu0 %v8350_v13  ;;  %4634 = vmatprep.subr.bf16.mxu1 %v8351_v26  ;;  %v8361_v13 = vld [vmem:[#allocation50_spill] sm:$0xff]  ;;  %v8362_v26 = vld [vmem:[#allocation51_spill] sm:$0xff] }
 0x459   :  { %4572 = vmatpush1.bf16.msra.mxu0 %v8352_v51  ;;  %4636 = vmatpush1.bf16.msra.mxu1 %v8353_v31  ;;  %v8363_v51 = vld [vmem:[#allocation52_spill] sm:$0xff]  ;;  %v8364_v31 = vld [vmem:[#allocation53_spill] sm:$0xff] }
 0x45a   :  { %4574 = vmatprep.subr.bf16.mxu0 %v8354_v15  ;;  %4638 = vmatprep.subr.bf16.mxu1 %v8355_v44  ;;  %v8365_v15 = vld [vmem:[#allocation54_spill] sm:$0xff]  ;;  %v8366_v44 = vld [vmem:[#allocation55_spill] sm:$0xff] }
 0x45d   :  { %4576 = vmatpush1.bf16.msra.mxu0 %v8356_v61  ;;  %4640 = vmatpush1.bf16.msra.mxu1 %v8357_v6  ;;  %v8367_v61 = vld [vmem:[#allocation56_spill] sm:$0xff]  ;;  %v8368_v6 = vld [vmem:[#allocation57_spill] sm:$0xff] }
 0x45e   :  { %4578 = vmatprep.subr.bf16.mxu0 %v8358_v0  ;;  %4642 = vmatprep.subr.bf16.mxu1 %v8359_v21  ;;  %v8369_v0 = vld [vmem:[#allocation58_spill] sm:$0xff]  ;;  %v8370_v21 = vld [vmem:[#allocation59_spill] sm:$0xff] }
 0x461   :  { %4580 = vmatpush1.bf16.msra.mxu0 %v8360_v32  ;;  %4644 = vmatpush1.bf16.msra.mxu1 %v8361_v13  ;;  %v8371_v32 = vld [vmem:[#allocation60_spill] sm:$0xff]  ;;  %v8372_v13 = vld [vmem:[#allocation61_spill] sm:$0xff] }
 0x462   :  { %4582 = vmatprep.subr.bf16.mxu0 %v8362_v26  ;;  %4646 = vmatprep.subr.bf16.mxu1 %v8363_v51  ;;  %v8373_v26 = vld [vmem:[#allocation62_spill] sm:$0xff]  ;;  %v8374_v51 = vld [vmem:[#allocation63_spill] sm:$0xff] }
 0x465   :  { %4584 = vmatpush1.bf16.msra.mxu0 %v8364_v31  ;;  %4648 = vmatpush1.bf16.msra.mxu1 %v8365_v15  ;;  %v8375_v31 = vld [vmem:[#allocation64_spill] sm:$0xff]  ;;  %v8376_v15 = vld [vmem:[#allocation65_spill] sm:$0xff] }
 0x466   :  { %4586 = vmatprep.subr.bf16.mxu0 %v8366_v44  ;;  %4650 = vmatprep.subr.bf16.mxu1 %v8367_v61  ;;  %v8377_v44 = vld [vmem:[#allocation66_spill] sm:$0xff]  ;;  %v8378_v61 = vld [vmem:[#allocation67_spill] sm:$0xff] }
 0x469   :  { %4588 = vmatpush1.bf16.msra.mxu0 %v8368_v6  ;;  %4652 = vmatpush1.bf16.msra.mxu1 %v8369_v0  ;;  %v8379_v6 = vld [vmem:[#allocation68_spill] sm:$0xff]  ;;  %v8380_v0 = vld [vmem:[#allocation69_spill] sm:$0xff] }
 0x46a   :  { %4590 = vmatprep.subr.bf16.mxu0 %v8370_v21  ;;  %4654 = vmatprep.subr.bf16.mxu1 %v8371_v32  ;;  %v8381_v21 = vld [vmem:[#allocation70_spill] sm:$0xff]  ;;  %v8382_v32 = vld [vmem:[#allocation71_spill] sm:$0xff] }
 0x46d   :  { %4592 = vmatpush1.bf16.msra.mxu0 %v8372_v13  ;;  %4656 = vmatpush1.bf16.msra.mxu1 %v8373_v26  ;;  %v8383_v13 = vld [vmem:[#allocation72_spill] sm:$0xff] }
 0x46e   :  { %4594 = vmatprep.subr.bf16.mxu0 %v8374_v51  ;;  %4658 = vmatprep.subr.bf16.mxu1 %v8375_v31 }
 0x471   :  { %4596 = vmatpush1.bf16.msra.mxu0 %v8376_v15  ;;  %4660 = vmatpush1.bf16.msra.mxu1 %v8377_v44  ;;  %v3354_v44 = vld [vmem:[%s7692_s0 + $0xc0] sm:$0xff] }
 0x472   :  { %4598 = vmatprep.subr.bf16.mxu0 %v8378_v61  ;;  %4662 = vmatprep.subr.bf16.mxu1 %v8379_v6  ;;  %v3356_v6 = vld [vmem:[%s7692_s0 + $0xd0] sm:$0xff] }
 0x475   :  { %4600 = vmatpush1.bf16.msra.mxu0 %v8380_v0  ;;  %4664 = vmatpush1.bf16.msra.mxu1 %v8381_v21  ;;  %v3355_v21 = vld [vmem:[%s7692_s0 + $0xc8] sm:$0xff] }
 0x476   :  { %4666 = vmatprep.subr.bf16.mxu0 %v8382_v32  ;;  %4730 = vmatprep.subr.bf16.mxu1 %v8383_v13  ;;  %v3357_v13 = vld [vmem:[%s7692_s0 + $0xd8] sm:$0xff] }
 0x4cb   :  { %v1426_v26 = vpop.f32.mrb[12].mxu0  ;;  %v1497_v51 = vpop.f32.mrb[12].mxu1 }
 0x4cc   :  { %v1428_v18 = vpop.f32.mrb[13].mxu0  ;;  %v1499_v31 = vpop.f32.mrb[13].mxu1  ;;  %v1644_v0 = vadd.f32 %v3354_v44, %v1426_v26  ;;  %v1646_v32 = vadd.f32 %v3356_v6, %v1497_v51 }
 0x4cd   :  { %v1645_v61 = vadd.f32 %v3355_v21, %v1428_v18  ;;  %v1647_v15 = vadd.f32 %v3357_v13, %v1499_v31  ;;  %v3358_v21 = vld [vmem:[%s7692_s0 + $0xe0] sm:$0xff] }
 0x4ce   :  { %v3362_v28 = vmul.f32 -1.442695, %v1644_v0  ;;  %v3364_v56 = vmul.f32 -1.442695, %v1646_v32  ;;  %v3360_v32 = vld [vmem:[%s7692_s0 + $0xf0] sm:$0xff] }
 0x4cf   :  { %v3363_v38 = vmul.f32 -1.442695, %v1645_v61  ;;  %v3365_v12 = vmul.f32 -1.442695, %v1647_v15 }
 0x4d0   :  { %5719 = vpow2.f32 %v3362_v28 }
 0x4d1   :  { %5721 = vpow2.f32 %v3364_v56 }
 0x4d2   :  { %5723 = vpow2.f32 %v3363_v38 }
 0x4d3   :  { %5725 = vpow2.f32 %v3365_v12  ;;  %v3359_v12 = vld [vmem:[%s7692_s0 + $0xe8] sm:$0xff] }
 0x4da   :  { %v5720_v10 = vpop.eup %5719 }
 0x4db   :  { %v5722_v60 = vpop.eup %5721  ;;  %v1658_v26 = vadd.f32 1.0, %v5720_v10  ;;  %v3361_v10 = vld [vmem:[%s7692_s0 + $0xf8] sm:$0xff] }
 0x4dc   :  { %v5724_v41 = vpop.eup %5723  ;;  %v1670_v44 = vadd.f32 1.0, %v5722_v60 }
 0x4dd   :  { %v5726_v54 = vpop.eup %5725  ;;  %v1659_v33 = vadd.f32 1.0, %v5724_v41  ;;  %5727 = vrcp.f32 %v1658_v26 }
 0x4de   :  { %v1671_v7 = vadd.f32 1.0, %v5726_v54  ;;  %5729 = vrcp.f32 %v1670_v44 }
 0x4df   :  { %5731 = vrcp.f32 %v1659_v33 }
 0x4e0   :  { %5733 = vrcp.f32 %v1671_v7 }
 0x4e7   :  { %v5728_v61 = vpop.eup %5727 }
 0x4e8   :  { %v5730_v6 = vpop.eup %5729 }
 0x4e9   :  { %v5732_v0 = vpop.eup %5731  ;;  %v1690_v33 = vmul.f32 %v5730_v6, %v6774_v22  ;;  %v8387_v6 = vld [vmem:[#allocation116_spill] sm:$0xff] }
 0x4ea   :  { %v5734_v51 = vpop.eup %5733 }
 0x4eb   :  { %v1691_v7 = vmul.f32 %v5734_v51, %v6776_v27  ;;  %v8389_v51 = vld [vmem:[#allocation118_spill] sm:$0xff] }
 0x50b   :  { %v1568_v41 = vpop.f32.mrb[14].mxu0  ;;  %v1639_v54 = vpop.f32.mrb[14].mxu1 }
 0x50c   :  { %v1648_v60 = vadd.f32 %v3358_v21, %v1568_v41  ;;  %v1650_v38 = vadd.f32 %v3360_v32, %v1639_v54  ;;  %v1570_v56 = vpop.f32.mrb[15].mxu0  ;;  %v1641_v28 = vpop.f32.mrb[15].mxu1 }
 0x50d   :  { %v1649_v13 = vadd.f32 %v3359_v12, %v1570_v56  ;;  %v1651_v18 = vadd.f32 %v3361_v10, %v1641_v28 }
 0x50e   :  { %5735 = vtanh.f32 %v1648_v60  ;;  %v3366_v31 = vmul.f32 -1.442695, %v1650_v38 }
 0x50f   :  { %5737 = vtanh.f32 %v1649_v13  ;;  %v3367_v15 = vmul.f32 -1.442695, %v1651_v18 }
 0x510   :  { %5739 = vpow2.f32 %v3366_v31  ;;  %v8384_v31 = vld [vmem:[#allocation113_spill] sm:$0xff] }
 0x511   :  { %5741 = vpow2.f32 %v3367_v15  ;;  %v8385_v15 = vld [vmem:[#allocation114_spill] sm:$0xff] }
 0x518   :  { %v5736_v26 = vpop.eup %5735 }
 0x519   :  { %v5738_v44 = vpop.eup %5737  ;;  %v1692_v21 = vmul.f32 %v5736_v26, %v5728_v61  ;;  %v8386_v61 = vld [vmem:[#allocation115_spill] sm:$0xff] }
 0x51a   :  { %v5740_v32 = vpop.eup %5739  ;;  %v1693_v12 = vmul.f32 %v5738_v44, %v5732_v0  ;;  %v8388_v0 = vld [vmem:[#allocation117_spill] sm:$0xff]  ;;  %v8390_v26 = vld [vmem:[#allocation119_spill] sm:$0xff]  ;;  %v8391_v44 = vld [vmem:[#allocation120_spill] sm:$0xff] }
 0x51b   :  { %v5742_v10 = vpop.eup %5741  ;;  %v6940_v41 = vadd.f32 %v1692_v21, %v1690_v33  ;;  %v1684_v54 = vadd.f32 1.0, %v5740_v32  ;;  %v8392_v33 = vld [vmem:[#allocation121_spill] sm:$0xff]  ;;  %v8393_v21 = vld [vmem:[#allocation122_spill] sm:$0xff]  ;;  %v8394_v32 = vld [vmem:[#allocation123_spill] sm:$0xff] }
 0x51c   :  { %v6942_v60 = vadd.f32 %v1693_v12, %v1691_v7  ;;  %v1685_v38 = vadd.f32 1.0, %v5742_v10  ;;  %v8395_v7 = vld [vmem:[#allocation124_spill] sm:$0xff]  ;;  %v8396_v12 = vld [vmem:[#allocation125_spill] sm:$0xff]  ;;  %v8397_v10 = vld [vmem:[#allocation126_spill] sm:$0xff] }
 0x51d   :  { %5743 = vtanh.f32 %v6940_v41 }
 0x51e   :  { %5745 = vrcp.f32 %v1684_v54  ;;  %v8398_v54 = vld [vmem:[#allocation127_spill] sm:$0xff] }
 0x51f   :  { %5747 = vtanh.f32 %v6942_v60 }
 0x520   :  { %5749 = vrcp.f32 %v1685_v38  ;;  %v8399_v38 = vld [vmem:[#allocation128_spill] sm:$0xff] }
 0x527   :  { %v5744_v56 = vpop.eup %5743 }
 0x528   :  { %v5746_v22 = vpop.eup %5745 }
 0x529   :  { %v5748_v28 = vpop.eup %5747  ;;  %v6946_v27 = vmul.f32 %v5746_v22, %v5744_v56  ;;  %v8400_v56 = vld [vmem:[#allocation129_spill] sm:$0xff]  ;;  %v8401_v22 = vld [vmem:[#allocation130_spill] sm:$0xff] }
 0x52a   :  { %v5750_v13 = vpop.eup %5749 }
 0x52b   :  { %v1699_v18 = vmul.f32 %v5750_v13, %v5748_v28  ;;  %v8402_v28 = vld [vmem:[#allocation131_spill] sm:$0xff]  ;;  %v8403_v13 = vld [vmem:[#allocation132_spill] sm:$0xff] }
 0x52d   :  { %1773 = vmatprep.mubr.f32.mxu0 %v1699_v18  ;;  %1844 = vmatprep.mubr.f32.mxu1 %v1699_v18 }
 0x52e   :  { %1774 = vmatmul.mubr.f32.vlgmr.msra.gmra.mrb[16].mxu0 %v6946_v27  ;;  %1845 = vmatmul.mubr.f32.vlgmr.msra.gmra.mrb[16].mxu1 %v6946_v27 }
 0x52f   :  { %4668 = vmatpush1.bf16.msra.mxu0 %v8122_v30  ;;  %4732 = vmatpush1.bf16.msra.mxu1 %v8123_v62 }
 0x530   :  { %1915 = vmatprep.mubr.f32.mxu0 %v1699_v18  ;;  %1986 = vmatprep.mubr.f32.mxu1 %v1699_v18  ;;  %v8404_v18 = vld [vmem:[#allocation133_spill] sm:$0xff] }
 0x531   :  { %4670 = vmatprep.subr.bf16.mxu0 %v8124_v58  ;;  %4734 = vmatprep.subr.bf16.mxu1 %v8125_v48 }
 0x533   :  { %4672 = vmatpush1.bf16.msra.mxu0 %v8126_v14  ;;  %4736 = vmatpush1.bf16.msra.mxu1 %v8127_v55 }
 0x534   :  { %4674 = vmatprep.subr.bf16.mxu0 %v8128_v46  ;;  %4738 = vmatprep.subr.bf16.mxu1 %v8129_v47 }
 0x537   :  { %4676 = vmatpush1.bf16.msra.mxu0 %v8208_v25  ;;  %4740 = vmatpush1.bf16.msra.mxu1 %v8209_v36 }
 0x538   :  { %4678 = vmatprep.subr.bf16.mxu0 %v8210_v37  ;;  %4742 = vmatprep.subr.bf16.mxu1 %v8211_v43 }
 0x53b   :  { %4680 = vmatpush1.bf16.msra.mxu0 %v8212_v50  ;;  %4744 = vmatpush1.bf16.msra.mxu1 %v8213_v29 }
 0x53c   :  { %4682 = vmatprep.subr.bf16.mxu0 %v8214_v16  ;;  %4746 = vmatprep.subr.bf16.mxu1 %v8215_v34 }
 0x53f   :  { %4684 = vmatpush1.bf16.msra.mxu0 %v8216_v39  ;;  %4748 = vmatpush1.bf16.msra.mxu1 %v8217_v2 }
 0x540   :  { %4686 = vmatprep.subr.bf16.mxu0 %v8296_v42  ;;  %4750 = vmatprep.subr.bf16.mxu1 %v8297_v49 }
 0x543   :  { %4688 = vmatpush1.bf16.msra.mxu0 %v8298_v5  ;;  %4752 = vmatpush1.bf16.msra.mxu1 %v8299_v24 }
 0x544   :  { %4690 = vmatprep.subr.bf16.mxu0 %v8300_v45  ;;  %4754 = vmatprep.subr.bf16.mxu1 %v8301_v11 }
 0x547   :  { %4692 = vmatpush1.bf16.msra.mxu0 %v8302_v4  ;;  %4756 = vmatpush1.bf16.msra.mxu1 %v8303_v17 }
 0x548   :  { %4694 = vmatprep.subr.bf16.mxu0 %v8304_v59  ;;  %4758 = vmatprep.subr.bf16.mxu1 %v8305_v8 }
 0x54b   :  { %4696 = vmatpush1.bf16.msra.mxu0 %v8228_v20  ;;  %4760 = vmatpush1.bf16.msra.mxu1 %v8306_v9 }
 0x54c   :  { %4698 = vmatprep.subr.bf16.mxu0 %v8230_v35  ;;  %4762 = vmatprep.subr.bf16.mxu1 %v8231_v53 }
 0x54f   :  { %4700 = vmatpush1.bf16.msra.mxu0 %v8232_v52  ;;  %4764 = vmatpush1.bf16.msra.mxu1 %v8233_v40 }
 0x550   :  { %4702 = vmatprep.subr.bf16.mxu0 %v8234_v57  ;;  %4766 = vmatprep.subr.bf16.mxu1 %v8235_v63 }
 0x553   :  { %4704 = vmatpush1.bf16.msra.mxu0 %v8236_v23  ;;  %4768 = vmatpush1.bf16.msra.mxu1 %v8237_v1 }
 0x554   :  { %4706 = vmatprep.subr.bf16.mxu0 %v8238_v19  ;;  %4770 = vmatprep.subr.bf16.mxu1 %v8161_v3 }
 0x557   :  { %4708 = vmatpush1.bf16.msra.mxu0 %v8384_v31  ;;  %4772 = vmatpush1.bf16.msra.mxu1 %v8385_v15 }
 0x558   :  { %4710 = vmatprep.subr.bf16.mxu0 %v8386_v61  ;;  %4774 = vmatprep.subr.bf16.mxu1 %v8387_v6 }
 0x55b   :  { %4712 = vmatpush1.bf16.msra.mxu0 %v8388_v0  ;;  %4776 = vmatpush1.bf16.msra.mxu1 %v8389_v51 }
 0x55c   :  { %4714 = vmatprep.subr.bf16.mxu0 %v8390_v26  ;;  %4778 = vmatprep.subr.bf16.mxu1 %v8391_v44 }
 0x55f   :  { %4716 = vmatpush1.bf16.msra.mxu0 %v8392_v33  ;;  %4780 = vmatpush1.bf16.msra.mxu1 %v8393_v21 }
 0x560   :  { %4718 = vmatprep.subr.bf16.mxu0 %v8394_v32  ;;  %4782 = vmatprep.subr.bf16.mxu1 %v8395_v7  ;;  %v8405_v32 = vld [vmem:[#allocation134_spill] sm:$0xff]  ;;  %v8406_v7 = vld [vmem:[#allocation7_spill] sm:$0xff] }
 0x563   :  { %4720 = vmatpush1.bf16.msra.mxu0 %v8396_v12  ;;  %4784 = vmatpush1.bf16.msra.mxu1 %v8397_v10  ;;  %v8407_v12 = vld [vmem:[#allocation8_spill] sm:$0xff] }
 0x564   :  { %4722 = vmatprep.subr.bf16.mxu0 %v8398_v54  ;;  %4786 = vmatprep.subr.bf16.mxu1 %v8399_v38  ;;  %v8408_v38 = vld [vmem:[#allocation9_spill] sm:$0xff]  ;;  %v8417_v54 = vld [vmem:[#allocation18_spill] sm:$0xff] }
 0x567   :  { %4724 = vmatpush1.bf16.msra.mxu0 %v8400_v56  ;;  %4788 = vmatpush1.bf16.msra.mxu1 %v8401_v22  ;;  %v8409_v56 = vld [vmem:[#allocation10_spill] sm:$0xff]  ;;  %v8410_v22 = vld [vmem:[#allocation11_spill] sm:$0xff] }
 0x568   :  { %4726 = vmatprep.subr.bf16.mxu0 %v8402_v28  ;;  %4790 = vmatprep.subr.bf16.mxu1 %v8403_v13  ;;  %v8411_v28 = vld [vmem:[#allocation12_spill] sm:$0xff]  ;;  %v8412_v13 = vld [vmem:[#allocation13_spill] sm:$0xff] }
 0x56b   :  { %4728 = vmatpush1.bf16.msra.mxu0 %v8404_v18  ;;  %4792 = vmatpush1.bf16.msra.mxu1 %v8405_v32  ;;  %v8413_v18 = vld [vmem:[#allocation14_spill] sm:$0xff]  ;;  %v8414_v32 = vld [vmem:[#allocation15_spill] sm:$0xff] }
 0x56c   :  { %4794 = vmatprep.subr.bf16.mxu0 %v8406_v7  ;;  %4858 = vmatprep.subr.bf16.mxu1 %v8407_v12  ;;  %v8415_v7 = vld [vmem:[#allocation16_spill] sm:$0xff]  ;;  %v8416_v12 = vld [vmem:[#allocation17_spill] sm:$0xff] }
 0x56e   :  { %1916 = vmatmul.mubr.f32.vlgmr.msra.gmra.mrb[18].mxu0 %v6946_v27  ;;  %1987 = vmatmul.mubr.f32.vlgmr.msra.gmra.mrb[18].mxu1 %v6946_v27  ;;  %v8418_v27 = vld [vmem:[#allocation19_spill] sm:$0xff] }
 0x56f   :  { %4796 = vmatpush1.bf16.msra.mxu0 %v8408_v38  ;;  %4860 = vmatpush1.bf16.msra.mxu1 %v8409_v56  ;;  %v8419_v38 = vld [vmem:[#allocation20_spill] sm:$0xff]  ;;  %v8420_v56 = vld [vmem:[#allocation21_spill] sm:$0xff] }
 0x570   :  { %4798 = vmatprep.subr.bf16.mxu0 %v8410_v22  ;;  %4862 = vmatprep.subr.bf16.mxu1 %v8411_v28  ;;  %v8421_v22 = vld [vmem:[#allocation22_spill] sm:$0xff]  ;;  %v8422_v28 = vld [vmem:[#allocation23_spill] sm:$0xff] }
 0x573   :  { %4800 = vmatpush1.bf16.msra.mxu0 %v8412_v13  ;;  %4864 = vmatpush1.bf16.msra.mxu1 %v8413_v18  ;;  %v8423_v13 = vld [vmem:[#allocation24_spill] sm:$0xff]  ;;  %v8424_v18 = vld [vmem:[#allocation25_spill] sm:$0xff] }
 0x574   :  { %4802 = vmatprep.subr.bf16.mxu0 %v8414_v32  ;;  %4866 = vmatprep.subr.bf16.mxu1 %v8415_v7  ;;  %v8425_v32 = vld [vmem:[#allocation26_spill] sm:$0xff]  ;;  %v8426_v7 = vld [vmem:[#allocation27_spill] sm:$0xff] }
 0x577   :  { %4804 = vmatpush1.bf16.msra.mxu0 %v8416_v12  ;;  %4868 = vmatpush1.bf16.msra.mxu1 %v8417_v54  ;;  %v8427_v12 = vld [vmem:[#allocation28_spill] sm:$0xff]  ;;  %v8428_v54 = vld [vmem:[#allocation29_spill] sm:$0xff] }
 0x578   :  { %4806 = vmatprep.subr.bf16.mxu0 %v8418_v27  ;;  %4870 = vmatprep.subr.bf16.mxu1 %v8419_v38  ;;  %v8429_v27 = vld [vmem:[#allocation30_spill] sm:$0xff]  ;;  %v8430_v38 = vld [vmem:[#allocation31_spill] sm:$0xff] }
 0x57b   :  { %4808 = vmatpush1.bf16.msra.mxu0 %v8420_v56  ;;  %4872 = vmatpush1.bf16.msra.mxu1 %v8421_v22  ;;  %v8431_v56 = vld [vmem:[#allocation32_spill] sm:$0xff]  ;;  %v8432_v22 = vld [vmem:[#allocation33_spill] sm:$0xff] }
 0x57c   :  { %4810 = vmatprep.subr.bf16.mxu0 %v8422_v28  ;;  %4874 = vmatprep.subr.bf16.mxu1 %v8423_v13  ;;  %v8433_v28 = vld [vmem:[#allocation34_spill] sm:$0xff]  ;;  %v8434_v13 = vld [vmem:[#allocation35_spill] sm:$0xff] }
 0x57f   :  { %4812 = vmatpush1.bf16.msra.mxu0 %v8424_v18  ;;  %4876 = vmatpush1.bf16.msra.mxu1 %v8425_v32  ;;  %v8435_v18 = vld [vmem:[#allocation36_spill] sm:$0xff]  ;;  %v8436_v32 = vld [vmem:[#allocation37_spill] sm:$0xff] }
 0x580   :  { %4814 = vmatprep.subr.bf16.mxu0 %v8426_v7  ;;  %4878 = vmatprep.subr.bf16.mxu1 %v8427_v12  ;;  %v8437_v7 = vld [vmem:[#allocation38_spill] sm:$0xff]  ;;  %v8438_v12 = vld [vmem:[#allocation39_spill] sm:$0xff] }
 0x583   :  { %4816 = vmatpush1.bf16.msra.mxu0 %v8428_v54  ;;  %4880 = vmatpush1.bf16.msra.mxu1 %v8429_v27  ;;  %v8439_v54 = vld [vmem:[#allocation40_spill] sm:$0xff]  ;;  %v8440_v27 = vld [vmem:[#allocation41_spill] sm:$0xff] }
 0x584   :  { %4818 = vmatprep.subr.bf16.mxu0 %v8430_v38  ;;  %4882 = vmatprep.subr.bf16.mxu1 %v8431_v56  ;;  %v8441_v38 = vld [vmem:[#allocation42_spill] sm:$0xff]  ;;  %v8442_v56 = vld [vmem:[#allocation43_spill] sm:$0xff] }
 0x587   :  { %4820 = vmatpush1.bf16.msra.mxu0 %v8432_v22  ;;  %4884 = vmatpush1.bf16.msra.mxu1 %v8433_v28  ;;  %v8443_v22 = vld [vmem:[#allocation44_spill] sm:$0xff]  ;;  %v8444_v28 = vld [vmem:[#allocation45_spill] sm:$0xff] }
 0x588   :  { %4822 = vmatprep.subr.bf16.mxu0 %v8434_v13  ;;  %4886 = vmatprep.subr.bf16.mxu1 %v8435_v18  ;;  %v8445_v13 = vld [vmem:[#allocation46_spill] sm:$0xff]  ;;  %v8446_v18 = vld [vmem:[#allocation47_spill] sm:$0xff] }
 0x58b   :  { %4824 = vmatpush1.bf16.msra.mxu0 %v8436_v32  ;;  %4888 = vmatpush1.bf16.msra.mxu1 %v8437_v7  ;;  %v8447_v32 = vld [vmem:[#allocation48_spill] sm:$0xff]  ;;  %v8448_v7 = vld [vmem:[#allocation49_spill] sm:$0xff] }
 0x58c   :  { %4826 = vmatprep.subr.bf16.mxu0 %v8438_v12  ;;  %4890 = vmatprep.subr.bf16.mxu1 %v8439_v54  ;;  %v8449_v12 = vld [vmem:[#allocation50_spill] sm:$0xff]  ;;  %v8450_v54 = vld [vmem:[#allocation51_spill] sm:$0xff] }
 0x58f   :  { %4828 = vmatpush1.bf16.msra.mxu0 %v8440_v27  ;;  %4892 = vmatpush1.bf16.msra.mxu1 %v8441_v38  ;;  %v8451_v27 = vld [vmem:[#allocation52_spill] sm:$0xff]  ;;  %v8452_v38 = vld [vmem:[#allocation53_spill] sm:$0xff] }
 0x590   :  { %4830 = vmatprep.subr.bf16.mxu0 %v8442_v56  ;;  %4894 = vmatprep.subr.bf16.mxu1 %v8443_v22  ;;  %v8453_v56 = vld [vmem:[#allocation54_spill] sm:$0xff]  ;;  %v8454_v22 = vld [vmem:[#allocation55_spill] sm:$0xff] }
 0x593   :  { %4832 = vmatpush1.bf16.msra.mxu0 %v8444_v28  ;;  %4896 = vmatpush1.bf16.msra.mxu1 %v8445_v13  ;;  %v8455_v28 = vld [vmem:[#allocation56_spill] sm:$0xff]  ;;  %v8456_v13 = vld [vmem:[#allocation57_spill] sm:$0xff] }
 0x594   :  { %4834 = vmatprep.subr.bf16.mxu0 %v8446_v18  ;;  %4898 = vmatprep.subr.bf16.mxu1 %v8447_v32  ;;  %v8457_v18 = vld [vmem:[#allocation58_spill] sm:$0xff]  ;;  %v8458_v32 = vld [vmem:[#allocation59_spill] sm:$0xff] }
 0x597   :  { %4836 = vmatpush1.bf16.msra.mxu0 %v8448_v7  ;;  %4900 = vmatpush1.bf16.msra.mxu1 %v8449_v12  ;;  %v8459_v7 = vld [vmem:[#allocation60_spill] sm:$0xff]  ;;  %v8460_v12 = vld [vmem:[#allocation61_spill] sm:$0xff] }
 0x598   :  { %4838 = vmatprep.subr.bf16.mxu0 %v8450_v54  ;;  %4902 = vmatprep.subr.bf16.mxu1 %v8451_v27  ;;  %v8461_v54 = vld [vmem:[#allocation62_spill] sm:$0xff]  ;;  %v8462_v27 = vld [vmem:[#allocation63_spill] sm:$0xff] }
 0x59b   :  { %4840 = vmatpush1.bf16.msra.mxu0 %v8452_v38  ;;  %4904 = vmatpush1.bf16.msra.mxu1 %v8453_v56  ;;  %v8463_v38 = vld [vmem:[#allocation64_spill] sm:$0xff]  ;;  %v8464_v56 = vld [vmem:[#allocation65_spill] sm:$0xff] }
 0x59c   :  { %4842 = vmatprep.subr.bf16.mxu0 %v8454_v22  ;;  %4906 = vmatprep.subr.bf16.mxu1 %v8455_v28  ;;  %v8465_v22 = vld [vmem:[#allocation66_spill] sm:$0xff]  ;;  %v8466_v28 = vld [vmem:[#allocation67_spill] sm:$0xff] }
 0x59f   :  { %4844 = vmatpush1.bf16.msra.mxu0 %v8456_v13  ;;  %4908 = vmatpush1.bf16.msra.mxu1 %v8457_v18  ;;  %v8467_v13 = vld [vmem:[#allocation68_spill] sm:$0xff]  ;;  %v8468_v18 = vld [vmem:[#allocation69_spill] sm:$0xff] }
 0x5a0   :  { %4846 = vmatprep.subr.bf16.mxu0 %v8458_v32  ;;  %4910 = vmatprep.subr.bf16.mxu1 %v8459_v7  ;;  %v8469_v32 = vld [vmem:[#allocation70_spill] sm:$0xff]  ;;  %v8470_v7 = vld [vmem:[#allocation71_spill] sm:$0xff] }
 0x5a3   :  { %4848 = vmatpush1.bf16.msra.mxu0 %v8460_v12  ;;  %4912 = vmatpush1.bf16.msra.mxu1 %v8461_v54  ;;  %v8471_v12 = vld [vmem:[#allocation72_spill] sm:$0xff] }
 0x5a4   :  { %4850 = vmatprep.subr.bf16.mxu0 %v8462_v27  ;;  %4914 = vmatprep.subr.bf16.mxu1 %v8463_v38 }
 0x5a7   :  { %4852 = vmatpush1.bf16.msra.mxu0 %v8464_v56  ;;  %4916 = vmatpush1.bf16.msra.mxu1 %v8465_v22  ;;  %v3368_v22 = vld [vmem:[%s7692_s0 + $0x100] sm:$0xff] }
 0x5a8   :  { %4854 = vmatprep.subr.bf16.mxu0 %v8466_v28  ;;  %4918 = vmatprep.subr.bf16.mxu1 %v8467_v13  ;;  %v3370_v13 = vld [vmem:[%s7692_s0 + $0x110] sm:$0xff] }
 0x5ab   :  { %4856 = vmatpush1.bf16.msra.mxu0 %v8468_v18  ;;  %4920 = vmatpush1.bf16.msra.mxu1 %v8469_v32  ;;  %v3369_v32 = vld [vmem:[%s7692_s0 + $0x108] sm:$0xff] }
 0x5ac   :  { %4922 = vmatprep.subr.bf16.mxu0 %v8470_v7  ;;  %4986 = vmatprep.subr.bf16.mxu1 %v8471_v12  ;;  %v3371_v12 = vld [vmem:[%s7692_s0 + $0x118] sm:$0xff] }
 0x601   :  { %v1775_v54 = vpop.f32.mrb[16].mxu0  ;;  %v1846_v27 = vpop.f32.mrb[16].mxu1 }
 0x602   :  { %v1777_v10 = vpop.f32.mrb[17].mxu0  ;;  %v1848_v38 = vpop.f32.mrb[17].mxu1  ;;  %v1993_v18 = vadd.f32 %v3368_v22, %v1775_v54  ;;  %v1995_v7 = vadd.f32 %v3370_v13, %v1846_v27 }
 0x603   :  { %v1994_v28 = vadd.f32 %v3369_v32, %v1777_v10  ;;  %v1996_v56 = vadd.f32 %v3371_v12, %v1848_v38  ;;  %v3372_v32 = vld [vmem:[%s7692_s0 + $0x120] sm:$0xff] }
 0x604   :  { %v3376_v21 = vmul.f32 -1.442695, %v1993_v18  ;;  %v3378_v33 = vmul.f32 -1.442695, %v1995_v7  ;;  %v3374_v7 = vld [vmem:[%s7692_s0 + $0x130] sm:$0xff] }
 0x605   :  { %v3377_v44 = vmul.f32 -1.442695, %v1994_v28  ;;  %v3379_v26 = vmul.f32 -1.442695, %v1996_v56 }
 0x606   :  { %5751 = vpow2.f32 %v3376_v21 }
 0x607   :  { %5753 = vpow2.f32 %v3378_v33 }
 0x608   :  { %5755 = vpow2.f32 %v3377_v44 }
 0x609   :  { %5757 = vpow2.f32 %v3379_v26  ;;  %v3373_v26 = vld [vmem:[%s7692_s0 + $0x128] sm:$0xff] }
 0x610   :  { %v5752_v51 = vpop.eup %5751 }
 0x611   :  { %v5754_v0 = vpop.eup %5753  ;;  %v2007_v54 = vadd.f32 1.0, %v5752_v51  ;;  %v3375_v51 = vld [vmem:[%s7692_s0 + $0x138] sm:$0xff] }
 0x612   :  { %v5756_v6 = vpop.eup %5755  ;;  %v2019_v22 = vadd.f32 1.0, %v5754_v0 }
 0x613   :  { %v5758_v61 = vpop.eup %5757  ;;  %v2008_v15 = vadd.f32 1.0, %v5756_v6  ;;  %5759 = vrcp.f32 %v2007_v54 }
 0x614   :  { %v2020_v31 = vadd.f32 1.0, %v5758_v61  ;;  %5761 = vrcp.f32 %v2019_v22 }
 0x615   :  { %5763 = vrcp.f32 %v2008_v15 }
 0x616   :  { %5765 = vrcp.f32 %v2020_v31 }
 0x61d   :  { %v5760_v28 = vpop.eup %5759 }
 0x61e   :  { %v5762_v13 = vpop.eup %5761 }
 0x61f   :  { %v5764_v18 = vpop.eup %5763  ;;  %v2039_v15 = vmul.f32 %v5762_v13, %v6940_v41  ;;  %v8475_v13 = vld [vmem:[#allocation116_spill] sm:$0xff] }
 0x620   :  { %v5766_v27 = vpop.eup %5765 }
 0x621   :  { %v2040_v31 = vmul.f32 %v5766_v27, %v6942_v60  ;;  %v8477_v27 = vld [vmem:[#allocation118_spill] sm:$0xff] }
 0x641   :  { %v1917_v6 = vpop.f32.mrb[18].mxu0  ;;  %v1988_v61 = vpop.f32.mrb[18].mxu1 }
 0x642   :  { %v1997_v0 = vadd.f32 %v3372_v32, %v1917_v6  ;;  %v1999_v44 = vadd.f32 %v3374_v7, %v1988_v61  ;;  %v1919_v33 = vpop.f32.mrb[19].mxu0  ;;  %v1990_v21 = vpop.f32.mrb[19].mxu1 }
 0x643   :  { %v1998_v12 = vadd.f32 %v3373_v26, %v1919_v33  ;;  %v2000_v10 = vadd.f32 %v3375_v51, %v1990_v21 }
 0x644   :  { %5767 = vtanh.f32 %v1997_v0  ;;  %v3380_v38 = vmul.f32 -1.442695, %v1999_v44 }
 0x645   :  { %5769 = vtanh.f32 %v1998_v12  ;;  %v3381_v56 = vmul.f32 -1.442695, %v2000_v10 }
 0x646   :  { %5771 = vpow2.f32 %v3380_v38  ;;  %v8472_v38 = vld [vmem:[#allocation113_spill] sm:$0xff] }
 0x647   :  { %5773 = vpow2.f32 %v3381_v56  ;;  %v8473_v56 = vld [vmem:[#allocation114_spill] sm:$0xff] }
 0x64e   :  { %v5768_v54 = vpop.eup %5767 }
 0x64f   :  { %v5770_v22 = vpop.eup %5769  ;;  %v2041_v32 = vmul.f32 %v5768_v54, %v5760_v28  ;;  %v8474_v28 = vld [vmem:[#allocation115_spill] sm:$0xff] }
 0x650   :  { %v5772_v7 = vpop.eup %5771  ;;  %v2042_v26 = vmul.f32 %v5770_v22, %v5764_v18  ;;  %v8476_v18 = vld [vmem:[#allocation117_spill] sm:$0xff]  ;;  %v8478_v54 = vld [vmem:[#allocation119_spill] sm:$0xff]  ;;  %v8479_v22 = vld [vmem:[#allocation120_spill] sm:$0xff] }
 0x651   :  { %v5774_v51 = vpop.eup %5773  ;;  %v7106_v6 = vadd.f32 %v2041_v32, %v2039_v15  ;;  %v2033_v61 = vadd.f32 1.0, %v5772_v7  ;;  %v8480_v15 = vld [vmem:[#allocation121_spill] sm:$0xff]  ;;  %v8481_v32 = vld [vmem:[#allocation122_spill] sm:$0xff]  ;;  %v8482_v7 = vld [vmem:[#allocation123_spill] sm:$0xff] }
 0x652   :  { %v7108_v0 = vadd.f32 %v2042_v26, %v2040_v31  ;;  %v2034_v44 = vadd.f32 1.0, %v5774_v51  ;;  %v8483_v31 = vld [vmem:[#allocation124_spill] sm:$0xff]  ;;  %v8484_v26 = vld [vmem:[#allocation125_spill] sm:$0xff]  ;;  %v8485_v51 = vld [vmem:[#allocation126_spill] sm:$0xff] }
 0x653   :  { %5775 = vtanh.f32 %v7106_v6 }
 0x654   :  { %5777 = vrcp.f32 %v2033_v61  ;;  %v8486_v61 = vld [vmem:[#allocation127_spill] sm:$0xff] }
 0x655   :  { %5779 = vtanh.f32 %v7108_v0 }
 0x656   :  { %5781 = vrcp.f32 %v2034_v44  ;;  %v8487_v44 = vld [vmem:[#allocation128_spill] sm:$0xff] }
 0x65d   :  { %v5776_v33 = vpop.eup %5775 }
 0x65e   :  { %v5778_v41 = vpop.eup %5777 }
 0x65f   :  { %v5780_v21 = vpop.eup %5779  ;;  %v7112_v60 = vmul.f32 %v5778_v41, %v5776_v33  ;;  %v8488_v33 = vld [vmem:[#allocation129_spill] sm:$0xff]  ;;  %v8489_v41 = vld [vmem:[#allocation130_spill] sm:$0xff] }
 0x660   :  { %v5782_v12 = vpop.eup %5781 }
 0x661   :  { %v2048_v10 = vmul.f32 %v5782_v12, %v5780_v21  ;;  %v8490_v21 = vld [vmem:[#allocation131_spill] sm:$0xff]  ;;  %v8491_v12 = vld [vmem:[#allocation132_spill] sm:$0xff] }
 0x663   :  { %2122 = vmatprep.mubr.f32.mxu0 %v2048_v10  ;;  %2193 = vmatprep.mubr.f32.mxu1 %v2048_v10 }
 0x664   :  { %2123 = vmatmul.mubr.f32.vlgmr.msra.gmra.mrb[20].mxu0 %v7112_v60  ;;  %2194 = vmatmul.mubr.f32.vlgmr.msra.gmra.mrb[20].mxu1 %v7112_v60 }
 0x665   :  { %4924 = vmatpush1.bf16.msra.mxu0 %v8122_v30  ;;  %4988 = vmatpush1.bf16.msra.mxu1 %v8123_v62 }
 0x666   :  { %2264 = vmatprep.mubr.f32.mxu0 %v2048_v10  ;;  %2335 = vmatprep.mubr.f32.mxu1 %v2048_v10  ;;  %v8492_v10 = vld [vmem:[#allocation133_spill] sm:$0xff] }
 0x667   :  { %4926 = vmatprep.subr.bf16.mxu0 %v8124_v58  ;;  %4990 = vmatprep.subr.bf16.mxu1 %v8125_v48 }
 0x669   :  { %4928 = vmatpush1.bf16.msra.mxu0 %v8126_v14  ;;  %4992 = vmatpush1.bf16.msra.mxu1 %v8127_v55 }
 0x66a   :  { %4930 = vmatprep.subr.bf16.mxu0 %v8128_v46  ;;  %4994 = vmatprep.subr.bf16.mxu1 %v8129_v47 }
 0x66d   :  { %4932 = vmatpush1.bf16.msra.mxu0 %v8208_v25  ;;  %4996 = vmatpush1.bf16.msra.mxu1 %v8209_v36 }
 0x66e   :  { %4934 = vmatprep.subr.bf16.mxu0 %v8210_v37  ;;  %4998 = vmatprep.subr.bf16.mxu1 %v8211_v43 }
 0x671   :  { %4936 = vmatpush1.bf16.msra.mxu0 %v8212_v50  ;;  %5000 = vmatpush1.bf16.msra.mxu1 %v8213_v29 }
 0x672   :  { %4938 = vmatprep.subr.bf16.mxu0 %v8214_v16  ;;  %5002 = vmatprep.subr.bf16.mxu1 %v8215_v34 }
 0x675   :  { %4940 = vmatpush1.bf16.msra.mxu0 %v8216_v39  ;;  %5004 = vmatpush1.bf16.msra.mxu1 %v8217_v2 }
 0x676   :  { %4942 = vmatprep.subr.bf16.mxu0 %v8296_v42  ;;  %5006 = vmatprep.subr.bf16.mxu1 %v8297_v49 }
 0x679   :  { %4944 = vmatpush1.bf16.msra.mxu0 %v8298_v5  ;;  %5008 = vmatpush1.bf16.msra.mxu1 %v8299_v24 }
 0x67a   :  { %4946 = vmatprep.subr.bf16.mxu0 %v8300_v45  ;;  %5010 = vmatprep.subr.bf16.mxu1 %v8301_v11 }
 0x67d   :  { %4948 = vmatpush1.bf16.msra.mxu0 %v8302_v4  ;;  %5012 = vmatpush1.bf16.msra.mxu1 %v8303_v17 }
 0x67e   :  { %4950 = vmatprep.subr.bf16.mxu0 %v8304_v59  ;;  %5014 = vmatprep.subr.bf16.mxu1 %v8305_v8 }
 0x681   :  { %4952 = vmatpush1.bf16.msra.mxu0 %v8228_v20  ;;  %5016 = vmatpush1.bf16.msra.mxu1 %v8306_v9 }
 0x682   :  { %4954 = vmatprep.subr.bf16.mxu0 %v8230_v35  ;;  %5018 = vmatprep.subr.bf16.mxu1 %v8231_v53 }
 0x685   :  { %4956 = vmatpush1.bf16.msra.mxu0 %v8232_v52  ;;  %5020 = vmatpush1.bf16.msra.mxu1 %v8233_v40 }
 0x686   :  { %4958 = vmatprep.subr.bf16.mxu0 %v8234_v57  ;;  %5022 = vmatprep.subr.bf16.mxu1 %v8235_v63 }
 0x689   :  { %4960 = vmatpush1.bf16.msra.mxu0 %v8236_v23  ;;  %5024 = vmatpush1.bf16.msra.mxu1 %v8237_v1 }
 0x68a   :  { %4962 = vmatprep.subr.bf16.mxu0 %v8238_v19  ;;  %5026 = vmatprep.subr.bf16.mxu1 %v8161_v3 }
 0x68d   :  { %4964 = vmatpush1.bf16.msra.mxu0 %v8472_v38  ;;  %5028 = vmatpush1.bf16.msra.mxu1 %v8473_v56 }
 0x68e   :  { %4966 = vmatprep.subr.bf16.mxu0 %v8474_v28  ;;  %5030 = vmatprep.subr.bf16.mxu1 %v8475_v13 }
 0x691   :  { %4968 = vmatpush1.bf16.msra.mxu0 %v8476_v18  ;;  %5032 = vmatpush1.bf16.msra.mxu1 %v8477_v27 }
 0x692   :  { %4970 = vmatprep.subr.bf16.mxu0 %v8478_v54  ;;  %5034 = vmatprep.subr.bf16.mxu1 %v8479_v22 }
 0x695   :  { %4972 = vmatpush1.bf16.msra.mxu0 %v8480_v15  ;;  %5036 = vmatpush1.bf16.msra.mxu1 %v8481_v32 }
 0x696   :  { %4974 = vmatprep.subr.bf16.mxu0 %v8482_v7  ;;  %5038 = vmatprep.subr.bf16.mxu1 %v8483_v31  ;;  %v8493_v7 = vld [vmem:[#allocation134_spill] sm:$0xff]  ;;  %v8494_v31 = vld [vmem:[#allocation7_spill] sm:$0xff] }
 0x699   :  { %4976 = vmatpush1.bf16.msra.mxu0 %v8484_v26  ;;  %5040 = vmatpush1.bf16.msra.mxu1 %v8485_v51  ;;  %v8495_v26 = vld [vmem:[#allocation8_spill] sm:$0xff] }
 0x69a   :  { %4978 = vmatprep.subr.bf16.mxu0 %v8486_v61  ;;  %5042 = vmatprep.subr.bf16.mxu1 %v8487_v44  ;;  %v8496_v44 = vld [vmem:[#allocation9_spill] sm:$0xff]  ;;  %v8505_v61 = vld [vmem:[#allocation18_spill] sm:$0xff] }
 0x69d   :  { %4980 = vmatpush1.bf16.msra.mxu0 %v8488_v33  ;;  %5044 = vmatpush1.bf16.msra.mxu1 %v8489_v41  ;;  %v8497_v33 = vld [vmem:[#allocation10_spill] sm:$0xff]  ;;  %v8498_v41 = vld [vmem:[#allocation11_spill] sm:$0xff] }
 0x69e   :  { %4982 = vmatprep.subr.bf16.mxu0 %v8490_v21  ;;  %5046 = vmatprep.subr.bf16.mxu1 %v8491_v12  ;;  %v8499_v21 = vld [vmem:[#allocation12_spill] sm:$0xff]  ;;  %v8500_v12 = vld [vmem:[#allocation13_spill] sm:$0xff] }
 0x6a1   :  { %4984 = vmatpush1.bf16.msra.mxu0 %v8492_v10  ;;  %5048 = vmatpush1.bf16.msra.mxu1 %v8493_v7  ;;  %v8501_v10 = vld [vmem:[#allocation14_spill] sm:$0xff]  ;;  %v8502_v7 = vld [vmem:[#allocation15_spill] sm:$0xff] }
 0x6a2   :  { %5050 = vmatprep.subr.bf16.mxu0 %v8494_v31  ;;  %5114 = vmatprep.subr.bf16.mxu1 %v8495_v26  ;;  %v8503_v31 = vld [vmem:[#allocation16_spill] sm:$0xff]  ;;  %v8504_v26 = vld [vmem:[#allocation17_spill] sm:$0xff] }
 0x6a4   :  { %2265 = vmatmul.mubr.f32.vlgmr.msra.gmra.mrb[22].mxu0 %v7112_v60  ;;  %2336 = vmatmul.mubr.f32.vlgmr.msra.gmra.mrb[22].mxu1 %v7112_v60  ;;  %v8506_v60 = vld [vmem:[#allocation19_spill] sm:$0xff] }
 0x6a5   :  { %5052 = vmatpush1.bf16.msra.mxu0 %v8496_v44  ;;  %5116 = vmatpush1.bf16.msra.mxu1 %v8497_v33  ;;  %v8507_v44 = vld [vmem:[#allocation20_spill] sm:$0xff]  ;;  %v8508_v33 = vld [vmem:[#allocation21_spill] sm:$0xff] }
 0x6a6   :  { %5054 = vmatprep.subr.bf16.mxu0 %v8498_v41  ;;  %5118 = vmatprep.subr.bf16.mxu1 %v8499_v21  ;;  %v8509_v41 = vld [vmem:[#allocation22_spill] sm:$0xff]  ;;  %v8510_v21 = vld [vmem:[#allocation23_spill] sm:$0xff] }
 0x6a9   :  { %5056 = vmatpush1.bf16.msra.mxu0 %v8500_v12  ;;  %5120 = vmatpush1.bf16.msra.mxu1 %v8501_v10  ;;  %v8511_v12 = vld [vmem:[#allocation24_spill] sm:$0xff]  ;;  %v8512_v10 = vld [vmem:[#allocation25_spill] sm:$0xff] }
 0x6aa   :  { %5058 = vmatprep.subr.bf16.mxu0 %v8502_v7  ;;  %5122 = vmatprep.subr.bf16.mxu1 %v8503_v31  ;;  %v8513_v7 = vld [vmem:[#allocation26_spill] sm:$0xff]  ;;  %v8514_v31 = vld [vmem:[#allocation27_spill] sm:$0xff] }
 0x6ad   :  { %5060 = vmatpush1.bf16.msra.mxu0 %v8504_v26  ;;  %5124 = vmatpush1.bf16.msra.mxu1 %v8505_v61  ;;  %v8515_v26 = vld [vmem:[#allocation28_spill] sm:$0xff]  ;;  %v8516_v61 = vld [vmem:[#allocation29_spill] sm:$0xff] }
 0x6ae   :  { %5062 = vmatprep.subr.bf16.mxu0 %v8506_v60  ;;  %5126 = vmatprep.subr.bf16.mxu1 %v8507_v44  ;;  %v8517_v60 = vld [vmem:[#allocation30_spill] sm:$0xff]  ;;  %v8518_v44 = vld [vmem:[#allocation31_spill] sm:$0xff] }
 0x6b1   :  { %5064 = vmatpush1.bf16.msra.mxu0 %v8508_v33  ;;  %5128 = vmatpush1.bf16.msra.mxu1 %v8509_v41  ;;  %v8519_v33 = vld [vmem:[#allocation32_spill] sm:$0xff]  ;;  %v8520_v41 = vld [vmem:[#allocation33_spill] sm:$0xff] }
 0x6b2   :  { %5066 = vmatprep.subr.bf16.mxu0 %v8510_v21  ;;  %5130 = vmatprep.subr.bf16.mxu1 %v8511_v12  ;;  %v8521_v21 = vld [vmem:[#allocation34_spill] sm:$0xff]  ;;  %v8522_v12 = vld [vmem:[#allocation35_spill] sm:$0xff] }
 0x6b5   :  { %5068 = vmatpush1.bf16.msra.mxu0 %v8512_v10  ;;  %5132 = vmatpush1.bf16.msra.mxu1 %v8513_v7  ;;  %v8523_v10 = vld [vmem:[#allocation36_spill] sm:$0xff]  ;;  %v8524_v7 = vld [vmem:[#allocation37_spill] sm:$0xff] }
 0x6b6   :  { %5070 = vmatprep.subr.bf16.mxu0 %v8514_v31  ;;  %5134 = vmatprep.subr.bf16.mxu1 %v8515_v26  ;;  %v8525_v31 = vld [vmem:[#allocation38_spill] sm:$0xff]  ;;  %v8526_v26 = vld [vmem:[#allocation39_spill] sm:$0xff] }
 0x6b9   :  { %5072 = vmatpush1.bf16.msra.mxu0 %v8516_v61  ;;  %5136 = vmatpush1.bf16.msra.mxu1 %v8517_v60  ;;  %v8527_v61 = vld [vmem:[#allocation40_spill] sm:$0xff]  ;;  %v8528_v60 = vld [vmem:[#allocation41_spill] sm:$0xff] }
 0x6ba   :  { %5074 = vmatprep.subr.bf16.mxu0 %v8518_v44  ;;  %5138 = vmatprep.subr.bf16.mxu1 %v8519_v33  ;;  %v8529_v44 = vld [vmem:[#allocation42_spill] sm:$0xff]  ;;  %v8530_v33 = vld [vmem:[#allocation43_spill] sm:$0xff] }
 0x6bd   :  { %5076 = vmatpush1.bf16.msra.mxu0 %v8520_v41  ;;  %5140 = vmatpush1.bf16.msra.mxu1 %v8521_v21  ;;  %v8531_v41 = vld [vmem:[#allocation44_spill] sm:$0xff]  ;;  %v8532_v21 = vld [vmem:[#allocation45_spill] sm:$0xff] }
 0x6be   :  { %5078 = vmatprep.subr.bf16.mxu0 %v8522_v12  ;;  %5142 = vmatprep.subr.bf16.mxu1 %v8523_v10  ;;  %v8533_v12 = vld [vmem:[#allocation46_spill] sm:$0xff]  ;;  %v8534_v10 = vld [vmem:[#allocation47_spill] sm:$0xff] }
 0x6c1   :  { %5080 = vmatpush1.bf16.msra.mxu0 %v8524_v7  ;;  %5144 = vmatpush1.bf16.msra.mxu1 %v8525_v31  ;;  %v8535_v7 = vld [vmem:[#allocation48_spill] sm:$0xff]  ;;  %v8536_v31 = vld [vmem:[#allocation49_spill] sm:$0xff] }
 0x6c2   :  { %5082 = vmatprep.subr.bf16.mxu0 %v8526_v26  ;;  %5146 = vmatprep.subr.bf16.mxu1 %v8527_v61  ;;  %v8537_v26 = vld [vmem:[#allocation50_spill] sm:$0xff]  ;;  %v8538_v61 = vld [vmem:[#allocation51_spill] sm:$0xff] }
 0x6c5   :  { %5084 = vmatpush1.bf16.msra.mxu0 %v8528_v60  ;;  %5148 = vmatpush1.bf16.msra.mxu1 %v8529_v44  ;;  %v8539_v60 = vld [vmem:[#allocation52_spill] sm:$0xff]  ;;  %v8540_v44 = vld [vmem:[#allocation53_spill] sm:$0xff] }
 0x6c6   :  { %5086 = vmatprep.subr.bf16.mxu0 %v8530_v33  ;;  %5150 = vmatprep.subr.bf16.mxu1 %v8531_v41  ;;  %v8541_v33 = vld [vmem:[#allocation54_spill] sm:$0xff]  ;;  %v8542_v41 = vld [vmem:[#allocation55_spill] sm:$0xff] }
 0x6c9   :  { %5088 = vmatpush1.bf16.msra.mxu0 %v8532_v21  ;;  %5152 = vmatpush1.bf16.msra.mxu1 %v8533_v12  ;;  %v8543_v21 = vld [vmem:[#allocation56_spill] sm:$0xff]  ;;  %v8544_v12 = vld [vmem:[#allocation57_spill] sm:$0xff] }
 0x6ca   :  { %5090 = vmatprep.subr.bf16.mxu0 %v8534_v10  ;;  %5154 = vmatprep.subr.bf16.mxu1 %v8535_v7  ;;  %v8545_v10 = vld [vmem:[#allocation58_spill] sm:$0xff]  ;;  %v8546_v7 = vld [vmem:[#allocation59_spill] sm:$0xff] }
 0x6cd   :  { %5092 = vmatpush1.bf16.msra.mxu0 %v8536_v31  ;;  %5156 = vmatpush1.bf16.msra.mxu1 %v8537_v26  ;;  %v8547_v31 = vld [vmem:[#allocation60_spill] sm:$0xff]  ;;  %v8548_v26 = vld [vmem:[#allocation61_spill] sm:$0xff] }
 0x6ce   :  { %5094 = vmatprep.subr.bf16.mxu0 %v8538_v61  ;;  %5158 = vmatprep.subr.bf16.mxu1 %v8539_v60  ;;  %v8549_v61 = vld [vmem:[#allocation62_spill] sm:$0xff]  ;;  %v8550_v60 = vld [vmem:[#allocation63_spill] sm:$0xff] }
 0x6d1   :  { %5096 = vmatpush1.bf16.msra.mxu0 %v8540_v44  ;;  %5160 = vmatpush1.bf16.msra.mxu1 %v8541_v33  ;;  %v8551_v44 = vld [vmem:[#allocation64_spill] sm:$0xff]  ;;  %v8552_v33 = vld [vmem:[#allocation65_spill] sm:$0xff] }
 0x6d2   :  { %5098 = vmatprep.subr.bf16.mxu0 %v8542_v41  ;;  %5162 = vmatprep.subr.bf16.mxu1 %v8543_v21  ;;  %v8553_v41 = vld [vmem:[#allocation66_spill] sm:$0xff]  ;;  %v8554_v21 = vld [vmem:[#allocation67_spill] sm:$0xff] }
 0x6d5   :  { %5100 = vmatpush1.bf16.msra.mxu0 %v8544_v12  ;;  %5164 = vmatpush1.bf16.msra.mxu1 %v8545_v10  ;;  %v8555_v12 = vld [vmem:[#allocation68_spill] sm:$0xff]  ;;  %v8556_v10 = vld [vmem:[#allocation69_spill] sm:$0xff] }
 0x6d6   :  { %5102 = vmatprep.subr.bf16.mxu0 %v8546_v7  ;;  %5166 = vmatprep.subr.bf16.mxu1 %v8547_v31  ;;  %v8557_v7 = vld [vmem:[#allocation70_spill] sm:$0xff]  ;;  %v8558_v31 = vld [vmem:[#allocation71_spill] sm:$0xff] }
 0x6d9   :  { %5104 = vmatpush1.bf16.msra.mxu0 %v8548_v26  ;;  %5168 = vmatpush1.bf16.msra.mxu1 %v8549_v61  ;;  %v8559_v26 = vld [vmem:[#allocation72_spill] sm:$0xff] }
 0x6da   :  { %5106 = vmatprep.subr.bf16.mxu0 %v8550_v60  ;;  %5170 = vmatprep.subr.bf16.mxu1 %v8551_v44 }
 0x6dd   :  { %5108 = vmatpush1.bf16.msra.mxu0 %v8552_v33  ;;  %5172 = vmatpush1.bf16.msra.mxu1 %v8553_v41  ;;  %v3382_v41 = vld [vmem:[%s7692_s0 + $0x140] sm:$0xff] }
 0x6de   :  { %5110 = vmatprep.subr.bf16.mxu0 %v8554_v21  ;;  %5174 = vmatprep.subr.bf16.mxu1 %v8555_v12  ;;  %v3384_v12 = vld [vmem:[%s7692_s0 + $0x150] sm:$0xff] }
 0x6e1   :  { %5112 = vmatpush1.bf16.msra.mxu0 %v8556_v10  ;;  %5176 = vmatpush1.bf16.msra.mxu1 %v8557_v7  ;;  %v3383_v7 = vld [vmem:[%s7692_s0 + $0x148] sm:$0xff] }
 0x6e2   :  { %5178 = vmatprep.subr.bf16.mxu0 %v8558_v31  ;;  %5242 = vmatprep.subr.bf16.mxu1 %v8559_v26  ;;  %v3385_v26 = vld [vmem:[%s7692_s0 + $0x158] sm:$0xff] }
 0x737   :  { %v2124_v61 = vpop.f32.mrb[20].mxu0  ;;  %v2195_v60 = vpop.f32.mrb[20].mxu1 }
 0x738   :  { %v2126_v51 = vpop.f32.mrb[21].mxu0  ;;  %v2197_v44 = vpop.f32.mrb[21].mxu1  ;;  %v2342_v10 = vadd.f32 %v3382_v41, %v2124_v61  ;;  %v2344_v31 = vadd.f32 %v3384_v12, %v2195_v60 }
 0x739   :  { %v2343_v21 = vadd.f32 %v3383_v7, %v2126_v51  ;;  %v2345_v33 = vadd.f32 %v3385_v26, %v2197_v44  ;;  %v3386_v7 = vld [vmem:[%s7692_s0 + $0x160] sm:$0xff] }
 0x73a   :  { %v3390_v32 = vmul.f32 -1.442695, %v2342_v10  ;;  %v3392_v15 = vmul.f32 -1.442695, %v2344_v31  ;;  %v3388_v31 = vld [vmem:[%s7692_s0 + $0x170] sm:$0xff] }
 0x73b   :  { %v3391_v22 = vmul.f32 -1.442695, %v2343_v21  ;;  %v3393_v54 = vmul.f32 -1.442695, %v2345_v33 }
 0x73c   :  { %5783 = vpow2.f32 %v3390_v32 }
 0x73d   :  { %5785 = vpow2.f32 %v3392_v15 }
 0x73e   :  { %5787 = vpow2.f32 %v3391_v22 }
 0x73f   :  { %5789 = vpow2.f32 %v3393_v54  ;;  %v3387_v54 = vld [vmem:[%s7692_s0 + $0x168] sm:$0xff] }
 0x746   :  { %v5784_v27 = vpop.eup %5783 }
 0x747   :  { %v5786_v18 = vpop.eup %5785  ;;  %v2356_v61 = vadd.f32 1.0, %v5784_v27  ;;  %v3389_v27 = vld [vmem:[%s7692_s0 + $0x178] sm:$0xff] }
 0x748   :  { %v5788_v13 = vpop.eup %5787  ;;  %v2368_v41 = vadd.f32 1.0, %v5786_v18 }
 0x749   :  { %v5790_v28 = vpop.eup %5789  ;;  %v2357_v56 = vadd.f32 1.0, %v5788_v13  ;;  %5791 = vrcp.f32 %v2356_v61 }
 0x74a   :  { %v2369_v38 = vadd.f32 1.0, %v5790_v28  ;;  %5793 = vrcp.f32 %v2368_v41 }
 0x74b   :  { %5795 = vrcp.f32 %v2357_v56 }
 0x74c   :  { %5797 = vrcp.f32 %v2369_v38 }
 0x753   :  { %v5792_v21 = vpop.eup %5791 }
 0x754   :  { %v5794_v12 = vpop.eup %5793 }
 0x755   :  { %v5796_v10 = vpop.eup %5795  ;;  %v2388_v56 = vmul.f32 %v5794_v12, %v7106_v6  ;;  %v8563_v12 = vld [vmem:[#allocation116_spill] sm:$0xff] }
 0x756   :  { %v5798_v60 = vpop.eup %5797 }
 0x757   :  { %v2389_v38 = vmul.f32 %v5798_v60, %v7108_v0  ;;  %v8565_v60 = vld [vmem:[#allocation118_spill] sm:$0xff] }
 0x777   :  { %v2266_v13 = vpop.f32.mrb[22].mxu0  ;;  %v2337_v28 = vpop.f32.mrb[22].mxu1 }
 0x778   :  { %v2346_v18 = vadd.f32 %v3386_v7, %v2266_v13  ;;  %v2348_v22 = vadd.f32 %v3388_v31, %v2337_v28  ;;  %v2268_v15 = vpop.f32.mrb[23].mxu0  ;;  %v2339_v32 = vpop.f32.mrb[23].mxu1 }
 0x779   :  { %v2347_v26 = vadd.f32 %v3387_v54, %v2268_v15  ;;  %v2349_v51 = vadd.f32 %v3389_v27, %v2339_v32 }
 0x77a   :  { %5799 = vtanh.f32 %v2346_v18  ;;  %v3394_v44 = vmul.f32 -1.442695, %v2348_v22 }
 0x77b   :  { %5801 = vtanh.f32 %v2347_v26  ;;  %v3395_v33 = vmul.f32 -1.442695, %v2349_v51 }
 0x77c   :  { %5803 = vpow2.f32 %v3394_v44  ;;  %v8560_v44 = vld [vmem:[#allocation113_spill] sm:$0xff] }
 0x77d   :  { %5805 = vpow2.f32 %v3395_v33  ;;  %v8561_v33 = vld [vmem:[#allocation114_spill] sm:$0xff] }
 0x784   :  { %v5800_v61 = vpop.eup %5799 }
 0x785   :  { %v5802_v41 = vpop.eup %5801  ;;  %v2390_v7 = vmul.f32 %v5800_v61, %v5792_v21  ;;  %v8562_v21 = vld [vmem:[#allocation115_spill] sm:$0xff] }
 0x786   :  { %v5804_v31 = vpop.eup %5803  ;;  %v2391_v54 = vmul.f32 %v5802_v41, %v5796_v10  ;;  %v8564_v10 = vld [vmem:[#allocation117_spill] sm:$0xff]  ;;  %v8566_v61 = vld [vmem:[#allocation119_spill] sm:$0xff]  ;;  %v8567_v41 = vld [vmem:[#allocation120_spill] sm:$0xff] }
 0x787   :  { %v5806_v27 = vpop.eup %5805  ;;  %v7272_v13 = vadd.f32 %v2390_v7, %v2388_v56  ;;  %v2382_v28 = vadd.f32 1.0, %v5804_v31  ;;  %v8568_v56 = vld [vmem:[#allocation121_spill] sm:$0xff]  ;;  %v8569_v7 = vld [vmem:[#allocation122_spill] sm:$0xff]  ;;  %v8570_v31 = vld [vmem:[#allocation123_spill] sm:$0xff] }
 0x788   :  { %v7274_v18 = vadd.f32 %v2391_v54, %v2389_v38  ;;  %v2383_v22 = vadd.f32 1.0, %v5806_v27  ;;  %v8571_v38 = vld [vmem:[#allocation124_spill] sm:$0xff]  ;;  %v8572_v54 = vld [vmem:[#allocation125_spill] sm:$0xff]  ;;  %v8573_v27 = vld [vmem:[#allocation126_spill] sm:$0xff] }
 0x789   :  { %5807 = vtanh.f32 %v7272_v13 }
 0x78a   :  { %5809 = vrcp.f32 %v2382_v28  ;;  %v8574_v28 = vld [vmem:[#allocation127_spill] sm:$0xff] }
 0x78b   :  { %5811 = vtanh.f32 %v7274_v18 }
 0x78c   :  { %5813 = vrcp.f32 %v2383_v22  ;;  %v8575_v22 = vld [vmem:[#allocation128_spill] sm:$0xff] }
 0x793   :  { %v5808_v15 = vpop.eup %5807 }
 0x794   :  { %v5810_v6 = vpop.eup %5809 }
 0x795   :  { %v5812_v32 = vpop.eup %5811  ;;  %v7278_v0 = vmul.f32 %v5810_v6, %v5808_v15  ;;  %v8576_v15 = vld [vmem:[#allocation129_spill] sm:$0xff]  ;;  %v8577_v6 = vld [vmem:[#allocation130_spill] sm:$0xff] }
 0x796   :  { %v5814_v26 = vpop.eup %5813 }
 0x797   :  { %v2397_v51 = vmul.f32 %v5814_v26, %v5812_v32  ;;  %v8578_v32 = vld [vmem:[#allocation131_spill] sm:$0xff]  ;;  %v8579_v26 = vld [vmem:[#allocation132_spill] sm:$0xff] }
 0x799   :  { %2471 = vmatprep.mubr.f32.mxu0 %v2397_v51  ;;  %2542 = vmatprep.mubr.f32.mxu1 %v2397_v51 }
 0x79a   :  { %2472 = vmatmul.mubr.f32.vlgmr.msra.gmra.mrb[24].mxu0 %v7278_v0  ;;  %2543 = vmatmul.mubr.f32.vlgmr.msra.gmra.mrb[24].mxu1 %v7278_v0 }
 0x79b   :  { %5180 = vmatpush1.bf16.msra.mxu0 %v8122_v30  ;;  %5244 = vmatpush1.bf16.msra.mxu1 %v8123_v62 }
 0x79c   :  { %2613 = vmatprep.mubr.f32.mxu0 %v2397_v51  ;;  %2684 = vmatprep.mubr.f32.mxu1 %v2397_v51  ;;  %v8580_v51 = vld [vmem:[#allocation133_spill] sm:$0xff] }
 0x79d   :  { %5182 = vmatprep.subr.bf16.mxu0 %v8124_v58  ;;  %5246 = vmatprep.subr.bf16.mxu1 %v8125_v48 }
 0x79f   :  { %5184 = vmatpush1.bf16.msra.mxu0 %v8126_v14  ;;  %5248 = vmatpush1.bf16.msra.mxu1 %v8127_v55 }
 0x7a0   :  { %5186 = vmatprep.subr.bf16.mxu0 %v8128_v46  ;;  %5250 = vmatprep.subr.bf16.mxu1 %v8129_v47 }
 0x7a3   :  { %5188 = vmatpush1.bf16.msra.mxu0 %v8208_v25  ;;  %5252 = vmatpush1.bf16.msra.mxu1 %v8209_v36 }
 0x7a4   :  { %5190 = vmatprep.subr.bf16.mxu0 %v8210_v37  ;;  %5254 = vmatprep.subr.bf16.mxu1 %v8211_v43 }
 0x7a7   :  { %5192 = vmatpush1.bf16.msra.mxu0 %v8212_v50  ;;  %5256 = vmatpush1.bf16.msra.mxu1 %v8213_v29 }
 0x7a8   :  { %5194 = vmatprep.subr.bf16.mxu0 %v8214_v16  ;;  %5258 = vmatprep.subr.bf16.mxu1 %v8215_v34 }
 0x7ab   :  { %5196 = vmatpush1.bf16.msra.mxu0 %v8216_v39  ;;  %5260 = vmatpush1.bf16.msra.mxu1 %v8217_v2 }
 0x7ac   :  { %5198 = vmatprep.subr.bf16.mxu0 %v8296_v42  ;;  %5262 = vmatprep.subr.bf16.mxu1 %v8297_v49 }
 0x7af   :  { %5200 = vmatpush1.bf16.msra.mxu0 %v8298_v5  ;;  %5264 = vmatpush1.bf16.msra.mxu1 %v8299_v24 }
 0x7b0   :  { %5202 = vmatprep.subr.bf16.mxu0 %v8300_v45  ;;  %5266 = vmatprep.subr.bf16.mxu1 %v8301_v11 }
 0x7b3   :  { %5204 = vmatpush1.bf16.msra.mxu0 %v8302_v4  ;;  %5268 = vmatpush1.bf16.msra.mxu1 %v8303_v17 }
 0x7b4   :  { %5206 = vmatprep.subr.bf16.mxu0 %v8304_v59  ;;  %5270 = vmatprep.subr.bf16.mxu1 %v8305_v8 }
 0x7b7   :  { %5208 = vmatpush1.bf16.msra.mxu0 %v8228_v20  ;;  %5272 = vmatpush1.bf16.msra.mxu1 %v8306_v9 }
 0x7b8   :  { %5210 = vmatprep.subr.bf16.mxu0 %v8230_v35  ;;  %5274 = vmatprep.subr.bf16.mxu1 %v8231_v53 }
 0x7bb   :  { %5212 = vmatpush1.bf16.msra.mxu0 %v8232_v52  ;;  %5276 = vmatpush1.bf16.msra.mxu1 %v8233_v40 }
 0x7bc   :  { %5214 = vmatprep.subr.bf16.mxu0 %v8234_v57  ;;  %5278 = vmatprep.subr.bf16.mxu1 %v8235_v63 }
 0x7bf   :  { %5216 = vmatpush1.bf16.msra.mxu0 %v8236_v23  ;;  %5280 = vmatpush1.bf16.msra.mxu1 %v8237_v1 }
 0x7c0   :  { %5218 = vmatprep.subr.bf16.mxu0 %v8238_v19  ;;  %5282 = vmatprep.subr.bf16.mxu1 %v8161_v3 }
 0x7c3   :  { %5220 = vmatpush1.bf16.msra.mxu0 %v8560_v44  ;;  %5284 = vmatpush1.bf16.msra.mxu1 %v8561_v33 }
 0x7c4   :  { %5222 = vmatprep.subr.bf16.mxu0 %v8562_v21  ;;  %5286 = vmatprep.subr.bf16.mxu1 %v8563_v12 }
 0x7c7   :  { %5224 = vmatpush1.bf16.msra.mxu0 %v8564_v10  ;;  %5288 = vmatpush1.bf16.msra.mxu1 %v8565_v60 }
 0x7c8   :  { %5226 = vmatprep.subr.bf16.mxu0 %v8566_v61  ;;  %5290 = vmatprep.subr.bf16.mxu1 %v8567_v41 }
 0x7cb   :  { %5228 = vmatpush1.bf16.msra.mxu0 %v8568_v56  ;;  %5292 = vmatpush1.bf16.msra.mxu1 %v8569_v7 }
 0x7cc   :  { %5230 = vmatprep.subr.bf16.mxu0 %v8570_v31  ;;  %5294 = vmatprep.subr.bf16.mxu1 %v8571_v38  ;;  %v8581_v31 = vld [vmem:[#allocation134_spill] sm:$0xff]  ;;  %v8582_v38 = vld [vmem:[#allocation7_spill] sm:$0xff] }
 0x7cf   :  { %5232 = vmatpush1.bf16.msra.mxu0 %v8572_v54  ;;  %5296 = vmatpush1.bf16.msra.mxu1 %v8573_v27  ;;  %v8583_v54 = vld [vmem:[#allocation8_spill] sm:$0xff] }
 0x7d0   :  { %5234 = vmatprep.subr.bf16.mxu0 %v8574_v28  ;;  %5298 = vmatprep.subr.bf16.mxu1 %v8575_v22  ;;  %v8584_v22 = vld [vmem:[#allocation9_spill] sm:$0xff]  ;;  %v8593_v28 = vld [vmem:[#allocation18_spill] sm:$0xff] }
 0x7d3   :  { %5236 = vmatpush1.bf16.msra.mxu0 %v8576_v15  ;;  %5300 = vmatpush1.bf16.msra.mxu1 %v8577_v6  ;;  %v8585_v15 = vld [vmem:[#allocation10_spill] sm:$0xff]  ;;  %v8586_v6 = vld [vmem:[#allocation11_spill] sm:$0xff] }
 0x7d4   :  { %5238 = vmatprep.subr.bf16.mxu0 %v8578_v32  ;;  %5302 = vmatprep.subr.bf16.mxu1 %v8579_v26  ;;  %v8587_v32 = vld [vmem:[#allocation12_spill] sm:$0xff]  ;;  %v8588_v26 = vld [vmem:[#allocation13_spill] sm:$0xff] }
 0x7d7   :  { %5240 = vmatpush1.bf16.msra.mxu0 %v8580_v51  ;;  %5304 = vmatpush1.bf16.msra.mxu1 %v8581_v31  ;;  %v8589_v51 = vld [vmem:[#allocation14_spill] sm:$0xff]  ;;  %v8590_v31 = vld [vmem:[#allocation15_spill] sm:$0xff] }
 0x7d8   :  { %5306 = vmatprep.subr.bf16.mxu0 %v8582_v38  ;;  %5370 = vmatprep.subr.bf16.mxu1 %v8583_v54  ;;  %v8591_v38 = vld [vmem:[#allocation16_spill] sm:$0xff]  ;;  %v8592_v54 = vld [vmem:[#allocation17_spill] sm:$0xff] }
 0x7da   :  { %2614 = vmatmul.mubr.f32.vlgmr.msra.gmra.mrb[26].mxu0 %v7278_v0  ;;  %2685 = vmatmul.mubr.f32.vlgmr.msra.gmra.mrb[26].mxu1 %v7278_v0  ;;  %v8594_v0 = vld [vmem:[#allocation19_spill] sm:$0xff] }
 0x7db   :  { %5308 = vmatpush1.bf16.msra.mxu0 %v8584_v22  ;;  %5372 = vmatpush1.bf16.msra.mxu1 %v8585_v15  ;;  %v8595_v22 = vld [vmem:[#allocation20_spill] sm:$0xff]  ;;  %v8596_v15 = vld [vmem:[#allocation21_spill] sm:$0xff] }
 0x7dc   :  { %5310 = vmatprep.subr.bf16.mxu0 %v8586_v6  ;;  %5374 = vmatprep.subr.bf16.mxu1 %v8587_v32  ;;  %v8597_v6 = vld [vmem:[#allocation22_spill] sm:$0xff]  ;;  %v8598_v32 = vld [vmem:[#allocation23_spill] sm:$0xff] }
 0x7df   :  { %5312 = vmatpush1.bf16.msra.mxu0 %v8588_v26  ;;  %5376 = vmatpush1.bf16.msra.mxu1 %v8589_v51  ;;  %v8599_v26 = vld [vmem:[#allocation24_spill] sm:$0xff]  ;;  %v8600_v51 = vld [vmem:[#allocation25_spill] sm:$0xff] }
 0x7e0   :  { %5314 = vmatprep.subr.bf16.mxu0 %v8590_v31  ;;  %5378 = vmatprep.subr.bf16.mxu1 %v8591_v38  ;;  %v8601_v31 = vld [vmem:[#allocation26_spill] sm:$0xff]  ;;  %v8602_v38 = vld [vmem:[#allocation27_spill] sm:$0xff] }
 0x7e3   :  { %5316 = vmatpush1.bf16.msra.mxu0 %v8592_v54  ;;  %5380 = vmatpush1.bf16.msra.mxu1 %v8593_v28  ;;  %v8603_v54 = vld [vmem:[#allocation28_spill] sm:$0xff]  ;;  %v8604_v28 = vld [vmem:[#allocation29_spill] sm:$0xff] }
 0x7e4   :  { %5318 = vmatprep.subr.bf16.mxu0 %v8594_v0  ;;  %5382 = vmatprep.subr.bf16.mxu1 %v8595_v22  ;;  %v8605_v0 = vld [vmem:[#allocation30_spill] sm:$0xff]  ;;  %v8606_v22 = vld [vmem:[#allocation31_spill] sm:$0xff] }
 0x7e7   :  { %5320 = vmatpush1.bf16.msra.mxu0 %v8596_v15  ;;  %5384 = vmatpush1.bf16.msra.mxu1 %v8597_v6  ;;  %v8607_v15 = vld [vmem:[#allocation32_spill] sm:$0xff]  ;;  %v8608_v6 = vld [vmem:[#allocation33_spill] sm:$0xff] }
 0x7e8   :  { %5322 = vmatprep.subr.bf16.mxu0 %v8598_v32  ;;  %5386 = vmatprep.subr.bf16.mxu1 %v8599_v26  ;;  %v8609_v32 = vld [vmem:[#allocation34_spill] sm:$0xff]  ;;  %v8610_v26 = vld [vmem:[#allocation35_spill] sm:$0xff] }
 0x7eb   :  { %5324 = vmatpush1.bf16.msra.mxu0 %v8600_v51  ;;  %5388 = vmatpush1.bf16.msra.mxu1 %v8601_v31  ;;  %v8611_v51 = vld [vmem:[#allocation36_spill] sm:$0xff]  ;;  %v8612_v31 = vld [vmem:[#allocation37_spill] sm:$0xff] }
 0x7ec   :  { %5326 = vmatprep.subr.bf16.mxu0 %v8602_v38  ;;  %5390 = vmatprep.subr.bf16.mxu1 %v8603_v54  ;;  %v8613_v38 = vld [vmem:[#allocation38_spill] sm:$0xff]  ;;  %v8614_v54 = vld [vmem:[#allocation39_spill] sm:$0xff] }
 0x7ef   :  { %5328 = vmatpush1.bf16.msra.mxu0 %v8604_v28  ;;  %5392 = vmatpush1.bf16.msra.mxu1 %v8605_v0  ;;  %v8615_v28 = vld [vmem:[#allocation40_spill] sm:$0xff]  ;;  %v8616_v0 = vld [vmem:[#allocation41_spill] sm:$0xff] }
 0x7f0   :  { %5330 = vmatprep.subr.bf16.mxu0 %v8606_v22  ;;  %5394 = vmatprep.subr.bf16.mxu1 %v8607_v15  ;;  %v8617_v22 = vld [vmem:[#allocation42_spill] sm:$0xff]  ;;  %v8618_v15 = vld [vmem:[#allocation43_spill] sm:$0xff] }
 0x7f3   :  { %5332 = vmatpush1.bf16.msra.mxu0 %v8608_v6  ;;  %5396 = vmatpush1.bf16.msra.mxu1 %v8609_v32  ;;  %v8619_v6 = vld [vmem:[#allocation44_spill] sm:$0xff]  ;;  %v8620_v32 = vld [vmem:[#allocation45_spill] sm:$0xff] }
 0x7f4   :  { %5334 = vmatprep.subr.bf16.mxu0 %v8610_v26  ;;  %5398 = vmatprep.subr.bf16.mxu1 %v8611_v51  ;;  %v8621_v26 = vld [vmem:[#allocation46_spill] sm:$0xff]  ;;  %v8622_v51 = vld [vmem:[#allocation47_spill] sm:$0xff] }
 0x7f7   :  { %5336 = vmatpush1.bf16.msra.mxu0 %v8612_v31  ;;  %5400 = vmatpush1.bf16.msra.mxu1 %v8613_v38  ;;  %v8623_v31 = vld [vmem:[#allocation48_spill] sm:$0xff]  ;;  %v8624_v38 = vld [vmem:[#allocation49_spill] sm:$0xff] }
 0x7f8   :  { %5338 = vmatprep.subr.bf16.mxu0 %v8614_v54  ;;  %5402 = vmatprep.subr.bf16.mxu1 %v8615_v28  ;;  %v8625_v54 = vld [vmem:[#allocation50_spill] sm:$0xff]  ;;  %v8626_v28 = vld [vmem:[#allocation51_spill] sm:$0xff] }
 0x7fb   :  { %5340 = vmatpush1.bf16.msra.mxu0 %v8616_v0  ;;  %5404 = vmatpush1.bf16.msra.mxu1 %v8617_v22  ;;  %v8627_v0 = vld [vmem:[#allocation52_spill] sm:$0xff]  ;;  %v8628_v22 = vld [vmem:[#allocation53_spill] sm:$0xff] }
 0x7fc   :  { %5342 = vmatprep.subr.bf16.mxu0 %v8618_v15  ;;  %5406 = vmatprep.subr.bf16.mxu1 %v8619_v6  ;;  %v8629_v15 = vld [vmem:[#allocation54_spill] sm:$0xff]  ;;  %v8630_v6 = vld [vmem:[#allocation55_spill] sm:$0xff] }
 0x7ff   :  { %5344 = vmatpush1.bf16.msra.mxu0 %v8620_v32  ;;  %5408 = vmatpush1.bf16.msra.mxu1 %v8621_v26  ;;  %v8631_v32 = vld [vmem:[#allocation56_spill] sm:$0xff]  ;;  %v8632_v26 = vld [vmem:[#allocation57_spill] sm:$0xff] }
 0x800   :  { %5346 = vmatprep.subr.bf16.mxu0 %v8622_v51  ;;  %5410 = vmatprep.subr.bf16.mxu1 %v8623_v31  ;;  %v8633_v51 = vld [vmem:[#allocation58_spill] sm:$0xff]  ;;  %v8634_v31 = vld [vmem:[#allocation59_spill] sm:$0xff] }
 0x803   :  { %5348 = vmatpush1.bf16.msra.mxu0 %v8624_v38  ;;  %5412 = vmatpush1.bf16.msra.mxu1 %v8625_v54  ;;  %v8635_v38 = vld [vmem:[#allocation60_spill] sm:$0xff]  ;;  %v8636_v54 = vld [vmem:[#allocation61_spill] sm:$0xff] }
 0x804   :  { %5350 = vmatprep.subr.bf16.mxu0 %v8626_v28  ;;  %5414 = vmatprep.subr.bf16.mxu1 %v8627_v0  ;;  %v8637_v28 = vld [vmem:[#allocation62_spill] sm:$0xff]  ;;  %v8638_v0 = vld [vmem:[#allocation63_spill] sm:$0xff] }
 0x807   :  { %5352 = vmatpush1.bf16.msra.mxu0 %v8628_v22  ;;  %5416 = vmatpush1.bf16.msra.mxu1 %v8629_v15  ;;  %v8639_v22 = vld [vmem:[#allocation64_spill] sm:$0xff]  ;;  %v8640_v15 = vld [vmem:[#allocation65_spill] sm:$0xff] }
 0x808   :  { %5354 = vmatprep.subr.bf16.mxu0 %v8630_v6  ;;  %5418 = vmatprep.subr.bf16.mxu1 %v8631_v32  ;;  %v8641_v6 = vld [vmem:[#allocation66_spill] sm:$0xff]  ;;  %v8642_v32 = vld [vmem:[#allocation67_spill] sm:$0xff] }
 0x80b   :  { %5356 = vmatpush1.bf16.msra.mxu0 %v8632_v26  ;;  %5420 = vmatpush1.bf16.msra.mxu1 %v8633_v51  ;;  %v8643_v26 = vld [vmem:[#allocation68_spill] sm:$0xff]  ;;  %v8644_v51 = vld [vmem:[#allocation69_spill] sm:$0xff] }
 0x80c   :  { %5358 = vmatprep.subr.bf16.mxu0 %v8634_v31  ;;  %5422 = vmatprep.subr.bf16.mxu1 %v8635_v38  ;;  %v8645_v31 = vld [vmem:[#allocation70_spill] sm:$0xff]  ;;  %v8646_v38 = vld [vmem:[#allocation71_spill] sm:$0xff] }
 0x80f   :  { %5360 = vmatpush1.bf16.msra.mxu0 %v8636_v54  ;;  %5424 = vmatpush1.bf16.msra.mxu1 %v8637_v28  ;;  %v8647_v54 = vld [vmem:[#allocation72_spill] sm:$0xff] }
 0x810   :  { %5362 = vmatprep.subr.bf16.mxu0 %v8638_v0  ;;  %5426 = vmatprep.subr.bf16.mxu1 %v8639_v22 }
 0x813   :  { %5364 = vmatpush1.bf16.msra.mxu0 %v8640_v15  ;;  %5428 = vmatpush1.bf16.msra.mxu1 %v8641_v6  ;;  %v3396_v15 = vld [vmem:[%s7692_s0 + $0x180] sm:$0xff]  ;;  %v3398_v6 = vld [vmem:[%s7692_s0 + $0x190] sm:$0xff] }
 0x814   :  { %5366 = vmatprep.subr.bf16.mxu0 %v8642_v32  ;;  %5430 = vmatprep.subr.bf16.mxu1 %v8643_v26  ;;  %v3397_v32 = vld [vmem:[%s7692_s0 + $0x188] sm:$0xff] }
 0x817   :  { %5368 = vmatpush1.bf16.msra.mxu0 %v8644_v51  ;;  %5432 = vmatpush1.bf16.msra.mxu1 %v8645_v31  ;;  %v3399_v51 = vld [vmem:[%s7692_s0 + $0x198] sm:$0xff] }
 0x818   :  { %5434 = vmatprep.subr.bf16.mxu0 %v8646_v38  ;;  %5498 = vmatprep.subr.bf16.mxu1 %v8647_v54 }
 0x86d   :  { %v2473_v28 = vpop.f32.mrb[24].mxu0  ;;  %v2544_v0 = vpop.f32.mrb[24].mxu1 }
 0x86e   :  { %v2475_v27 = vpop.f32.mrb[25].mxu0  ;;  %v2546_v22 = vpop.f32.mrb[25].mxu1  ;;  %v2691_v26 = vadd.f32 %v3396_v15, %v2473_v28  ;;  %v2693_v31 = vadd.f32 %v3398_v6, %v2544_v0  ;;  %v3402_v0 = vld [vmem:[%s7692_s0 + $0x1b0] sm:$0xff] }
 0x86f   :  { %v2692_v38 = vadd.f32 %v3397_v32, %v2475_v27  ;;  %v2694_v54 = vadd.f32 %v3399_v51, %v2546_v22  ;;  %v3400_v27 = vld [vmem:[%s7692_s0 + $0x1a0] sm:$0xff] }
 0x870   :  { %v3404_v7 = vmul.f32 -1.442695, %v2691_v26  ;;  %v3406_v56 = vmul.f32 -1.442695, %v2693_v31 }
 0x871   :  { %v3405_v41 = vmul.f32 -1.442695, %v2692_v38  ;;  %v3407_v61 = vmul.f32 -1.442695, %v2694_v54 }
 0x872   :  { %5815 = vpow2.f32 %v3404_v7 }
 0x873   :  { %5817 = vpow2.f32 %v3406_v56 }
 0x874   :  { %5819 = vpow2.f32 %v3405_v41 }
 0x875   :  { %5821 = vpow2.f32 %v3407_v61  ;;  %v3401_v61 = vld [vmem:[%s7692_s0 + $0x1a8] sm:$0xff] }
 0x87c   :  { %v5816_v60 = vpop.eup %5815 }
 0x87d   :  { %v5818_v10 = vpop.eup %5817  ;;  %v2705_v28 = vadd.f32 1.0, %v5816_v60  ;;  %v3403_v60 = vld [vmem:[%s7692_s0 + $0x1b8] sm:$0xff] }
 0x87e   :  { %v5820_v12 = vpop.eup %5819  ;;  %v2717_v15 = vadd.f32 1.0, %v5818_v10 }
 0x87f   :  { %v5822_v21 = vpop.eup %5821  ;;  %v2706_v33 = vadd.f32 1.0, %v5820_v12  ;;  %5823 = vrcp.f32 %v2705_v28 }
 0x880   :  { %v2718_v44 = vadd.f32 1.0, %v5822_v21  ;;  %5825 = vrcp.f32 %v2717_v15 }
 0x881   :  { %5827 = vrcp.f32 %v2706_v33 }
 0x882   :  { %5829 = vrcp.f32 %v2718_v44 }
 0x889   :  { %v5824_v51 = vpop.eup %5823 }
 0x88a   :  { %v5826_v31 = vpop.eup %5825 }
 0x88b   :  { %v5828_v38 = vpop.eup %5827  ;;  %v2737_v33 = vmul.f32 %v5826_v31, %v7272_v13  ;;  %v3109_v31 = vld [vmem:[%s7694_s2 + $0x30] sm:$0xff] }
 0x88c   :  { %v5830_v54 = vpop.eup %5829 }
 0x88d   :  { %v2738_v44 = vmul.f32 %v5830_v54, %v7274_v18 }
 0x8ad   :  { %v2615_v12 = vpop.f32.mrb[26].mxu0  ;;  %v2686_v21 = vpop.f32.mrb[26].mxu1 }
 0x8ae   :  { %v2695_v10 = vadd.f32 %v3400_v27, %v2615_v12  ;;  %v2697_v41 = vadd.f32 %v3402_v0, %v2686_v21  ;;  %v2617_v56 = vpop.f32.mrb[27].mxu0  ;;  %v2688_v7 = vpop.f32.mrb[27].mxu1 }
 0x8af   :  { %v2696_v22 = vadd.f32 %v3401_v61, %v2617_v56  ;;  %v2698_v6 = vadd.f32 %v3403_v60, %v2688_v7 }
 0x8b0   :  { %5831 = vtanh.f32 %v2695_v10  ;;  %v3408_v32 = vmul.f32 -1.442695, %v2697_v41 }
 0x8b1   :  { %5833 = vtanh.f32 %v2696_v22  ;;  %v3409_v26 = vmul.f32 -1.442695, %v2698_v6 }
 0x8b2   :  { %5835 = vpow2.f32 %v3408_v32  ;;  %v3125_v32 = vld [vmem:[%s7694_s2 + $0xb0] sm:$0xff] }
 0x8b3   :  { %5837 = vpow2.f32 %v3409_v26  ;;  %v3126_v26 = vld [vmem:[%s7694_s2 + $0xb8] sm:$0xff] }
 0x8ba   :  { %v5832_v28 = vpop.eup %5831 }
 0x8bb   :  { %v5834_v15 = vpop.eup %5833  ;;  %v2739_v27 = vmul.f32 %v5832_v28, %v5824_v51  ;;  %v5573_v51 = vpack.c.bf16 %v3126_v26, %v3125_v32  ;;  %v3127_v28 = vld [vmem:[%s7694_s2 + $0xc0] sm:$0xff] }
 0x8bc   :  { %v5836_v0 = vpop.eup %5835  ;;  %v2740_v61 = vmul.f32 %v5834_v15, %v5828_v38  ;;  %v3110_v38 = vld [vmem:[%s7694_s2 + $0x38] sm:$0xff]  ;;  %v3128_v15 = vld [vmem:[%s7694_s2 + $0xc8] sm:$0xff] }
 0x8bd   :  { %v5838_v60 = vpop.eup %5837  ;;  %v7438_v12 = vadd.f32 %v2739_v27, %v2737_v33  ;;  %v2731_v21 = vadd.f32 1.0, %v5836_v0  ;;  %v5575_v54 = vpack.c.bf16 %v3110_v38, %v3109_v31  ;;  %v5577_v33 = vpack.c.bf16 %v3128_v15, %v3127_v28  ;;  %v3111_v27 = vld [vmem:[%s7694_s2 + $0x40] sm:$0xff]  ;;  %v3112_v0 = vld [vmem:[%s7694_s2 + $0x48] sm:$0xff] }
 0x8be   :  { %v7440_v10 = vadd.f32 %v2740_v61, %v2738_v44  ;;  %v2732_v41 = vadd.f32 1.0, %v5838_v60  ;;  %v5579_v44 = vpack.c.bf16 %v3112_v0, %v3111_v27  ;;  %v3129_v61 = vld [vmem:[%s7694_s2 + $0xd0] sm:$0xff]  ;;  %v3130_v60 = vld [vmem:[%s7694_s2 + $0xd8] sm:$0xff] }
 0x8bf   :  { %5839 = vtanh.f32 %v7438_v12 }
 0x8c0   :  { %5841 = vrcp.f32 %v2731_v21  ;;  %v5581_v21 = vpack.c.bf16 %v3130_v60, %v3129_v61 }
 0x8c1   :  { %5843 = vtanh.f32 %v7440_v10 }
 0x8c2   :  { %5845 = vrcp.f32 %v2732_v41  ;;  %v3113_v41 = vld [vmem:[%s7694_s2 + $0x50] sm:$0xff] }
 0x8c9   :  { %v5840_v56 = vpop.eup %5839 }
 0x8ca   :  { %v5842_v13 = vpop.eup %5841 }
 0x8cb   :  { %v5844_v7 = vpop.eup %5843  ;;  %v7444_v18 = vmul.f32 %v5842_v13, %v5840_v56  ;;  %v3114_v56 = vld [vmem:[%s7694_s2 + $0x58] sm:$0xff]  ;;  %v3131_v13 = vld [vmem:[%s7694_s2 + $0xe0] sm:$0xff] }
 0x8cc   :  { %v5846_v22 = vpop.eup %5845 }
 0x8cd   :  { %v2746_v6 = vmul.f32 %v5846_v22, %v5844_v7  ;;  %v5583_v7 = vpack.c.bf16 %v3114_v56, %v3113_v41  ;;  %v3132_v22 = vld [vmem:[%s7694_s2 + $0xe8] sm:$0xff]  ;;  %v3416_v41 = vld [vmem:[%s7692_s0 + $0x1f0] sm:$0xff] }
 0x8ce   :  { %v3415_v56 = vld [vmem:[%s7692_s0 + $0x1e8] sm:$0xff] }
 0x8cf   :  { %2820 = vmatprep.mubr.f32.mxu0 %v2746_v6  ;;  %2891 = vmatprep.mubr.f32.mxu1 %v2746_v6 }
 0x8d0   :  { %2821 = vmatmul.mubr.f32.vlgmr.msra.gmra.mrb[28].mxu0 %v7444_v18  ;;  %2892 = vmatmul.mubr.f32.vlgmr.msra.gmra.mrb[28].mxu1 %v7444_v18 }
 0x8d1   :  { %5436 = vmatpush1.bf16.msra.mxu0 %v8122_v30  ;;  %5500 = vmatpush1.bf16.msra.mxu1 %v8123_v62  ;;  %v8648_v30 = vld [vmem:[#allocation113_spill] sm:$0xff]  ;;  %v8649_v62 = vld [vmem:[#allocation114_spill] sm:$0xff] }
 0x8d2   :  { %2962 = vmatprep.mubr.f32.mxu0 %v2746_v6  ;;  %3033 = vmatprep.mubr.f32.mxu1 %v2746_v6  ;;  %v3115_v6 = vld [vmem:[%s7694_s2 + $0x60] sm:$0xff] }
 0x8d3   :  { %5438 = vmatprep.subr.bf16.mxu0 %v8124_v58  ;;  %5502 = vmatprep.subr.bf16.mxu1 %v8125_v48  ;;  %v8650_v58 = vld [vmem:[#allocation115_spill] sm:$0xff]  ;;  %v8651_v48 = vld [vmem:[#allocation116_spill] sm:$0xff] }
 0x8d5   :  { %5440 = vmatpush1.bf16.msra.mxu0 %v8126_v14  ;;  %5504 = vmatpush1.bf16.msra.mxu1 %v8127_v55  ;;  %v8652_v14 = vld [vmem:[#allocation117_spill] sm:$0xff]  ;;  %v8653_v55 = vld [vmem:[#allocation118_spill] sm:$0xff] }
 0x8d6   :  { %5442 = vmatprep.subr.bf16.mxu0 %v8128_v46  ;;  %5506 = vmatprep.subr.bf16.mxu1 %v8129_v47  ;;  %v8654_v46 = vld [vmem:[#allocation119_spill] sm:$0xff]  ;;  %v8655_v47 = vld [vmem:[#allocation120_spill] sm:$0xff] }
 0x8d9   :  { %5444 = vmatpush1.bf16.msra.mxu0 %v8208_v25  ;;  %5508 = vmatpush1.bf16.msra.mxu1 %v8209_v36  ;;  %v8656_v25 = vld [vmem:[#allocation121_spill] sm:$0xff]  ;;  %v8657_v36 = vld [vmem:[#allocation122_spill] sm:$0xff] }
 0x8da   :  { %5446 = vmatprep.subr.bf16.mxu0 %v8210_v37  ;;  %5510 = vmatprep.subr.bf16.mxu1 %v8211_v43  ;;  %v8659_v37 = vld [vmem:[#allocation124_spill] sm:$0xff]  ;;  %v8660_v43 = vld [vmem:[#allocation125_spill] sm:$0xff] }
 0x8dd   :  { %5448 = vmatpush1.bf16.msra.mxu0 %v8212_v50  ;;  %5512 = vmatpush1.bf16.msra.mxu1 %v8213_v29  ;;  %v8661_v50 = vld [vmem:[#allocation126_spill] sm:$0xff]  ;;  %v8662_v29 = vld [vmem:[#allocation127_spill] sm:$0xff] }
 0x8de   :  { %5450 = vmatprep.subr.bf16.mxu0 %v8214_v16  ;;  %5514 = vmatprep.subr.bf16.mxu1 %v8215_v34  ;;  %v8663_v16 = vld [vmem:[#allocation128_spill] sm:$0xff]  ;;  %v8664_v34 = vld [vmem:[#allocation129_spill] sm:$0xff] }
 0x8e1   :  { %5452 = vmatpush1.bf16.msra.mxu0 %v8216_v39  ;;  %5516 = vmatpush1.bf16.msra.mxu1 %v8217_v2  ;;  %v8665_v39 = vld [vmem:[#allocation130_spill] sm:$0xff]  ;;  %v8666_v2 = vld [vmem:[#allocation131_spill] sm:$0xff] }
 0x8e2   :  { %5454 = vmatprep.subr.bf16.mxu0 %v8296_v42  ;;  %5518 = vmatprep.subr.bf16.mxu1 %v8297_v49  ;;  %v3122_v42 = vld [vmem:[%s7694_s2 + $0x98] sm:$0xff] }
 0x8e5   :  { %5456 = vmatpush1.bf16.msra.mxu0 %v8298_v5  ;;  %5520 = vmatpush1.bf16.msra.mxu1 %v8299_v24  ;;  %v3105_v5 = vld [vmem:[%s7694_s2 + $0x10] sm:$0xff]  ;;  %v3106_v24 = vld [vmem:[%s7694_s2 + $0x18] sm:$0xff] }
 0x8e6   :  { %5458 = vmatprep.subr.bf16.mxu0 %v8300_v45  ;;  %5522 = vmatprep.subr.bf16.mxu1 %v8301_v11  ;;  %v5567_v45 = vpack.c.bf16 %v3106_v24, %v3105_v5  ;;  %v3123_v11 = vld [vmem:[%s7694_s2 + $0xa0] sm:$0xff] }
 0x8e9   :  { %5460 = vmatpush1.bf16.msra.mxu0 %v8302_v4  ;;  %5524 = vmatpush1.bf16.msra.mxu1 %v8303_v17  ;;  %v3124_v4 = vld [vmem:[%s7694_s2 + $0xa8] sm:$0xff] }
 0x8ea   :  { %5462 = vmatprep.subr.bf16.mxu0 %v8304_v59  ;;  %5526 = vmatprep.subr.bf16.mxu1 %v8305_v8  ;;  %v5569_v17 = vpack.c.bf16 %v3124_v4, %v3123_v11  ;;  %v3107_v59 = vld [vmem:[%s7694_s2 + $0x20] sm:$0xff]  ;;  %v3108_v8 = vld [vmem:[%s7694_s2 + $0x28] sm:$0xff]  ;;  %v3412_v4 = vld [vmem:[%s7692_s0 + $0x1d0] sm:$0xff] }
 0x8eb   :  { %v3410_v11 = vld [vmem:[%s7692_s0 + $0x1c0] sm:$0xff] }
 0x8ed   :  { %5464 = vmatpush1.bf16.msra.mxu0 %v8228_v20  ;;  %5528 = vmatpush1.bf16.msra.mxu1 %v8306_v9  ;;  %v3121_v20 = vld [vmem:[%s7694_s2 + $0x90] sm:$0xff]  ;;  %v5571_v9 = vpack.c.bf16 %v3108_v8, %v3107_v59  ;;  %v3413_v8 = vld [vmem:[%s7692_s0 + $0x1d8] sm:$0xff] }
 0x8ee   :  { %5466 = vmatprep.subr.bf16.mxu0 %v8230_v35  ;;  %5530 = vmatprep.subr.bf16.mxu1 %v8231_v53  ;;  %v8667_v35 = vld [vmem:[#allocation132_spill] sm:$0xff]  ;;  %v8668_v53 = vld [vmem:[#allocation133_spill] sm:$0xff]  ;;  %v5565_v49 = vpack.c.bf16 %v3122_v42, %v3121_v20 }
 0x8ef   :  { %v3225_v20 = vld [vmem:[%s7696_s4 + $0x68] sm:$0xff] }
 0x8f1   :  { %5468 = vmatpush1.bf16.msra.mxu0 %v8232_v52  ;;  %5532 = vmatpush1.bf16.msra.mxu1 %v8233_v40  ;;  %v8669_v52 = vld [vmem:[#allocation134_spill] sm:$0xff]  ;;  %v3119_v40 = vld [vmem:[%s7694_s2 + $0x80] sm:$0xff] }
 0x8f2   :  { %5470 = vmatprep.subr.bf16.mxu0 %v8234_v57  ;;  %5534 = vmatprep.subr.bf16.mxu1 %v8235_v63  ;;  %v3120_v57 = vld [vmem:[%s7694_s2 + $0x88] sm:$0xff] }
 0x8f3   :  { %v5561_v63 = vpack.c.bf16 %v3120_v57, %v3119_v40  ;;  %v3221_v40 = vld [vmem:[%s7696_s4 + $0x48] sm:$0xff] }
 0x8f5   :  { %5472 = vmatpush1.bf16.msra.mxu0 %v8236_v23  ;;  %5536 = vmatpush1.bf16.msra.mxu1 %v8237_v1  ;;  %v3103_v23 = vld [vmem:[%s7694_s2] sm:$0xff]  ;;  %v3104_v1 = vld [vmem:[%s7694_s2 + $0x8] sm:$0xff] }
 0x8f6   :  { %5474 = vmatprep.subr.bf16.mxu0 %v8238_v19  ;;  %5538 = vmatprep.subr.bf16.mxu1 %v8161_v3  ;;  %v8658_v3 = vld [vmem:[#allocation123_spill] sm:$0xff]  ;;  %v5563_v19 = vpack.c.bf16 %v3104_v1, %v3103_v23  ;;  %v3223_v23 = vld [vmem:[%s7696_s4 + $0x58] sm:$0xff] }
 0x8f9   :  { %5476 = vmatpush1.bf16.msra.mxu0 %v8648_v30  ;;  %5540 = vmatpush1.bf16.msra.mxu1 %v8649_v62  ;;  %v5585_v30 = vpack.c.bf16 %v3132_v22, %v3131_v13  ;;  %v3133_v62 = vld [vmem:[%s7694_s2 + $0xf0] sm:$0xff]  ;;  %v3417_v13 = vld [vmem:[%s7692_s0 + $0x1f8] sm:$0xff] }
 0x8fa   :  { %5478 = vmatprep.subr.bf16.mxu0 %v8650_v58  ;;  %5542 = vmatprep.subr.bf16.mxu1 %v8651_v48  ;;  %v3134_v58 = vld [vmem:[%s7694_s2 + $0xf8] sm:$0xff] }
 0x8fd   :  { %5480 = vmatpush1.bf16.msra.mxu0 %v8652_v14  ;;  %5544 = vmatpush1.bf16.msra.mxu1 %v8653_v55  ;;  %v5589_v14 = vpack.c.bf16 %v3134_v58, %v3133_v62  ;;  %v3117_v55 = vld [vmem:[%s7694_s2 + $0x70] sm:$0xff] }
 0x8fe   :  { %5482 = vmatprep.subr.bf16.mxu0 %v8654_v46  ;;  %5546 = vmatprep.subr.bf16.mxu1 %v8655_v47  ;;  %v3118_v46 = vld [vmem:[%s7694_s2 + $0x78] sm:$0xff] }
 0x8ff   :  { %v5591_v47 = vpack.c.bf16 %v3118_v46, %v3117_v55 }
 0x901   :  { %5484 = vmatpush1.bf16.msra.mxu0 %v8656_v25  ;;  %5548 = vmatpush1.bf16.msra.mxu1 %v8657_v36  ;;  %v3212_v25 = vld [vmem:[%s7696_s4] sm:$0xff]  ;;  %v3213_v36 = vld [vmem:[%s7696_s4 + $0x8] sm:$0xff] }
 0x902   :  { %5486 = vmatprep.subr.bf16.mxu0 %v8658_v3  ;;  %5550 = vmatprep.subr.bf16.mxu1 %v8659_v37  ;;  %v3214_v3 = vld [vmem:[%s7696_s4 + $0x10] sm:$0xff]  ;;  %v5911_v37 = vmov 0.0|0.0  }
 0x905   :  { %5488 = vmatpush1.bf16.msra.mxu0 %v8660_v43  ;;  %5552 = vmatpush1.bf16.msra.mxu1 %v8661_v50  ;;  %v5594_v43 = vpack.c.bf16 %v3213_v36, %v3212_v25  ;;  %v3215_v50 = vld [vmem:[%s7696_s4 + $0x18] sm:$0xff] }
 0x906   :  { %5490 = vmatprep.subr.bf16.mxu0 %v8662_v29  ;;  %5554 = vmatprep.subr.bf16.mxu1 %v8663_v16  ;;  %v5597_v29 = vpack.c.bf16 %v3215_v50, %v3214_v3  ;;  %v3216_v16 = vld [vmem:[%s7696_s4 + $0x20] sm:$0xff] }
 0x909   :  { %5492 = vmatpush1.bf16.msra.mxu0 %v8664_v34  ;;  %5556 = vmatpush1.bf16.msra.mxu1 %v8665_v39  ;;  %v3217_v34 = vld [vmem:[%s7696_s4 + $0x28] sm:$0xff] }
 0x90a   :  { %5494 = vmatprep.subr.bf16.mxu0 %v8666_v2  ;;  %5558 = vmatprep.subr.bf16.mxu1 %v8667_v35  ;;  %v5600_v39 = vpack.c.bf16 %v3217_v34, %v3216_v16  ;;  %v3218_v2 = vld [vmem:[%s7696_s4 + $0x30] sm:$0xff]  ;;  %v3219_v35 = vld [vmem:[%s7696_s4 + $0x38] sm:$0xff] }
 0x90d   :  { %5496 = vmatpush1.bf16.msra.mxu0 %v8668_v53  ;;  %5560 = vmatpush1.bf16.msra.mxu1 %v8669_v52  ;;  %v5603_v53 = vpack.c.bf16 %v3219_v35, %v3218_v2  ;;  %v3220_v52 = vld [vmem:[%s7696_s4 + $0x40] sm:$0xff] }
 0x90e   :  { %5562 = vmatprep.subr.bf16.mxu0 %v5561_v63  ;;  %5593 = vmatprep.subr.bf16.mxu1 %v5911_v37  ;;  %v5606_v57 = vpack.c.bf16 %v3221_v40, %v3220_v52  ;;  %v3222_v63 = vld [vmem:[%s7696_s4 + $0x50] sm:$0xff] }
 0x90f   :  { %v5609_v1 = vpack.c.bf16 %v3223_v23, %v3222_v63 }
 0x910   :  { %2963 = vmatmul.mubr.f32.vlgmr.msra.gmra.mrb[30].mxu0 %v7444_v18  ;;  %3034 = vmatmul.mubr.f32.vlgmr.msra.gmra.mrb[30].mxu1 %v7444_v18  ;;  %v3116_v18 = vld [vmem:[%s7694_s2 + $0x68] sm:$0xff] }
 0x911   :  { %5564 = vmatpush3.bf16.msra.mxu0 %v5563_v19  ;;  %v5587_v48 = vpack.c.bf16 %v3116_v18, %v3115_v6  ;;  %5595 = vmatpush3.bf16.msra.mxu1 %v5594_v43  ;;  %v3224_v19 = vld [vmem:[%s7696_s4 + $0x60] sm:$0xff] }
 0x912   :  { %5566 = vmatprep.subr.bf16.mxu0 %v5565_v49  ;;  %5596 = vmatprep.subr.bf16.mxu1 %v5911_v37  ;;  %v5612_v42 = vpack.c.bf16 %v3225_v20, %v3224_v19  ;;  %v3227_v19 = vld [vmem:[%s7696_s4 + $0x78] sm:$0xff] }
 0x915   :  { %5568 = vmatpush3.bf16.msra.mxu0 %v5567_v45  ;;  %5598 = vmatpush3.bf16.msra.mxu1 %v5597_v29 }
 0x916   :  { %5570 = vmatprep.subr.bf16.mxu0 %v5569_v17  ;;  %5599 = vmatprep.subr.bf16.mxu1 %v5911_v37  ;;  %v3411_v17 = vld [vmem:[%s7692_s0 + $0x1c8] sm:$0xff] }
 0x919   :  { %5572 = vmatpush3.bf16.msra.mxu0 %v5571_v9  ;;  %5601 = vmatpush3.bf16.msra.mxu1 %v5600_v39 }
 0x91a   :  { %5574 = vmatprep.subr.bf16.mxu0 %v5573_v51  ;;  %5602 = vmatprep.subr.bf16.mxu1 %v5911_v37 }
 0x91d   :  { %5576 = vmatpush3.bf16.msra.mxu0 %v5575_v54  ;;  %5604 = vmatpush3.bf16.msra.mxu1 %v5603_v53 }
 0x91e   :  { %5578 = vmatprep.subr.bf16.mxu0 %v5577_v33  ;;  %5605 = vmatprep.subr.bf16.mxu1 %v5911_v37 }
 0x921   :  { %5580 = vmatpush3.bf16.msra.mxu0 %v5579_v44  ;;  %5607 = vmatpush3.bf16.msra.mxu1 %v5606_v57 }
 0x922   :  { %5582 = vmatprep.subr.bf16.mxu0 %v5581_v21  ;;  %5608 = vmatprep.subr.bf16.mxu1 %v5911_v37  ;;  %v3414_v21 = vld [vmem:[%s7692_s0 + $0x1e0] sm:$0xff] }
 0x925   :  { %5584 = vmatpush3.bf16.msra.mxu0 %v5583_v7  ;;  %5610 = vmatpush3.bf16.msra.mxu1 %v5609_v1 }
 0x926   :  { %5586 = vmatprep.subr.bf16.mxu0 %v5585_v30  ;;  %5611 = vmatprep.subr.bf16.mxu1 %v5911_v37 }
 0x929   :  { %5588 = vmatpush3.bf16.msra.mxu0 %v5587_v48  ;;  %5613 = vmatpush3.bf16.msra.mxu1 %v5612_v42  ;;  %v8670_v42 = vmov 0.0  }
 0x92a   :  { %5590 = vmatprep.subr.bf16.mxu0 %v5589_v14  ;;  %5614 = vmatprep.subr.bf16.mxu1 %v5911_v37 }
 0x92b   :  { %3510 = vmatprep.mubr.msk.f32.mxu1 %vm5912_vm0, %v8670_v42 }
 0x92d   :  { %5592 = vmatpush3.bf16.msra.mxu0 %v5591_v47 }
 0x9a3   :  { %v2822_v49 = vpop.f32.mrb[28].mxu0  ;;  %v2893_v5 = vpop.f32.mrb[28].mxu1 }
 0x9a4   :  { %v2824_v24 = vpop.f32.mrb[29].mxu0  ;;  %v2895_v45 = vpop.f32.mrb[29].mxu1  ;;  %v3040_v59 = vadd.f32 %v3410_v11, %v2822_v49  ;;  %v3042_v9 = vadd.f32 %v3412_v4, %v2893_v5  ;;  %v3424_v5 = vld [vmem:[%s7695_s3] ss:$0 sm:$0xff] }
 0x9a5   :  { %v3041_v32 = vadd.f32 %v3411_v17, %v2824_v24  ;;  %v3043_v26 = vadd.f32 %v3413_v8, %v2895_v45  ;;  %v3425_v4 = vld [vmem:[%s7697_s5] ss:$0 sm:$0xff] }
 0x9a6   :  { %v3418_v51 = vmul.f32 -1.442695, %v3040_v59  ;;  %v3420_v31 = vmul.f32 -1.442695, %v3042_v9 }
 0x9a7   :  { %v3419_v38 = vmul.f32 -1.442695, %v3041_v32  ;;  %v3421_v54 = vmul.f32 -1.442695, %v3043_v26 }
 0x9a8   :  { %5847 = vpow2.f32 %v3418_v51 }
 0x9a9   :  { %5849 = vpow2.f32 %v3420_v31 }
 0x9aa   :  { %5851 = vpow2.f32 %v3419_v38 }
 0x9ab   :  { %5853 = vpow2.f32 %v3421_v54 }
 0x9b2   :  { %v5848_v28 = vpop.eup %5847 }
 0x9b3   :  { %v5850_v15 = vpop.eup %5849  ;;  %v3054_v0 = vadd.f32 1.0, %v5848_v28 }
 0x9b4   :  { %v5852_v33 = vpop.eup %5851  ;;  %v3066_v44 = vadd.f32 1.0, %v5850_v15 }
 0x9b5   :  { %v5854_v27 = vpop.eup %5853  ;;  %v3055_v61 = vadd.f32 1.0, %v5852_v33  ;;  %5855 = vrcp.f32 %v3054_v0 }
 0x9b6   :  { %v3067_v60 = vadd.f32 1.0, %v5854_v27  ;;  %5857 = vrcp.f32 %v3066_v44 }
 0x9b7   :  { %5859 = vrcp.f32 %v3055_v61 }
 0x9b8   :  { %5861 = vrcp.f32 %v3067_v60 }
 0x9bf   :  { %v5856_v46 = vpop.eup %5855 }
 0x9c0   :  { %v5858_v47 = vpop.eup %5857 }
 0x9c1   :  { %v5860_v25 = vpop.eup %5859  ;;  %v3086_v43 = vmul.f32 %v5858_v47, %v7438_v12 }
 0x9c2   :  { %v5862_v36 = vpop.eup %5861 }
 0x9c3   :  { %v3087_v16 = vmul.f32 %v5862_v36, %v7440_v10  ;;  %v3226_v10 = vld [vmem:[%s7696_s4 + $0x70] sm:$0xff] }
 0x9c4   :  { %v5615_v20 = vpack.c.bf16 %v3227_v19, %v3226_v10 }
 0x9c6   :  { %5616 = vmatpush3.bf16.msra.mxu1 %v5615_v20 }
 0x9e3   :  { %v2964_v7 = vpop.f32.mrb[30].mxu0  ;;  %v3035_v22 = vpop.f32.mrb[30].mxu1 }
 0x9e4   :  { %v3044_v6 = vadd.f32 %v3414_v21, %v2964_v7  ;;  %v3046_v18 = vadd.f32 %v3416_v41, %v3035_v22  ;;  %v2966_v30 = vpop.f32.mrb[31].mxu0  ;;  %v3037_v62 = vpop.f32.mrb[31].mxu1 }
 0x9e5   :  { %v3045_v58 = vadd.f32 %v3415_v56, %v2966_v30  ;;  %v3047_v48 = vadd.f32 %v3417_v13, %v3037_v62 }
 0x9e6   :  { %5863 = vtanh.f32 %v3044_v6  ;;  %v3422_v14 = vmul.f32 -1.442695, %v3046_v18 }
 0x9e7   :  { %5865 = vtanh.f32 %v3045_v58  ;;  %v3423_v55 = vmul.f32 -1.442695, %v3047_v48 }
 0x9e8   :  { %5867 = vpow2.f32 %v3422_v14 }
 0x9e9   :  { %5869 = vpow2.f32 %v3423_v55 }
 0x9f0   :  { %v5864_v3 = vpop.eup %5863 }
 0x9f1   :  { %v5866_v37 = vpop.eup %5865  ;;  %v3088_v50 = vmul.f32 %v5864_v3, %v5856_v46 }
 0x9f2   :  { %v5868_v29 = vpop.eup %5867  ;;  %v3089_v34 = vmul.f32 %v5866_v37, %v5860_v25 }
 0x9f3   :  { %v5870_v39 = vpop.eup %5869  ;;  %v3090_v2 = vadd.f32 %v3088_v50, %v3086_v43  ;;  %v3080_v35 = vadd.f32 1.0, %v5868_v29 }
 0x9f4   :  { %v3091_v53 = vadd.f32 %v3089_v34, %v3087_v16  ;;  %v3081_v52 = vadd.f32 1.0, %v5870_v39 }
 0x9f5   :  { %5871 = vtanh.f32 %v3090_v2 }
 0x9f6   :  { %5873 = vrcp.f32 %v3080_v35 }
 0x9f7   :  { %5875 = vtanh.f32 %v3091_v53 }
 0x9f8   :  { %5877 = vrcp.f32 %v3081_v52 }
 0x9ff   :  { %v5872_v40 = vpop.eup %5871 }
 0xa00   :  { %v5874_v57 = vpop.eup %5873 }
 0xa01   :  { %v5876_v63 = vpop.eup %5875  ;;  %v3094_v23 = vmul.f32 %v5874_v57, %v5872_v40 }
 0xa02   :  { %v5878_v1 = vpop.eup %5877 }
 0xa03   :  { %v3095_v12 = vmul.f32 %v5878_v1, %v5876_v63 }
 0xa05   :  { %3206 = vmatprep.mubr.f32.mxu0 %v3095_v12 }
 0xa06   :  { %3207 = vmatmul.mubr.f32.vlgmr.msra.gmra.mrb[32].mxu0 %v3094_v23 }
 0xad9   :  { %v3458_v49 = vpop.f32.mrb[32].mxu0 }
 0xada   :  { %v3459_v24 = vpop.f32.mrb[33].mxu0 }
 0xadb   :  { %v3460_v45 = vadd.f32 %v3459_v24, %v3458_v49 }
 0xadd   :  { %v3209_v11 = vadd.f32 %v3460_v45, %v3424_v5 }
 0xadf   :  { %3511 = vmatmul.mubr.f32.vlgmr.msra.gmra.mrb[32].mxu1 %v3209_v11 }
 0xbb2   :  { %v3301_v17 = vpop.f32.mrb[32].mxu1 }
 0xbb3   :  { %v3302_v59 = vadd.f32 %v3425_v4, %v3301_v17  ;;  %v3512_v8 = vpop.f32.mrb[33].mxu1 }
 0xbb5   :  { %3305 = vmax.xlane.f32.xlu0 %v3302_v59 }
 0xc42   :  { %v3306_v9 = vpop.xlane.xlu0 %3305 }
 0xc43   :  { %v3307_v32 = vsub.f32 %v3302_v59, %v3306_v9 }
 0xc45   :  { %v3308_v26 = vmul.f32 1.442695, %v3307_v32 }
 0xc47   :  { %5879 = vpow2.f32 %v3308_v26 }
 0xc51   :  { %v5880_v51 = vpop.eup %5879 }
 0xc52   :  { %3310 = vadd.xlane.f32.xlu0 %v5880_v51 }
 0xcdf   :  { %v3311_v31 = vpop.xlane.xlu0 %3310 }
 0xce0   :  { %5881 = vrcp.f32 %v3311_v31 }
 0xcea   :  { %v5882_v38 = vpop.eup %5881 }
 0xceb   :  { %v3313_v54 = vmul.f32 %v5882_v38, %v5880_v51 }
 0xced   :  { %3314 = vst [vmem:[%s7698_s6] sm:$0xff] %v3313_v54 }
 0xcee   :  { %3319 = vsyncpa [#allocation5], 1 }

</bundles_post_ra>
